<compile_context>
chip_gen: v6e
topology: v6e:2x2x1
jax: 0.10.0
libtpu: 0.0.40
codegen_flags: <defaults>
</compile_context>

<pallas_src>
import functools

import jax
import jax.numpy as jnp
from jax.experimental import pallas as pl
from jax.experimental.pallas import tpu as pltpu

CPAD = 128   # channel padding -> dense 128-lane layout everywhere
COL0 = 8     # sublane-aligned start column of the image interior in the halo scratch


def _conv_stack_kernel(x_ref, w_ref, b_ref, o_ref, pad_ref, acc_ref, *, H, W, C, L):
    """Run the full ConvBlock stack for one image (one grid step).

    x_ref:   (1, H, W, C)        f32  channel-padded NHWC input image
    w_ref:   (L, 9, C, C)        bf16 weights, tap index = 3*ky + kx, (cin, cout)
    b_ref:   (L, C)              f32  biases (zero in padded channels)
    o_ref:   (1, H, W, C)        f32  output (lane-dense: last dim = 128)
    pad_ref: (H+2, COL0+W+8, C)  f32  zero-halo activation scratch
    acc_ref: (H*W, C)            f32  matmul accumulator scratch
    """
    # Zero the halo scratch; the borders stay zero for every layer (only the
    # interior is overwritten below), which implements the pad=1 zero padding.
    pad_ref[...] = jnp.zeros_like(pad_ref)

    # Place this image's input in the interior: row offset 1 (untiled dim),
    # column offset COL0 (sublane-aligned) -> aligned store.
    pad_ref[1:1 + H, COL0:COL0 + W, :] = x_ref[0]

    for l in range(L):  # static unroll over layers (L is small)
        acc_ref[...] = jnp.zeros_like(acc_ref)
        for dy in range(3):
            for dx in range(3):
                # Shifted window for tap (dy, dx); unaligned sublane *read* is fine.
                c0 = COL0 - 1 + dx
                patch = pad_ref[dy:dy + H, c0:c0 + W, :]              # (H, W, C) f32
                lhs = patch.reshape(H * W, C).astype(jnp.bfloat16)    # bf16 MXU operand
                acc_ref[...] += jax.lax.dot_general(
                    lhs, w_ref[l, 3 * dy + dx, :, :],
                    dimension_numbers=(((1,), (0,)), ((), ())),
                    preferred_element_type=jnp.float32)               # f32 accumulation

        # Bias + ReLU in f32, fully lane-dense (256 x 128).
        y = jnp.maximum(acc_ref[...] + b_ref[l:l + 1, :], 0.0)

        if l < L - 1:
            # Feed the next layer: overwrite the interior (aligned store);
            # the zero halo is untouched.
            pad_ref[1:1 + H, COL0:COL0 + W, :] = y.reshape(H, W, C)
        else:
            o_ref[...] = y.reshape(1, H, W, C).astype(o_ref.dtype)


def conv_stack_pallas(x_nhwc, w_packed, b_packed):
    """Fused ConvBlock stack. x_nhwc: (N, H, W, CPAD) f32 (channels already padded)."""
    N, H, W, C = x_nhwc.shape
    L = w_packed.shape[0]
    wpad_cols = COL0 + W + 8  # halo scratch width (interior at [COL0, COL0+W))

    kernel = functools.partial(_conv_stack_kernel, H=H, W=W, C=C, L=L)

    return pl.pallas_call(
        kernel,
        out_shape=jax.ShapeDtypeStruct((N, H, W, C), jnp.float32),
        grid_spec=pltpu.PrefetchScalarGridSpec(
            num_scalar_prefetch=0,
            grid=(N,),  # one image per grid step
            in_specs=[
                pl.BlockSpec((1, H, W, C), lambda n: (n, 0, 0, 0)),
                pl.BlockSpec((L, 9, C, C), lambda n: (0, 0, 0, 0)),
                pl.BlockSpec((L, C), lambda n: (0, 0)),
            ],
            out_specs=pl.BlockSpec((1, H, W, C), lambda n: (n, 0, 0, 0)),
            scratch_shapes=[
                pltpu.VMEM((H + 2, wpad_cols, C), jnp.float32),  # halo'd activation
                pltpu.VMEM((H * W, C), jnp.float32),             # f32 accumulator
            ],
        ),
        compiler_params=pltpu.CompilerParams(
            dimension_semantics=("parallel",),      # v7x: 2 TCs, one image each
            vmem_limit_bytes=32 * 1024 * 1024,      # explicit budget (usage ~2 MiB)
        ),
    )(x_nhwc, w_packed, b_packed)


def pack_conv_stack(params, cpad):
    """Stack per-layer (Cout,Cin,3,3)/(Cout,) params into channel-padded, tap-major
    (L, 9, cpad, cpad) bf16 weights and (L, cpad) f32 biases."""
    L = len(params)
    w_all = jnp.zeros((L, 9, cpad, cpad), jnp.float32)
    b_all = jnp.zeros((L, cpad), jnp.float32)
    for l, (w, b) in enumerate(params):
        cout, cin = int(w.shape[0]), int(w.shape[1])
        assert cin <= cpad and cout <= cpad, "channel count exceeds lane padding"
        taps = jnp.transpose(w, (2, 3, 1, 0)).reshape(9, cin, cout)  # (3*ky+kx, cin, cout)
        w_all = w_all.at[l, :, :cin, :cout].set(taps)
        b_all = b_all.at[l, :cout].set(b)
    return w_all.astype(jnp.bfloat16), b_all


class BaseModelPallas:
    """JAX/Pallas analogue of BaseModel: build_conv_layers + a concrete forward that
    runs the resulting Sequential of ConvBlocks as a single fused Pallas kernel."""

    def __init__(self, layer_opts, key):
        self.layer_opts = list(layer_opts)
        self.params = []
        for opts in self.layer_opts:
            cin, cout = opts["in_channels"], opts["out_channels"]
            key, kw, kb = jax.random.split(key, 3)
            fan_in = cin * 3 * 3
            bound = 1.0 / (fan_in ** 0.5)
            w = jax.random.uniform(kw, (cout, cin, 3, 3), jnp.float32, -bound, bound)
            b = jax.random.uniform(kb, (cout,), jnp.float32, -bound, bound)
            self.params.append((w, b))
        # Pre-pack once (bf16 weights, channel-padded) for the fused kernel.
        self.w_packed, self.b_packed = pack_conv_stack(self.params, CPAD)
        self.cout_last = self.layer_opts[-1]["out_channels"]

    def num_parameters(self):
        return sum(int(w.size) + int(b.size) for w, b in self.params)

    @functools.partial(jax.jit, static_argnums=0)
    def forward(self, x_nchw):
        # NCHW (PyTorch convention) -> NHWC, channels zero-padded to the lane width.
        x = jnp.transpose(x_nchw, (0, 2, 3, 1))
        cin = x.shape[-1]
        x = jnp.pad(x, ((0, 0), (0, 0), (0, 0), (0, CPAD - cin)))
        y = conv_stack_pallas(x, self.w_packed, self.b_packed)
        y = y[..., : self.cout_last]          # drop channel padding
        return jnp.transpose(y, (0, 3, 1, 2))  # back to NCHW


def reference_forward(params, x_nchw):
    """Pure-JAX reference matching the kernel's numerics (bf16 operands, f32 accum)."""
    x = x_nchw
    for w, b in params:
        y = jax.lax.conv_general_dilated(
            x.astype(jnp.bfloat16), w.astype(jnp.bfloat16),
            window_strides=(1, 1), padding="SAME",
            dimension_numbers=("NCHW", "OIHW", "NCHW"),
            preferred_element_type=jnp.float32)
        x = jnp.maximum(y + b.reshape(1, -1, 1, 1), 0.0)
    return x


if __name__ == "__main__":
    key = jax.random.PRNGKey(0)
    k_model, k_x = jax.random.split(key)

    layer_opts = [
        {"in_channels": 4, "out_channels": 8},
        {"in_channels": 8, "out_channels": 8},
    ]
    model = BaseModelPallas(layer_opts, k_model)

    # small NCHW input: batch=2, channels=4, spatial=16x16
    x = jax.random.normal(k_x, (2, 4, 16, 16), jnp.float32)

    out = jax.block_until_ready(model.forward(x))

    ref = reference_forward(model.params, x)
    assert out.shape == (2, 8, 16, 16), out.shape
    assert jnp.allclose(out, ref, atol=2e-2, rtol=2e-2), (
        "mismatch vs reference, max abs diff = %s" % jnp.max(jnp.abs(out - ref)))

    print("KERNEL_OK")
</pallas_src>

<mosaic_0001>
module attributes {stable_mosaic.version = 11 : i64} {
  func.func @_conv_stack_kernel(%arg0: i32, %arg1: memref<1x16x16x128xf32, #tpu.memory_space<vmem>>, %arg2: memref<2x9x128x128xbf16, #tpu.memory_space<vmem>>, %arg3: memref<2x128xf32, #tpu.memory_space<vmem>>, %arg4: memref<1x16x16x128xf32, #tpu.memory_space<vmem>>, %arg5: memref<18x32x128xf32, #tpu.memory_space<vmem>>, %arg6: memref<256x128xf32, #tpu.memory_space<vmem>>) attributes {dimension_semantics = [#tpu.dimension_semantics<parallel>], iteration_bounds = array<i64: 2>, scalar_prefetch = 0 : i64, scratch_operands = 2 : i64, tpu.core_type = #tpu.core_type<tc>, window_params = [{transform_indices = @transform_0, window_bounds = array<i64: 1, 16, 16, 128>}, {pipeline_mode = #tpu.pipeline_mode<synchronous>, transform_indices = @transform_1, window_bounds = array<i64: 2, 9, 128, 128>}, {pipeline_mode = #tpu.pipeline_mode<synchronous>, transform_indices = @transform_2, window_bounds = array<i64: 2, 128>}, {transform_indices = @transform_3, window_bounds = array<i64: 1, 16, 16, 128>}]} {
    %cst = arith.constant 0.000000e+00 : f32
    %0 = vector.broadcast %cst : f32 to vector<18x32x128xf32>
    %c0 = arith.constant 0 : index
    %c0_0 = arith.constant 0 : index
    %c0_1 = arith.constant 0 : index
    %1 = vector.load %arg5[%c0, %c0_0, %c0_1] : memref<18x32x128xf32, #tpu.memory_space<vmem>>, vector<18x32x128xf32>
    tpu.vector_store %arg5[%c0, %c0_0, %c0_1], %0 {strides = array<i32>} : memref<18x32x128xf32, #tpu.memory_space<vmem>>, vector<18x32x128xf32>,
    %c0_2 = arith.constant 0 : index
    %c0_3 = arith.constant 0 : index
    %c0_4 = arith.constant 0 : index
    %c0_5 = arith.constant 0 : index
    %2 = vector.load %arg1[%c0_2, %c0_3, %c0_4, %c0_5] : memref<1x16x16x128xf32, #tpu.memory_space<vmem>>, vector<1x16x16x128xf32>
    %3 = vector.shape_cast %2 : vector<1x16x16x128xf32> to vector<16x16x128xf32>
    %c1 = arith.constant 1 : index
    %c8 = arith.constant 8 : index
    %c0_6 = arith.constant 0 : index
    %4 = vector.load %arg5[%c1, %c8, %c0_6] : memref<18x32x128xf32, #tpu.memory_space<vmem>>, vector<16x16x128xf32>
    tpu.vector_store %arg5[%c1, %c8, %c0_6], %3 {strides = array<i32>} : memref<18x32x128xf32, #tpu.memory_space<vmem>>, vector<16x16x128xf32>,
    %cst_7 = arith.constant 0.000000e+00 : f32
    %5 = vector.broadcast %cst_7 : f32 to vector<256x128xf32>
    %c0_8 = arith.constant 0 : index
    %c0_9 = arith.constant 0 : index
    %6 = vector.load %arg6[%c0_8, %c0_9] : memref<256x128xf32, #tpu.memory_space<vmem>>, vector<256x128xf32>
    tpu.vector_store %arg6[%c0_8, %c0_9], %5 {strides = array<i32>} : memref<256x128xf32, #tpu.memory_space<vmem>>, vector<256x128xf32>,
    %c0_10 = arith.constant 0 : index
    %c7 = arith.constant 7 : index
    %c0_11 = arith.constant 0 : index
    %7 = vector.load %arg5[%c0_10, %c7, %c0_11] : memref<18x32x128xf32, #tpu.memory_space<vmem>>, vector<16x16x128xf32>
    %8 = vector.shape_cast %7 : vector<16x16x128xf32> to vector<256x128xf32>
    %9 = arith.truncf %8 : vector<256x128xf32> to vector<256x128xbf16>
    %c0_12 = arith.constant 0 : index
    %c0_13 = arith.constant 0 : index
    %10 = vector.load %arg6[%c0_12, %c0_13] : memref<256x128xf32, #tpu.memory_space<vmem>>, vector<256x128xf32>
    %c0_14 = arith.constant 0 : index
    %c0_15 = arith.constant 0 : index
    %c0_16 = arith.constant 0 : index
    %c0_17 = arith.constant 0 : index
    %11 = vector.load %arg2[%c0_14, %c0_15, %c0_16, %c0_17] : memref<2x9x128x128xbf16, #tpu.memory_space<vmem>>, vector<1x1x128x128xbf16>
    %12 = vector.shape_cast %11 : vector<1x1x128x128xbf16> to vector<128x128xbf16>
    %cst_18 = arith.constant dense<0.000000e+00> : vector<256x128xf32>
    %13 = tpu.matmul %9, %12, %cst_18 {dimension_numbers = #tpu.dot_dimension_numbers<[1], [0], [0], [1], [0, 0, 1, 1], [], []>} : vector<256x128xbf16>, vector<128x128xbf16>, vector<256x128xf32> -> vector<256x128xf32>
    %14 = arith.addf %10, %13 : vector<256x128xf32>
    %c0_19 = arith.constant 0 : index
    %c0_20 = arith.constant 0 : index
    %15 = vector.load %arg6[%c0_19, %c0_20] : memref<256x128xf32, #tpu.memory_space<vmem>>, vector<256x128xf32>
    tpu.vector_store %arg6[%c0_19, %c0_20], %14 {strides = array<i32>} : memref<256x128xf32, #tpu.memory_space<vmem>>, vector<256x128xf32>,
    %c0_21 = arith.constant 0 : index
    %c8_22 = arith.constant 8 : index
    %c0_23 = arith.constant 0 : index
    %16 = vector.load %arg5[%c0_21, %c8_22, %c0_23] : memref<18x32x128xf32, #tpu.memory_space<vmem>>, vector<16x16x128xf32>
    %17 = vector.shape_cast %16 : vector<16x16x128xf32> to vector<256x128xf32>
    %18 = arith.truncf %17 : vector<256x128xf32> to vector<256x128xbf16>
    %c0_24 = arith.constant 0 : index
    %c0_25 = arith.constant 0 : index
    %19 = vector.load %arg6[%c0_24, %c0_25] : memref<256x128xf32, #tpu.memory_space<vmem>>, vector<256x128xf32>
    %c0_26 = arith.constant 0 : index
    %c1_27 = arith.constant 1 : index
    %c0_28 = arith.constant 0 : index
    %c0_29 = arith.constant 0 : index
    %20 = vector.load %arg2[%c0_26, %c1_27, %c0_28, %c0_29] : memref<2x9x128x128xbf16, #tpu.memory_space<vmem>>, vector<1x1x128x128xbf16>
    %21 = vector.shape_cast %20 : vector<1x1x128x128xbf16> to vector<128x128xbf16>
    %cst_30 = arith.constant dense<0.000000e+00> : vector<256x128xf32>
    %22 = tpu.matmul %18, %21, %cst_30 {dimension_numbers = #tpu.dot_dimension_numbers<[1], [0], [0], [1], [0, 0, 1, 1], [], []>} : vector<256x128xbf16>, vector<128x128xbf16>, vector<256x128xf32> -> vector<256x128xf32>
    %23 = arith.addf %19, %22 : vector<256x128xf32>
    %c0_31 = arith.constant 0 : index
    %c0_32 = arith.constant 0 : index
    %24 = vector.load %arg6[%c0_31, %c0_32] : memref<256x128xf32, #tpu.memory_space<vmem>>, vector<256x128xf32>
    tpu.vector_store %arg6[%c0_31, %c0_32], %23 {strides = array<i32>} : memref<256x128xf32, #tpu.memory_space<vmem>>, vector<256x128xf32>,
    %c0_33 = arith.constant 0 : index
    %c9 = arith.constant 9 : index
    %c0_34 = arith.constant 0 : index
    %25 = vector.load %arg5[%c0_33, %c9, %c0_34] : memref<18x32x128xf32, #tpu.memory_space<vmem>>, vector<16x16x128xf32>
    %26 = vector.shape_cast %25 : vector<16x16x128xf32> to vector<256x128xf32>
    %27 = arith.truncf %26 : vector<256x128xf32> to vector<256x128xbf16>
    %c0_35 = arith.constant 0 : index
    %c0_36 = arith.constant 0 : index
    %28 = vector.load %arg6[%c0_35, %c0_36] : memref<256x128xf32, #tpu.memory_space<vmem>>, vector<256x128xf32>
    %c0_37 = arith.constant 0 : index
    %c2 = arith.constant 2 : index
    %c0_38 = arith.constant 0 : index
    %c0_39 = arith.constant 0 : index
    %29 = vector.load %arg2[%c0_37, %c2, %c0_38, %c0_39] : memref<2x9x128x128xbf16, #tpu.memory_space<vmem>>, vector<1x1x128x128xbf16>
    %30 = vector.shape_cast %29 : vector<1x1x128x128xbf16> to vector<128x128xbf16>
    %cst_40 = arith.constant dense<0.000000e+00> : vector<256x128xf32>
    %31 = tpu.matmul %27, %30, %cst_40 {dimension_numbers = #tpu.dot_dimension_numbers<[1], [0], [0], [1], [0, 0, 1, 1], [], []>} : vector<256x128xbf16>, vector<128x128xbf16>, vector<256x128xf32> -> vector<256x128xf32>
    %32 = arith.addf %28, %31 : vector<256x128xf32>
    %c0_41 = arith.constant 0 : index
    %c0_42 = arith.constant 0 : index
    %33 = vector.load %arg6[%c0_41, %c0_42] : memref<256x128xf32, #tpu.memory_space<vmem>>, vector<256x128xf32>
    tpu.vector_store %arg6[%c0_41, %c0_42], %32 {strides = array<i32>} : memref<256x128xf32, #tpu.memory_space<vmem>>, vector<256x128xf32>,
    %c1_43 = arith.constant 1 : index
    %c7_44 = arith.constant 7 : index
    %c0_45 = arith.constant 0 : index
    %34 = vector.load %arg5[%c1_43, %c7_44, %c0_45] : memref<18x32x128xf32, #tpu.memory_space<vmem>>, vector<16x16x128xf32>
    %35 = vector.shape_cast %34 : vector<16x16x128xf32> to vector<256x128xf32>
    %36 = arith.truncf %35 : vector<256x128xf32> to vector<256x128xbf16>
    %c0_46 = arith.constant 0 : index
    %c0_47 = arith.constant 0 : index
    %37 = vector.load %arg6[%c0_46, %c0_47] : memref<256x128xf32, #tpu.memory_space<vmem>>, vector<256x128xf32>
    %c0_48 = arith.constant 0 : index
    %c3 = arith.constant 3 : index
    %c0_49 = arith.constant 0 : index
    %c0_50 = arith.constant 0 : index
    %38 = vector.load %arg2[%c0_48, %c3, %c0_49, %c0_50] : memref<2x9x128x128xbf16, #tpu.memory_space<vmem>>, vector<1x1x128x128xbf16>
    %39 = vector.shape_cast %38 : vector<1x1x128x128xbf16> to vector<128x128xbf16>
    %cst_51 = arith.constant dense<0.000000e+00> : vector<256x128xf32>
    %40 = tpu.matmul %36, %39, %cst_51 {dimension_numbers = #tpu.dot_dimension_numbers<[1], [0], [0], [1], [0, 0, 1, 1], [], []>} : vector<256x128xbf16>, vector<128x128xbf16>, vector<256x128xf32> -> vector<256x128xf32>
    %41 = arith.addf %37, %40 : vector<256x128xf32>
    %c0_52 = arith.constant 0 : index
    %c0_53 = arith.constant 0 : index
    %42 = vector.load %arg6[%c0_52, %c0_53] : memref<256x128xf32, #tpu.memory_space<vmem>>, vector<256x128xf32>
    tpu.vector_store %arg6[%c0_52, %c0_53], %41 {strides = array<i32>} : memref<256x128xf32, #tpu.memory_space<vmem>>, vector<256x128xf32>,
    %c1_54 = arith.constant 1 : index
    %c8_55 = arith.constant 8 : index
    %c0_56 = arith.constant 0 : index
    %43 = vector.load %arg5[%c1_54, %c8_55, %c0_56] : memref<18x32x128xf32, #tpu.memory_space<vmem>>, vector<16x16x128xf32>
    %44 = vector.shape_cast %43 : vector<16x16x128xf32> to vector<256x128xf32>
    %45 = arith.truncf %44 : vector<256x128xf32> to vector<256x128xbf16>
    %c0_57 = arith.constant 0 : index
    %c0_58 = arith.constant 0 : index
    %46 = vector.load %arg6[%c0_57, %c0_58] : memref<256x128xf32, #tpu.memory_space<vmem>>, vector<256x128xf32>
    %c0_59 = arith.constant 0 : index
    %c4 = arith.constant 4 : index
    %c0_60 = arith.constant 0 : index
    %c0_61 = arith.constant 0 : index
    %47 = vector.load %arg2[%c0_59, %c4, %c0_60, %c0_61] : memref<2x9x128x128xbf16, #tpu.memory_space<vmem>>, vector<1x1x128x128xbf16>
    %48 = vector.shape_cast %47 : vector<1x1x128x128xbf16> to vector<128x128xbf16>
    %cst_62 = arith.constant dense<0.000000e+00> : vector<256x128xf32>
    %49 = tpu.matmul %45, %48, %cst_62 {dimension_numbers = #tpu.dot_dimension_numbers<[1], [0], [0], [1], [0, 0, 1, 1], [], []>} : vector<256x128xbf16>, vector<128x128xbf16>, vector<256x128xf32> -> vector<256x128xf32>
    %50 = arith.addf %46, %49 : vector<256x128xf32>
    %c0_63 = arith.constant 0 : index
    %c0_64 = arith.constant 0 : index
    %51 = vector.load %arg6[%c0_63, %c0_64] : memref<256x128xf32, #tpu.memory_space<vmem>>, vector<256x128xf32>
    tpu.vector_store %arg6[%c0_63, %c0_64], %50 {strides = array<i32>} : memref<256x128xf32, #tpu.memory_space<vmem>>, vector<256x128xf32>,
    %c1_65 = arith.constant 1 : index
    %c9_66 = arith.constant 9 : index
    %c0_67 = arith.constant 0 : index
    %52 = vector.load %arg5[%c1_65, %c9_66, %c0_67] : memref<18x32x128xf32, #tpu.memory_space<vmem>>, vector<16x16x128xf32>
    %53 = vector.shape_cast %52 : vector<16x16x128xf32> to vector<256x128xf32>
    %54 = arith.truncf %53 : vector<256x128xf32> to vector<256x128xbf16>
    %c0_68 = arith.constant 0 : index
    %c0_69 = arith.constant 0 : index
    %55 = vector.load %arg6[%c0_68, %c0_69] : memref<256x128xf32, #tpu.memory_space<vmem>>, vector<256x128xf32>
    %c0_70 = arith.constant 0 : index
    %c5 = arith.constant 5 : index
    %c0_71 = arith.constant 0 : index
    %c0_72 = arith.constant 0 : index
    %56 = vector.load %arg2[%c0_70, %c5, %c0_71, %c0_72] : memref<2x9x128x128xbf16, #tpu.memory_space<vmem>>, vector<1x1x128x128xbf16>
    %57 = vector.shape_cast %56 : vector<1x1x128x128xbf16> to vector<128x128xbf16>
    %cst_73 = arith.constant dense<0.000000e+00> : vector<256x128xf32>
    %58 = tpu.matmul %54, %57, %cst_73 {dimension_numbers = #tpu.dot_dimension_numbers<[1], [0], [0], [1], [0, 0, 1, 1], [], []>} : vector<256x128xbf16>, vector<128x128xbf16>, vector<256x128xf32> -> vector<256x128xf32>
    %59 = arith.addf %55, %58 : vector<256x128xf32>
    %c0_74 = arith.constant 0 : index
    %c0_75 = arith.constant 0 : index
    %60 = vector.load %arg6[%c0_74, %c0_75] : memref<256x128xf32, #tpu.memory_space<vmem>>, vector<256x128xf32>
    tpu.vector_store %arg6[%c0_74, %c0_75], %59 {strides = array<i32>} : memref<256x128xf32, #tpu.memory_space<vmem>>, vector<256x128xf32>,
    %c2_76 = arith.constant 2 : index
    %c7_77 = arith.constant 7 : index
    %c0_78 = arith.constant 0 : index
    %61 = vector.load %arg5[%c2_76, %c7_77, %c0_78] : memref<18x32x128xf32, #tpu.memory_space<vmem>>, vector<16x16x128xf32>
    %62 = vector.shape_cast %61 : vector<16x16x128xf32> to vector<256x128xf32>
    %63 = arith.truncf %62 : vector<256x128xf32> to vector<256x128xbf16>
    %c0_79 = arith.constant 0 : index
    %c0_80 = arith.constant 0 : index
    %64 = vector.load %arg6[%c0_79, %c0_80] : memref<256x128xf32, #tpu.memory_space<vmem>>, vector<256x128xf32>
    %c0_81 = arith.constant 0 : index
    %c6 = arith.constant 6 : index
    %c0_82 = arith.constant 0 : index
    %c0_83 = arith.constant 0 : index
    %65 = vector.load %arg2[%c0_81, %c6, %c0_82, %c0_83] : memref<2x9x128x128xbf16, #tpu.memory_space<vmem>>, vector<1x1x128x128xbf16>
    %66 = vector.shape_cast %65 : vector<1x1x128x128xbf16> to vector<128x128xbf16>
    %cst_84 = arith.constant dense<0.000000e+00> : vector<256x128xf32>
    %67 = tpu.matmul %63, %66, %cst_84 {dimension_numbers = #tpu.dot_dimension_numbers<[1], [0], [0], [1], [0, 0, 1, 1], [], []>} : vector<256x128xbf16>, vector<128x128xbf16>, vector<256x128xf32> -> vector<256x128xf32>
    %68 = arith.addf %64, %67 : vector<256x128xf32>
    %c0_85 = arith.constant 0 : index
    %c0_86 = arith.constant 0 : index
    %69 = vector.load %arg6[%c0_85, %c0_86] : memref<256x128xf32, #tpu.memory_space<vmem>>, vector<256x128xf32>
    tpu.vector_store %arg6[%c0_85, %c0_86], %68 {strides = array<i32>} : memref<256x128xf32, #tpu.memory_space<vmem>>, vector<256x128xf32>,
    %c2_87 = arith.constant 2 : index
    %c8_88 = arith.constant 8 : index
    %c0_89 = arith.constant 0 : index
    %70 = vector.load %arg5[%c2_87, %c8_88, %c0_89] : memref<18x32x128xf32, #tpu.memory_space<vmem>>, vector<16x16x128xf32>
    %71 = vector.shape_cast %70 : vector<16x16x128xf32> to vector<256x128xf32>
    %72 = arith.truncf %71 : vector<256x128xf32> to vector<256x128xbf16>
    %c0_90 = arith.constant 0 : index
    %c0_91 = arith.constant 0 : index
    %73 = vector.load %arg6[%c0_90, %c0_91] : memref<256x128xf32, #tpu.memory_space<vmem>>, vector<256x128xf32>
    %c0_92 = arith.constant 0 : index
    %c7_93 = arith.constant 7 : index
    %c0_94 = arith.constant 0 : index
    %c0_95 = arith.constant 0 : index
    %74 = vector.load %arg2[%c0_92, %c7_93, %c0_94, %c0_95] : memref<2x9x128x128xbf16, #tpu.memory_space<vmem>>, vector<1x1x128x128xbf16>
    %75 = vector.shape_cast %74 : vector<1x1x128x128xbf16> to vector<128x128xbf16>
    %cst_96 = arith.constant dense<0.000000e+00> : vector<256x128xf32>
    %76 = tpu.matmul %72, %75, %cst_96 {dimension_numbers = #tpu.dot_dimension_numbers<[1], [0], [0], [1], [0, 0, 1, 1], [], []>} : vector<256x128xbf16>, vector<128x128xbf16>, vector<256x128xf32> -> vector<256x128xf32>
    %77 = arith.addf %73, %76 : vector<256x128xf32>
    %c0_97 = arith.constant 0 : index
    %c0_98 = arith.constant 0 : index
    %78 = vector.load %arg6[%c0_97, %c0_98] : memref<256x128xf32, #tpu.memory_space<vmem>>, vector<256x128xf32>
    tpu.vector_store %arg6[%c0_97, %c0_98], %77 {strides = array<i32>} : memref<256x128xf32, #tpu.memory_space<vmem>>, vector<256x128xf32>,
    %c2_99 = arith.constant 2 : index
    %c9_100 = arith.constant 9 : index
    %c0_101 = arith.constant 0 : index
    %79 = vector.load %arg5[%c2_99, %c9_100, %c0_101] : memref<18x32x128xf32, #tpu.memory_space<vmem>>, vector<16x16x128xf32>
    %80 = vector.shape_cast %79 : vector<16x16x128xf32> to vector<256x128xf32>
    %81 = arith.truncf %80 : vector<256x128xf32> to vector<256x128xbf16>
    %c0_102 = arith.constant 0 : index
    %c0_103 = arith.constant 0 : index
    %82 = vector.load %arg6[%c0_102, %c0_103] : memref<256x128xf32, #tpu.memory_space<vmem>>, vector<256x128xf32>
    %c0_104 = arith.constant 0 : index
    %c8_105 = arith.constant 8 : index
    %c0_106 = arith.constant 0 : index
    %c0_107 = arith.constant 0 : index
    %83 = vector.load %arg2[%c0_104, %c8_105, %c0_106, %c0_107] : memref<2x9x128x128xbf16, #tpu.memory_space<vmem>>, vector<1x1x128x128xbf16>
    %84 = vector.shape_cast %83 : vector<1x1x128x128xbf16> to vector<128x128xbf16>
    %cst_108 = arith.constant dense<0.000000e+00> : vector<256x128xf32>
    %85 = tpu.matmul %81, %84, %cst_108 {dimension_numbers = #tpu.dot_dimension_numbers<[1], [0], [0], [1], [0, 0, 1, 1], [], []>} : vector<256x128xbf16>, vector<128x128xbf16>, vector<256x128xf32> -> vector<256x128xf32>
    %86 = arith.addf %82, %85 : vector<256x128xf32>
    %c0_109 = arith.constant 0 : index
    %c0_110 = arith.constant 0 : index
    %87 = vector.load %arg6[%c0_109, %c0_110] : memref<256x128xf32, #tpu.memory_space<vmem>>, vector<256x128xf32>
    tpu.vector_store %arg6[%c0_109, %c0_110], %86 {strides = array<i32>} : memref<256x128xf32, #tpu.memory_space<vmem>>, vector<256x128xf32>,
    %c0_111 = arith.constant 0 : index
    %c0_112 = arith.constant 0 : index
    %88 = vector.load %arg6[%c0_111, %c0_112] : memref<256x128xf32, #tpu.memory_space<vmem>>, vector<256x128xf32>
    %c0_113 = arith.constant 0 : index
    %c0_114 = arith.constant 0 : index
    %89 = vector.load %arg3[%c0_113, %c0_114] : memref<2x128xf32, #tpu.memory_space<vmem>>, vector<1x128xf32>
    %90 = vector.broadcast %89 : vector<1x128xf32> to vector<256x128xf32>
    %91 = arith.addf %88, %90 : vector<256x128xf32>
    %cst_115 = arith.constant 0.000000e+00 : f32
    %92 = vector.broadcast %cst_115 : f32 to vector<256x128xf32>
    %93 = arith.maximumf %91, %92 : vector<256x128xf32>
    %94 = vector.shape_cast %93 : vector<256x128xf32> to vector<16x16x128xf32>
    %c1_116 = arith.constant 1 : index
    %c8_117 = arith.constant 8 : index
    %c0_118 = arith.constant 0 : index
    %95 = vector.load %arg5[%c1_116, %c8_117, %c0_118] : memref<18x32x128xf32, #tpu.memory_space<vmem>>, vector<16x16x128xf32>
    tpu.vector_store %arg5[%c1_116, %c8_117, %c0_118], %94 {strides = array<i32>} : memref<18x32x128xf32, #tpu.memory_space<vmem>>, vector<16x16x128xf32>,
    %cst_119 = arith.constant 0.000000e+00 : f32
    %96 = vector.broadcast %cst_119 : f32 to vector<256x128xf32>
    %c0_120 = arith.constant 0 : index
    %c0_121 = arith.constant 0 : index
    %97 = vector.load %arg6[%c0_120, %c0_121] : memref<256x128xf32, #tpu.memory_space<vmem>>, vector<256x128xf32>
    tpu.vector_store %arg6[%c0_120, %c0_121], %96 {strides = array<i32>} : memref<256x128xf32, #tpu.memory_space<vmem>>, vector<256x128xf32>,
    %c0_122 = arith.constant 0 : index
    %c7_123 = arith.constant 7 : index
    %c0_124 = arith.constant 0 : index
    %98 = vector.load %arg5[%c0_122, %c7_123, %c0_124] : memref<18x32x128xf32, #tpu.memory_space<vmem>>, vector<16x16x128xf32>
    %99 = vector.shape_cast %98 : vector<16x16x128xf32> to vector<256x128xf32>
    %100 = arith.truncf %99 : vector<256x128xf32> to vector<256x128xbf16>
    %c0_125 = arith.constant 0 : index
    %c0_126 = arith.constant 0 : index
    %101 = vector.load %arg6[%c0_125, %c0_126] : memref<256x128xf32, #tpu.memory_space<vmem>>, vector<256x128xf32>
    %c1_127 = arith.constant 1 : index
    %c0_128 = arith.constant 0 : index
    %c0_129 = arith.constant 0 : index
    %c0_130 = arith.constant 0 : index
    %102 = vector.load %arg2[%c1_127, %c0_128, %c0_129, %c0_130] : memref<2x9x128x128xbf16, #tpu.memory_space<vmem>>, vector<1x1x128x128xbf16>
    %103 = vector.shape_cast %102 : vector<1x1x128x128xbf16> to vector<128x128xbf16>
    %cst_131 = arith.constant dense<0.000000e+00> : vector<256x128xf32>
    %104 = tpu.matmul %100, %103, %cst_131 {dimension_numbers = #tpu.dot_dimension_numbers<[1], [0], [0], [1], [0, 0, 1, 1], [], []>} : vector<256x128xbf16>, vector<128x128xbf16>, vector<256x128xf32> -> vector<256x128xf32>
    %105 = arith.addf %101, %104 : vector<256x128xf32>
    %c0_132 = arith.constant 0 : index
    %c0_133 = arith.constant 0 : index
    %106 = vector.load %arg6[%c0_132, %c0_133] : memref<256x128xf32, #tpu.memory_space<vmem>>, vector<256x128xf32>
    tpu.vector_store %arg6[%c0_132, %c0_133], %105 {strides = array<i32>} : memref<256x128xf32, #tpu.memory_space<vmem>>, vector<256x128xf32>,
    %c0_134 = arith.constant 0 : index
    %c8_135 = arith.constant 8 : index
    %c0_136 = arith.constant 0 : index
    %107 = vector.load %arg5[%c0_134, %c8_135, %c0_136] : memref<18x32x128xf32, #tpu.memory_space<vmem>>, vector<16x16x128xf32>
    %108 = vector.shape_cast %107 : vector<16x16x128xf32> to vector<256x128xf32>
    %109 = arith.truncf %108 : vector<256x128xf32> to vector<256x128xbf16>
    %c0_137 = arith.constant 0 : index
    %c0_138 = arith.constant 0 : index
    %110 = vector.load %arg6[%c0_137, %c0_138] : memref<256x128xf32, #tpu.memory_space<vmem>>, vector<256x128xf32>
    %c1_139 = arith.constant 1 : index
    %c1_140 = arith.constant 1 : index
    %c0_141 = arith.constant 0 : index
    %c0_142 = arith.constant 0 : index
    %111 = vector.load %arg2[%c1_139, %c1_140, %c0_141, %c0_142] : memref<2x9x128x128xbf16, #tpu.memory_space<vmem>>, vector<1x1x128x128xbf16>
    %112 = vector.shape_cast %111 : vector<1x1x128x128xbf16> to vector<128x128xbf16>
    %cst_143 = arith.constant dense<0.000000e+00> : vector<256x128xf32>
    %113 = tpu.matmul %109, %112, %cst_143 {dimension_numbers = #tpu.dot_dimension_numbers<[1], [0], [0], [1], [0, 0, 1, 1], [], []>} : vector<256x128xbf16>, vector<128x128xbf16>, vector<256x128xf32> -> vector<256x128xf32>
    %114 = arith.addf %110, %113 : vector<256x128xf32>
    %c0_144 = arith.constant 0 : index
    %c0_145 = arith.constant 0 : index
    %115 = vector.load %arg6[%c0_144, %c0_145] : memref<256x128xf32, #tpu.memory_space<vmem>>, vector<256x128xf32>
    tpu.vector_store %arg6[%c0_144, %c0_145], %114 {strides = array<i32>} : memref<256x128xf32, #tpu.memory_space<vmem>>, vector<256x128xf32>,
    %c0_146 = arith.constant 0 : index
    %c9_147 = arith.constant 9 : index
    %c0_148 = arith.constant 0 : index
    %116 = vector.load %arg5[%c0_146, %c9_147, %c0_148] : memref<18x32x128xf32, #tpu.memory_space<vmem>>, vector<16x16x128xf32>
    %117 = vector.shape_cast %116 : vector<16x16x128xf32> to vector<256x128xf32>
    %118 = arith.truncf %117 : vector<256x128xf32> to vector<256x128xbf16>
    %c0_149 = arith.constant 0 : index
    %c0_150 = arith.constant 0 : index
    %119 = vector.load %arg6[%c0_149, %c0_150] : memref<256x128xf32, #tpu.memory_space<vmem>>, vector<256x128xf32>
    %c1_151 = arith.constant 1 : index
    %c2_152 = arith.constant 2 : index
    %c0_153 = arith.constant 0 : index
    %c0_154 = arith.constant 0 : index
    %120 = vector.load %arg2[%c1_151, %c2_152, %c0_153, %c0_154] : memref<2x9x128x128xbf16, #tpu.memory_space<vmem>>, vector<1x1x128x128xbf16>
    %121 = vector.shape_cast %120 : vector<1x1x128x128xbf16> to vector<128x128xbf16>
    %cst_155 = arith.constant dense<0.000000e+00> : vector<256x128xf32>
    %122 = tpu.matmul %118, %121, %cst_155 {dimension_numbers = #tpu.dot_dimension_numbers<[1], [0], [0], [1], [0, 0, 1, 1], [], []>} : vector<256x128xbf16>, vector<128x128xbf16>, vector<256x128xf32> -> vector<256x128xf32>
    %123 = arith.addf %119, %122 : vector<256x128xf32>
    %c0_156 = arith.constant 0 : index
    %c0_157 = arith.constant 0 : index
    %124 = vector.load %arg6[%c0_156, %c0_157] : memref<256x128xf32, #tpu.memory_space<vmem>>, vector<256x128xf32>
    tpu.vector_store %arg6[%c0_156, %c0_157], %123 {strides = array<i32>} : memref<256x128xf32, #tpu.memory_space<vmem>>, vector<256x128xf32>,
    %c1_158 = arith.constant 1 : index
    %c7_159 = arith.constant 7 : index
    %c0_160 = arith.constant 0 : index
    %125 = vector.load %arg5[%c1_158, %c7_159, %c0_160] : memref<18x32x128xf32, #tpu.memory_space<vmem>>, vector<16x16x128xf32>
    %126 = vector.shape_cast %125 : vector<16x16x128xf32> to vector<256x128xf32>
    %127 = arith.truncf %126 : vector<256x128xf32> to vector<256x128xbf16>
    %c0_161 = arith.constant 0 : index
    %c0_162 = arith.constant 0 : index
    %128 = vector.load %arg6[%c0_161, %c0_162] : memref<256x128xf32, #tpu.memory_space<vmem>>, vector<256x128xf32>
    %c1_163 = arith.constant 1 : index
    %c3_164 = arith.constant 3 : index
    %c0_165 = arith.constant 0 : index
    %c0_166 = arith.constant 0 : index
    %129 = vector.load %arg2[%c1_163, %c3_164, %c0_165, %c0_166] : memref<2x9x128x128xbf16, #tpu.memory_space<vmem>>, vector<1x1x128x128xbf16>
    %130 = vector.shape_cast %129 : vector<1x1x128x128xbf16> to vector<128x128xbf16>
    %cst_167 = arith.constant dense<0.000000e+00> : vector<256x128xf32>
    %131 = tpu.matmul %127, %130, %cst_167 {dimension_numbers = #tpu.dot_dimension_numbers<[1], [0], [0], [1], [0, 0, 1, 1], [], []>} : vector<256x128xbf16>, vector<128x128xbf16>, vector<256x128xf32> -> vector<256x128xf32>
    %132 = arith.addf %128, %131 : vector<256x128xf32>
    %c0_168 = arith.constant 0 : index
    %c0_169 = arith.constant 0 : index
    %133 = vector.load %arg6[%c0_168, %c0_169] : memref<256x128xf32, #tpu.memory_space<vmem>>, vector<256x128xf32>
    tpu.vector_store %arg6[%c0_168, %c0_169], %132 {strides = array<i32>} : memref<256x128xf32, #tpu.memory_space<vmem>>, vector<256x128xf32>,
    %c1_170 = arith.constant 1 : index
    %c8_171 = arith.constant 8 : index
    %c0_172 = arith.constant 0 : index
    %134 = vector.load %arg5[%c1_170, %c8_171, %c0_172] : memref<18x32x128xf32, #tpu.memory_space<vmem>>, vector<16x16x128xf32>
    %135 = vector.shape_cast %134 : vector<16x16x128xf32> to vector<256x128xf32>
    %136 = arith.truncf %135 : vector<256x128xf32> to vector<256x128xbf16>
    %c0_173 = arith.constant 0 : index
    %c0_174 = arith.constant 0 : index
    %137 = vector.load %arg6[%c0_173, %c0_174] : memref<256x128xf32, #tpu.memory_space<vmem>>, vector<256x128xf32>
    %c1_175 = arith.constant 1 : index
    %c4_176 = arith.constant 4 : index
    %c0_177 = arith.constant 0 : index
    %c0_178 = arith.constant 0 : index
    %138 = vector.load %arg2[%c1_175, %c4_176, %c0_177, %c0_178] : memref<2x9x128x128xbf16, #tpu.memory_space<vmem>>, vector<1x1x128x128xbf16>
    %139 = vector.shape_cast %138 : vector<1x1x128x128xbf16> to vector<128x128xbf16>
    %cst_179 = arith.constant dense<0.000000e+00> : vector<256x128xf32>
    %140 = tpu.matmul %136, %139, %cst_179 {dimension_numbers = #tpu.dot_dimension_numbers<[1], [0], [0], [1], [0, 0, 1, 1], [], []>} : vector<256x128xbf16>, vector<128x128xbf16>, vector<256x128xf32> -> vector<256x128xf32>
    %141 = arith.addf %137, %140 : vector<256x128xf32>
    %c0_180 = arith.constant 0 : index
    %c0_181 = arith.constant 0 : index
    %142 = vector.load %arg6[%c0_180, %c0_181] : memref<256x128xf32, #tpu.memory_space<vmem>>, vector<256x128xf32>
    tpu.vector_store %arg6[%c0_180, %c0_181], %141 {strides = array<i32>} : memref<256x128xf32, #tpu.memory_space<vmem>>, vector<256x128xf32>,
    %c1_182 = arith.constant 1 : index
    %c9_183 = arith.constant 9 : index
    %c0_184 = arith.constant 0 : index
    %143 = vector.load %arg5[%c1_182, %c9_183, %c0_184] : memref<18x32x128xf32, #tpu.memory_space<vmem>>, vector<16x16x128xf32>
    %144 = vector.shape_cast %143 : vector<16x16x128xf32> to vector<256x128xf32>
    %145 = arith.truncf %144 : vector<256x128xf32> to vector<256x128xbf16>
    %c0_185 = arith.constant 0 : index
    %c0_186 = arith.constant 0 : index
    %146 = vector.load %arg6[%c0_185, %c0_186] : memref<256x128xf32, #tpu.memory_space<vmem>>, vector<256x128xf32>
    %c1_187 = arith.constant 1 : index
    %c5_188 = arith.constant 5 : index
    %c0_189 = arith.constant 0 : index
    %c0_190 = arith.constant 0 : index
    %147 = vector.load %arg2[%c1_187, %c5_188, %c0_189, %c0_190] : memref<2x9x128x128xbf16, #tpu.memory_space<vmem>>, vector<1x1x128x128xbf16>
    %148 = vector.shape_cast %147 : vector<1x1x128x128xbf16> to vector<128x128xbf16>
    %cst_191 = arith.constant dense<0.000000e+00> : vector<256x128xf32>
    %149 = tpu.matmul %145, %148, %cst_191 {dimension_numbers = #tpu.dot_dimension_numbers<[1], [0], [0], [1], [0, 0, 1, 1], [], []>} : vector<256x128xbf16>, vector<128x128xbf16>, vector<256x128xf32> -> vector<256x128xf32>
    %150 = arith.addf %146, %149 : vector<256x128xf32>
    %c0_192 = arith.constant 0 : index
    %c0_193 = arith.constant 0 : index
    %151 = vector.load %arg6[%c0_192, %c0_193] : memref<256x128xf32, #tpu.memory_space<vmem>>, vector<256x128xf32>
    tpu.vector_store %arg6[%c0_192, %c0_193], %150 {strides = array<i32>} : memref<256x128xf32, #tpu.memory_space<vmem>>, vector<256x128xf32>,
    %c2_194 = arith.constant 2 : index
    %c7_195 = arith.constant 7 : index
    %c0_196 = arith.constant 0 : index
    %152 = vector.load %arg5[%c2_194, %c7_195, %c0_196] : memref<18x32x128xf32, #tpu.memory_space<vmem>>, vector<16x16x128xf32>
    %153 = vector.shape_cast %152 : vector<16x16x128xf32> to vector<256x128xf32>
    %154 = arith.truncf %153 : vector<256x128xf32> to vector<256x128xbf16>
    %c0_197 = arith.constant 0 : index
    %c0_198 = arith.constant 0 : index
    %155 = vector.load %arg6[%c0_197, %c0_198] : memref<256x128xf32, #tpu.memory_space<vmem>>, vector<256x128xf32>
    %c1_199 = arith.constant 1 : index
    %c6_200 = arith.constant 6 : index
    %c0_201 = arith.constant 0 : index
    %c0_202 = arith.constant 0 : index
    %156 = vector.load %arg2[%c1_199, %c6_200, %c0_201, %c0_202] : memref<2x9x128x128xbf16, #tpu.memory_space<vmem>>, vector<1x1x128x128xbf16>
    %157 = vector.shape_cast %156 : vector<1x1x128x128xbf16> to vector<128x128xbf16>
    %cst_203 = arith.constant dense<0.000000e+00> : vector<256x128xf32>
    %158 = tpu.matmul %154, %157, %cst_203 {dimension_numbers = #tpu.dot_dimension_numbers<[1], [0], [0], [1], [0, 0, 1, 1], [], []>} : vector<256x128xbf16>, vector<128x128xbf16>, vector<256x128xf32> -> vector<256x128xf32>
    %159 = arith.addf %155, %158 : vector<256x128xf32>
    %c0_204 = arith.constant 0 : index
    %c0_205 = arith.constant 0 : index
    %160 = vector.load %arg6[%c0_204, %c0_205] : memref<256x128xf32, #tpu.memory_space<vmem>>, vector<256x128xf32>
    tpu.vector_store %arg6[%c0_204, %c0_205], %159 {strides = array<i32>} : memref<256x128xf32, #tpu.memory_space<vmem>>, vector<256x128xf32>,
    %c2_206 = arith.constant 2 : index
    %c8_207 = arith.constant 8 : index
    %c0_208 = arith.constant 0 : index
    %161 = vector.load %arg5[%c2_206, %c8_207, %c0_208] : memref<18x32x128xf32, #tpu.memory_space<vmem>>, vector<16x16x128xf32>
    %162 = vector.shape_cast %161 : vector<16x16x128xf32> to vector<256x128xf32>
    %163 = arith.truncf %162 : vector<256x128xf32> to vector<256x128xbf16>
    %c0_209 = arith.constant 0 : index
    %c0_210 = arith.constant 0 : index
    %164 = vector.load %arg6[%c0_209, %c0_210] : memref<256x128xf32, #tpu.memory_space<vmem>>, vector<256x128xf32>
    %c1_211 = arith.constant 1 : index
    %c7_212 = arith.constant 7 : index
    %c0_213 = arith.constant 0 : index
    %c0_214 = arith.constant 0 : index
    %165 = vector.load %arg2[%c1_211, %c7_212, %c0_213, %c0_214] : memref<2x9x128x128xbf16, #tpu.memory_space<vmem>>, vector<1x1x128x128xbf16>
    %166 = vector.shape_cast %165 : vector<1x1x128x128xbf16> to vector<128x128xbf16>
    %cst_215 = arith.constant dense<0.000000e+00> : vector<256x128xf32>
    %167 = tpu.matmul %163, %166, %cst_215 {dimension_numbers = #tpu.dot_dimension_numbers<[1], [0], [0], [1], [0, 0, 1, 1], [], []>} : vector<256x128xbf16>, vector<128x128xbf16>, vector<256x128xf32> -> vector<256x128xf32>
    %168 = arith.addf %164, %167 : vector<256x128xf32>
    %c0_216 = arith.constant 0 : index
    %c0_217 = arith.constant 0 : index
    %169 = vector.load %arg6[%c0_216, %c0_217] : memref<256x128xf32, #tpu.memory_space<vmem>>, vector<256x128xf32>
    tpu.vector_store %arg6[%c0_216, %c0_217], %168 {strides = array<i32>} : memref<256x128xf32, #tpu.memory_space<vmem>>, vector<256x128xf32>,
    %c2_218 = arith.constant 2 : index
    %c9_219 = arith.constant 9 : index
    %c0_220 = arith.constant 0 : index
    %170 = vector.load %arg5[%c2_218, %c9_219, %c0_220] : memref<18x32x128xf32, #tpu.memory_space<vmem>>, vector<16x16x128xf32>
    %171 = vector.shape_cast %170 : vector<16x16x128xf32> to vector<256x128xf32>
    %172 = arith.truncf %171 : vector<256x128xf32> to vector<256x128xbf16>
    %c0_221 = arith.constant 0 : index
    %c0_222 = arith.constant 0 : index
    %173 = vector.load %arg6[%c0_221, %c0_222] : memref<256x128xf32, #tpu.memory_space<vmem>>, vector<256x128xf32>
    %c1_223 = arith.constant 1 : index
    %c8_224 = arith.constant 8 : index
    %c0_225 = arith.constant 0 : index
    %c0_226 = arith.constant 0 : index
    %174 = vector.load %arg2[%c1_223, %c8_224, %c0_225, %c0_226] : memref<2x9x128x128xbf16, #tpu.memory_space<vmem>>, vector<1x1x128x128xbf16>
    %175 = vector.shape_cast %174 : vector<1x1x128x128xbf16> to vector<128x128xbf16>
    %cst_227 = arith.constant dense<0.000000e+00> : vector<256x128xf32>
    %176 = tpu.matmul %172, %175, %cst_227 {dimension_numbers = #tpu.dot_dimension_numbers<[1], [0], [0], [1], [0, 0, 1, 1], [], []>} : vector<256x128xbf16>, vector<128x128xbf16>, vector<256x128xf32> -> vector<256x128xf32>
    %177 = arith.addf %173, %176 : vector<256x128xf32>
    %c0_228 = arith.constant 0 : index
    %c0_229 = arith.constant 0 : index
    %178 = vector.load %arg6[%c0_228, %c0_229] : memref<256x128xf32, #tpu.memory_space<vmem>>, vector<256x128xf32>
    tpu.vector_store %arg6[%c0_228, %c0_229], %177 {strides = array<i32>} : memref<256x128xf32, #tpu.memory_space<vmem>>, vector<256x128xf32>,
    %c0_230 = arith.constant 0 : index
    %c0_231 = arith.constant 0 : index
    %179 = vector.load %arg6[%c0_230, %c0_231] : memref<256x128xf32, #tpu.memory_space<vmem>>, vector<256x128xf32>
    %c1_232 = arith.constant 1 : index
    %c0_233 = arith.constant 0 : index
    %180 = vector.load %arg3[%c1_232, %c0_233] : memref<2x128xf32, #tpu.memory_space<vmem>>, vector<1x128xf32>
    %181 = vector.broadcast %180 : vector<1x128xf32> to vector<256x128xf32>
    %182 = arith.addf %179, %181 : vector<256x128xf32>
    %cst_234 = arith.constant 0.000000e+00 : f32
    %183 = vector.broadcast %cst_234 : f32 to vector<256x128xf32>
    %184 = arith.maximumf %182, %183 : vector<256x128xf32>
    %185 = vector.shape_cast %184 : vector<256x128xf32> to vector<1x16x16x128xf32>
    %c0_235 = arith.constant 0 : index
    %c0_236 = arith.constant 0 : index
    %c0_237 = arith.constant 0 : index
    %c0_238 = arith.constant 0 : index
    %186 = vector.load %arg4[%c0_235, %c0_236, %c0_237, %c0_238] : memref<1x16x16x128xf32, #tpu.memory_space<vmem>>, vector<1x16x16x128xf32>
    tpu.vector_store %arg4[%c0_235, %c0_236, %c0_237, %c0_238], %185 {strides = array<i32>} : memref<1x16x16x128xf32, #tpu.memory_space<vmem>>, vector<1x16x16x128xf32>,
    return
  }
  func.func @transform_0(%arg0: i32) -> (i32, i32, i32, i32) {
    %c0_i32 = arith.constant 0 : i32
    %c0_i32_0 = arith.constant 0 : i32
    %c0_i32_1 = arith.constant 0 : i32
    %c0_i32_2 = arith.constant 0 : i32
    return %arg0, %c0_i32, %c0_i32_0, %c0_i32_1 : i32, i32, i32, i32
  }
  func.func @transform_1(%arg0: i32) -> (i32, i32, i32, i32) {
    %c0_i32 = arith.constant 0 : i32
    %c0_i32_0 = arith.constant 0 : i32
    %c0_i32_1 = arith.constant 0 : i32
    %c0_i32_2 = arith.constant 0 : i32
    %c0_i32_3 = arith.constant 0 : i32
    return %c0_i32, %c0_i32_0, %c0_i32_1, %c0_i32_2 : i32, i32, i32, i32
  }
  func.func @transform_2(%arg0: i32) -> (i32, i32) {
    %c0_i32 = arith.constant 0 : i32
    %c0_i32_0 = arith.constant 0 : i32
    %c0_i32_1 = arith.constant 0 : i32
    return %c0_i32, %c0_i32_0 : i32, i32
  }
  func.func @transform_3(%arg0: i32) -> (i32, i32, i32, i32) {
    %c0_i32 = arith.constant 0 : i32
    %c0_i32_0 = arith.constant 0 : i32
    %c0_i32_1 = arith.constant 0 : i32
    %c0_i32_2 = arith.constant 0 : i32
    return %arg0, %c0_i32, %c0_i32_0, %c0_i32_1 : i32, i32, i32, i32
  }
}

</mosaic_0001>

<bundles_post_ra>
// kernel: forward.1
= control target key start
LH: loop header
LB: loop body
LE: loop exit
PB: predicated region body
PF: predicated region fallthrough
CT: control target
= control target key end

     0   :  { %s9266_s12 = smov 0   ;;  %s11538_s0 = inlined_call_operand.vmem [shape: f32[2,16,16,128], index: 0, kind: input, shape index: {}]   ;;  %s11539_s1 = inlined_call_operand.vmem [shape: bf16[2,9,128,128], index: 1, kind: input, shape index: {}]   ;;  %s11540_s2 = inlined_call_operand.vmem [shape: f32[2,128], index: 2, kind: input, shape index: {}]   ;;  %s11541_s3 = inlined_call_operand.vmem [shape: f32[2,16,16,128], index: 3, kind: output, shape index: {}]  }
   0x1 LB: > { %s7354_s13 = sadd.s32 4294967295, %s9242_s12   ;;  %p7358_p0 = scmp.ge.s32.totalorder %s9242_s12, 1  ;;  %s9242_s12 = sphi %s9266_s12, %s13_s12  }
   0x2   : > { %p137_p1 = scmp.lt.s32.totalorder %s9242_s12, 3 }
   0x4   : > { %p138_p2 = pnand %p7358_p0, %p137_p1 }
   0x6   : > { %141 = sbr.rel (%p138_p2) target bundleno = 1034 (0x40a), region = 32 }
   0xb   : > { %v9090_v0 = vld [vmem:[%s11539_s1 + $0x38] sm:$0xff]   ;;  %v9244_v2 = vmov 0.0   ;;  %v9092_v3 = vld [vmem:[%s11539_s1 + $0x30] sm:$0xff]   ;;  %p161_p3 = scmp.lt.s32.totalorder %s7354_s13, 1  ;;  %v9094_v5 = vld [vmem:[%s11539_s1 + $0x28] sm:$0xff]   ;;  %v9245_v7 = vmov 0.0|0.0  }
   0xc   : > { %v9091_v1 = vld [vmem:[%s11539_s1 + $0x78] sm:$0xff]   ;;  %172 = vst [vmem:[#allocation2] sm:$0xff] %v9244_v2  ;;  %173 = vst [vmem:[#allocation2 + $0x8] sm:$0xff] %v9244_v2  ;;  %8217 = vmatprep.subr.bf16.mxu0 %v9090_v0  ;;  %v9093_v4 = vld [vmem:[%s11539_s1 + $0x70] sm:$0xff]   ;;  %8281 = vmatprep.mubr.bf16.mxu1 %v9245_v7 }
   0xd   : > { %174 = vst [vmem:[#allocation2 + $0x10] sm:$0xff] %v9244_v2  ;;  %175 = vst [vmem:[#allocation2 + $0x18] sm:$0xff] %v9244_v2  ;;  %8265 = vmatprep.subr.bf16.mxu1 %v9091_v1  ;;  %8218 = vmatpush3.bf16.msra.mxu0 %v9090_v0  ;;  %v9095_v6 = vld [vmem:[%s11539_s1 + $0x68] sm:$0xff]   ;;  %s11817_s13 = smov (!%p161_p3, %s7354_s13), 1  ;;  %v9096_v8 = vld [vmem:[%s11539_s1 + $0x20] sm:$0xff]  }
   0xe   : > { %176 = vst [vmem:[#allocation2 + $0x20] sm:$0xff] %v9244_v2  ;;  %179 = vst [vmem:[#allocation2 + $0x38] sm:$0xff] %v9244_v2  ;;  %8266 = vmatpush3.bf16.msra.mxu1 %v9091_v1  ;;  %8219 = vmatprep.subr.bf16.mxu0 %v9092_v3  ;;  %v9097_v9 = vld [vmem:[%s11539_s1 + $0x60] sm:$0xff]   ;;  %s7783_s30 = sshll.u32 %s11817_s13, 8  ;;  %v9098_v10 = vld [vmem:[%s11539_s1 + $0x18] sm:$0xff]  }
   0xf   : > { %180 = vst [vmem:[#allocation2 + $0x40] sm:$0xff] %v9244_v2  ;;  %183 = vst [vmem:[#allocation2 + $0x58] sm:$0xff] %v9244_v2  ;;  %8267 = vmatprep.subr.bf16.mxu1 %v9093_v4  ;;  %v9099_v11 = vld [vmem:[%s11539_s1 + $0x58] sm:$0xff]   ;;  %s9316_s10 = scalar_lea.vmem %s11538_s0, %s7783_s30  ;;  %v9100_v12 = vld [vmem:[%s11539_s1 + $0x10] sm:$0xff]   ;;  %s11361_s24 = scalar_lea.vmem %s11541_s3, %s7783_s30 }
  0x10   : > { %184 = vst [vmem:[#allocation2 + $0x60] sm:$0xff] %v9244_v2  ;;  %187 = vst [vmem:[#allocation2 + $0x78] sm:$0xff] %v9244_v2  ;;  %v9101_v13 = vld [vmem:[%s11539_s1 + $0x50] sm:$0xff]   ;;  %v244_v16 = vld [vmem:[%s9316_s10] sm:$0xff] }
  0x11   : > { %188 = vst [vmem:[#allocation2 + $0x80] sm:$0xff] %v9244_v2  ;;  %191 = vst [vmem:[#allocation2 + $0x98] sm:$0xff] %v9244_v2  ;;  %8220 = vmatpush3.bf16.msra.mxu0 %v9092_v3  ;;  %v245_v18 = vld [vmem:[%s9316_s10 + $0x8] sm:$0xff]  ;;  %v246_v20 = vld [vmem:[%s9316_s10 + $0x10] sm:$0xff] }
  0x12   : > { %192 = vst [vmem:[#allocation2 + $0xa0] sm:$0xff] %v9244_v2  ;;  %195 = vst [vmem:[#allocation2 + $0xb8] sm:$0xff] %v9244_v2  ;;  %8268 = vmatpush3.bf16.msra.mxu1 %v9093_v4  ;;  %8221 = vmatprep.subr.bf16.mxu0 %v9094_v5  ;;  %v9102_v19 = vld [vmem:[%s11539_s1 + $0x8] sm:$0xff]   ;;  %v247_v21 = vld [vmem:[%s9316_s10 + $0x18] sm:$0xff]  ;;  %v9401_v45 = vpack.c.bf16 %v245_v18, %v244_v16 }
  0x13   : > { %196 = vst [vmem:[#allocation2 + $0xc0] sm:$0xff] %v9244_v2  ;;  %199 = vst [vmem:[#allocation2 + $0xd8] sm:$0xff] %v9244_v2  ;;  %8269 = vmatprep.subr.bf16.mxu1 %v9095_v6  ;;  %v341_v14 = vld [vmem:[#allocation2 + $0x7] sm:$0xff]  ;;  %v9343_v25 = vld [vmem:[%s9316_s10 + $0x30] sm:$0xff]  ;;  %v9405_v47 = vpack.c.bf16 %v247_v21, %v246_v20 }
  0x14   : > { %200 = vst [vmem:[#allocation2 + $0xe0] sm:$0xff] %v9244_v2  ;;  %203 = vst [vmem:[#allocation2 + $0xf8] sm:$0xff] %v9244_v2  ;;  %v342_v15 = vld [vmem:[#allocation2 + $0xf] sm:$0xff]  ;;  %v9332_v22 = vld [vmem:[%s9316_s10 + $0x20] sm:$0xff] }
  0x15   : > { %204 = vst [vmem:[#allocation2 + $0x100] sm:$0xff] %v9244_v2  ;;  %207 = vst [vmem:[#allocation2 + $0x118] sm:$0xff] %v9244_v2  ;;  %8222 = vmatpush3.bf16.msra.mxu0 %v9094_v5  ;;  %v373_v17 = vpack.c.bf16 %v342_v15, %v341_v14  ;;  %v9335_v23 = vld [vmem:[%s9316_s10 + $0x28] sm:$0xff]  ;;  %v9346_v26 = vld [vmem:[%s9316_s10 + $0x38] sm:$0xff] }
  0x16   : > { %208 = vst [vmem:[#allocation2 + $0x120] sm:$0xff] %v9244_v2  ;;  %211 = vst [vmem:[#allocation2 + $0x138] sm:$0xff] %v9244_v2  ;;  %8270 = vmatpush3.bf16.msra.mxu1 %v9095_v6  ;;  %8223 = vmatprep.subr.bf16.mxu0 %v9096_v8  ;;  %v9103_v24 = vld [vmem:[%s11539_s1 + $0x48] sm:$0xff]   ;;  %v9350_v27 = vld [vmem:[%s9316_s10 + $0x40] sm:$0xff]  ;;  %v9443_v61 = vpack.c.bf16 %v9335_v23, %v9332_v22  ;;  %v9455_v1 = vpack.c.bf16 %v9346_v26, %v9343_v25 }
  0x17   : > { %212 = vst [vmem:[#allocation2 + $0x140] sm:$0xff] %v9244_v2  ;;  %215 = vst [vmem:[#allocation2 + $0x158] sm:$0xff] %v9244_v2  ;;  %8271 = vmatprep.subr.bf16.mxu1 %v9097_v9  ;;  %8233 = vmatprep.mubr.bf16.mxu0 %v373_v17  ;;  %v9353_v28 = vld [vmem:[%s9316_s10 + $0x48] sm:$0xff]  ;;  %v9359_v29 = vld [vmem:[%s9316_s10 + $0x50] sm:$0xff] }
  0x18   : > { %216 = vst [vmem:[#allocation2 + $0x160] sm:$0xff] %v9244_v2  ;;  %219 = vst [vmem:[#allocation2 + $0x178] sm:$0xff] %v9244_v2  ;;  %v9362_v30 = vld [vmem:[%s9316_s10 + $0x58] sm:$0xff]  ;;  %v9365_v31 = vld [vmem:[%s9316_s10 + $0x60] sm:$0xff]  ;;  %v9500_v17 = vpack.c.bf16 %v9353_v28, %v9350_v27 }
  0x19   : > { %220 = vst [vmem:[#allocation2 + $0x180] sm:$0xff] %v9244_v2  ;;  %223 = vst [vmem:[#allocation2 + $0x198] sm:$0xff] %v9244_v2  ;;  %8224 = vmatpush3.bf16.msra.mxu0 %v9096_v8  ;;  %v9104_v32 = vld [vmem:[%s11539_s1] sm:$0xff]   ;;  %v9373_v33 = vld [vmem:[%s9316_s10 + $0x68] sm:$0xff] }
  0x1a   : > { %224 = vst [vmem:[#allocation2 + $0x1a0] sm:$0xff] %v9244_v2  ;;  %227 = vst [vmem:[#allocation2 + $0x1b8] sm:$0xff] %v9244_v2  ;;  %8272 = vmatpush3.bf16.msra.mxu1 %v9097_v9  ;;  %8225 = vmatprep.subr.bf16.mxu0 %v9098_v10  ;;  %v9105_v34 = vld [vmem:[%s11539_s1 + $0x40] sm:$0xff]   ;;  %v9381_v35 = vld [vmem:[%s9316_s10 + $0x70] sm:$0xff] }
  0x1b   : > { %228 = vst [vmem:[#allocation2 + $0x1c0] sm:$0xff] %v9244_v2  ;;  %231 = vst [vmem:[#allocation2 + $0x1d8] sm:$0xff] %v9244_v2  ;;  %8273 = vmatprep.subr.bf16.mxu1 %v9099_v11  ;;  %v9384_v38 = vld [vmem:[%s9316_s10 + $0x78] sm:$0xff]  ;;  %v9392_v40 = vld [vmem:[%s9316_s10 + $0x80] sm:$0xff] }
  0x1c   : > { %232 = vst [vmem:[#allocation2 + $0x1e0] sm:$0xff] %v9244_v2  ;;  %235 = vst [vmem:[#allocation2 + $0x1f8] sm:$0xff] %v9244_v2  ;;  %v9106_v39 = vld [vmem:[%s11539_s1 + $0xb8] sm:$0xff]   ;;  %v9395_v41 = vld [vmem:[%s9316_s10 + $0x88] sm:$0xff] }
  0x1d   : > { %236 = vst [vmem:[#allocation2 + $0x200] sm:$0xff] %v9244_v2  ;;  %239 = vst [vmem:[#allocation2 + $0x218] sm:$0xff] %v9244_v2  ;;  %8226 = vmatpush3.bf16.msra.mxu0 %v9098_v10  ;;  %v9107_v48 = vld [vmem:[%s11539_s1 + $0xb0] sm:$0xff]   ;;  %v9111_v49 = vld [vmem:[%s11539_s1 + $0xf8] sm:$0xff]  }
  0x1e   : > { %240 = vst [vmem:[#allocation2 + $0x220] sm:$0xff] %v9244_v2  ;;  %241 = vst [vmem:[#allocation2 + $0x228] sm:$0xff] %v9244_v2  ;;  %8274 = vmatpush3.bf16.msra.mxu1 %v9099_v11  ;;  %8227 = vmatprep.subr.bf16.mxu0 %v9100_v12  ;;  %v9108_v52 = vld [vmem:[%s11539_s1 + $0xa8] sm:$0xff]   ;;  %v9418_v53 = vld [vmem:[%s9316_s10 + $0x90] sm:$0xff] }
  0x1f   : > { %242 = vst [vmem:[#allocation2 + $0x230] sm:$0xff] %v9244_v2  ;;  %243 = vst [vmem:[#allocation2 + $0x238] sm:$0xff] %v9244_v2  ;;  %8275 = vmatprep.subr.bf16.mxu1 %v9101_v13  ;;  %v9112_v54 = vld [vmem:[%s11539_s1 + $0xf0] sm:$0xff]   ;;  %v9425_v55 = vld [vmem:[%s9316_s10 + $0x98] sm:$0xff] }
  0x20   : > { %277 = vst [vmem:[#allocation2 + $0x28] sm:$0xff] %v244_v16  ;;  %278 = vst [vmem:[#allocation2 + $0x30] sm:$0xff] %v245_v18  ;;  %v9429_v56 = vld [vmem:[%s9316_s10 + $0xa0] sm:$0xff]  ;;  %v9435_v59 = vld [vmem:[%s9316_s10 + $0xa8] sm:$0xff] }
  0x21   : > { %279 = vst [vmem:[#allocation2 + $0x48] sm:$0xff] %v246_v20  ;;  %280 = vst [vmem:[#allocation2 + $0x50] sm:$0xff] %v247_v21  ;;  %8228 = vmatpush3.bf16.msra.mxu0 %v9100_v12  ;;  %v9109_v63 = vld [vmem:[%s11539_s1 + $0xa0] sm:$0xff]   ;;  %v9114_v0 = vld [vmem:[%s11539_s1 + $0xe8] sm:$0xff]  }
  0x22   : > { %281 = vst [vmem:[#allocation2 + $0x68] sm:$0xff] %v9332_v22  ;;  %282 = vst [vmem:[#allocation2 + $0x70] sm:$0xff] %v9335_v23  ;;  %8276 = vmatpush3.bf16.msra.mxu1 %v9101_v13  ;;  %8229 = vmatprep.subr.bf16.mxu0 %v9102_v19  ;;  %v9458_v2 = vld [vmem:[%s9316_s10 + $0xb0] sm:$0xff]  ;;  %v9461_v3 = vld [vmem:[%s9316_s10 + $0xb8] sm:$0xff] }
  0x23   : > { %283 = vst [vmem:[#allocation2 + $0x88] sm:$0xff] %v9343_v25  ;;  %284 = vst [vmem:[#allocation2 + $0x90] sm:$0xff] %v9346_v26  ;;  %8277 = vmatprep.subr.bf16.mxu1 %v9103_v24  ;;  %v9464_v4 = vld [vmem:[%s9316_s10 + $0xc0] sm:$0xff]  ;;  %v9469_v5 = vld [vmem:[%s9316_s10 + $0xc8] sm:$0xff] }
  0x24   : > { %285 = vst [vmem:[#allocation2 + $0xa8] sm:$0xff] %v9350_v27  ;;  %286 = vst [vmem:[#allocation2 + $0xb0] sm:$0xff] %v9353_v28  ;;  %v9115_v8 = vld [vmem:[%s11539_s1 + $0xe0] sm:$0xff]   ;;  %v9110_v11 = vld [vmem:[%s11539_s1 + $0x98] sm:$0xff]  }
  0x25   : > { %287 = vst [vmem:[#allocation2 + $0xc8] sm:$0xff] %v9359_v29  ;;  %288 = vst [vmem:[#allocation2 + $0xd0] sm:$0xff] %v9362_v30  ;;  %8230 = vmatpush3.bf16.msra.mxu0 %v9102_v19  ;;  %v9484_v12 = vld [vmem:[%s9316_s10 + $0xd0] sm:$0xff]  ;;  %v9489_v14 = vld [vmem:[%s9316_s10 + $0xd8] sm:$0xff]  ;;  %v9509_v19 = vpack.c.bf16 %v9362_v30, %v9359_v29  ;;  %v9531_v29 = vpack.c.bf16 %v9373_v33, %v9365_v31 }
  0x26   : > { %289 = vst [vmem:[#allocation2 + $0xe8] sm:$0xff] %v9365_v31  ;;  %290 = vst [vmem:[#allocation2 + $0xf0] sm:$0xff] %v9373_v33  ;;  %8278 = vmatpush3.bf16.msra.mxu1 %v9103_v24  ;;  %8231 = vmatprep.subr.bf16.mxu0 %v9104_v32  ;;  %v9493_v15 = vld [vmem:[%s9316_s10 + $0xe0] sm:$0xff]  ;;  %v9496_v16 = vld [vmem:[%s9316_s10 + $0xe8] sm:$0xff] }
  0x27   : > { %v343_v36 = vld [vmem:[#allocation2 + $0x27] sm:$0xff]  ;;  %v344_v37 = vld [vmem:[#allocation2 + $0x2f] sm:$0xff]  ;;  %291 = vst [vmem:[#allocation2 + $0x108] sm:$0xff] %v9381_v35  ;;  %292 = vst [vmem:[#allocation2 + $0x110] sm:$0xff] %v9384_v38  ;;  %8279 = vmatprep.subr.bf16.mxu1 %v9105_v34 }
  0x28   : > { %v345_v42 = vld [vmem:[#allocation2 + $0x47] sm:$0xff]  ;;  %v346_v43 = vld [vmem:[#allocation2 + $0x4f] sm:$0xff]  ;;  %293 = vst [vmem:[#allocation2 + $0x128] sm:$0xff] %v9392_v40  ;;  %294 = vst [vmem:[#allocation2 + $0x130] sm:$0xff] %v9395_v41  ;;  %v9399_v44 = vpack.c.bf16 %v344_v37, %v343_v36 }
  0x29   : > { %8232 = vmatpush3.bf16.msra.mxu0 %v9104_v32  ;;  %v9403_v46 = vpack.c.bf16 %v346_v43, %v345_v42  ;;  %v347_v50 = vld [vmem:[#allocation2 + $0x67] sm:$0xff]  ;;  %v348_v51 = vld [vmem:[#allocation2 + $0x6f] sm:$0xff]  ;;  %295 = vst [vmem:[#allocation2 + $0x148] sm:$0xff] %v9418_v53  ;;  %296 = vst [vmem:[#allocation2 + $0x150] sm:$0xff] %v9425_v55  ;;  %v9537_v32 = vpack.c.bf16 %v9384_v38, %v9381_v35  ;;  %v9561_v43 = vpack.c.bf16 %v9395_v41, %v9392_v40 }
  0x2a   : > { %8280 = vmatpush3.bf16.msra.mxu1 %v9105_v34  ;;  %8313 = vmatprep.subr.bf16.mxu0 %v9106_v39  ;;  %v349_v57 = vld [vmem:[#allocation2 + $0x87] sm:$0xff]  ;;  %v350_v58 = vld [vmem:[#allocation2 + $0x8f] sm:$0xff]  ;;  %297 = vst [vmem:[#allocation2 + $0x168] sm:$0xff] %v9429_v56  ;;  %298 = vst [vmem:[#allocation2 + $0x170] sm:$0xff] %v9435_v59  ;;  %v9439_v60 = vpack.c.bf16 %v348_v51, %v347_v50 }
  0x2b   : > { %8361 = vmatprep.subr.bf16.mxu1 %v9111_v49  ;;  %v9445_v62 = vpack.c.bf16 %v350_v58, %v349_v57  ;;  %299 = vst [vmem:[#allocation2 + $0x188] sm:$0xff] %v9458_v2  ;;  %300 = vst [vmem:[#allocation2 + $0x190] sm:$0xff] %v9461_v3  ;;  %v351_v6 = vld [vmem:[#allocation2 + $0xa7] sm:$0xff]  ;;  %v352_v7 = vld [vmem:[#allocation2 + $0xaf] sm:$0xff]  ;;  %v9590_v57 = vpack.c.bf16 %v9461_v3, %v9458_v2  ;;  %v9602_v2 = vpack.c.bf16 %v9469_v5, %v9464_v4 }
  0x2c   : > { %8234 = vmatmul.mubr.bf16.vlgmr.msra.gmra.mxu0 %v9399_v44  ;;  %301 = vst [vmem:[#allocation2 + $0x1a8] sm:$0xff] %v9464_v4  ;;  %302 = vst [vmem:[#allocation2 + $0x1b0] sm:$0xff] %v9469_v5  ;;  %v353_v9 = vld [vmem:[#allocation2 + $0xc7] sm:$0xff]  ;;  %v354_v10 = vld [vmem:[#allocation2 + $0xcf] sm:$0xff]  ;;  %v9486_v13 = vpack.c.bf16 %v352_v7, %v351_v6 }
  0x2d   : > { %8282 = vmatmul.mubr.bf16.vlgmr.msra.gmra.mxu1 %v9401_v45  ;;  %8314 = vmatpush3.bf16.msra.mxu0 %v9106_v39  ;;  %303 = vst [vmem:[#allocation2 + $0x1c8] sm:$0xff] %v9484_v12  ;;  %v9502_v18 = vpack.c.bf16 %v354_v10, %v353_v9  ;;  %304 = vst [vmem:[#allocation2 + $0x1d0] sm:$0xff] %v9489_v14  ;;  %v9113_v20 = vld [vmem:[%s11539_s1 + $0x90] sm:$0xff]   ;;  %v9117_v21 = vld [vmem:[%s11539_s1 + $0xd8] sm:$0xff]  }
  0x2e   : > { %8237 = vmatprep.mubr.bf16.mxu0 %v9403_v46  ;;  %8285 = vmatprep.mubr.bf16.mxu1 %v9405_v47  ;;  %305 = vst [vmem:[#allocation2 + $0x1e8] sm:$0xff] %v9493_v15  ;;  %306 = vst [vmem:[#allocation2 + $0x1f0] sm:$0xff] %v9496_v16  ;;  %v355_v22 = vld [vmem:[#allocation2 + $0xe7] sm:$0xff]  ;;  %v356_v23 = vld [vmem:[#allocation2 + $0xef] sm:$0xff] }
  0x2f   : > { %8315 = vmatprep.subr.bf16.mxu0 %v9107_v48  ;;  %8362 = vmatpush3.bf16.msra.mxu1 %v9111_v49  ;;  %v9118_v24 = vld [vmem:[%s11539_s1 + $0xd0] sm:$0xff]   ;;  %v357_v25 = vld [vmem:[#allocation2 + $0x107] sm:$0xff]  ;;  %v9527_v28 = vpack.c.bf16 %v356_v23, %v355_v22  ;;  %v9555_v39 = vld [vmem:[%s11539_s1 + $0x138] sm:$0xff]   ;;  %v9567_v49 = vpack.c.bf16 %v9425_v55, %v9418_v53 }
  0x30   : > { %8363 = vmatprep.subr.bf16.mxu1 %v9112_v54  ;;  %v358_v26 = vld [vmem:[#allocation2 + $0x10f] sm:$0xff]  ;;  %v9119_v34 = vld [vmem:[%s11539_s1 + $0x80] sm:$0xff]   ;;  %v9573_v50 = vld [vmem:[%s11539_s1 + $0x178] sm:$0xff]  }
  0x31   : > { %8316 = vmatpush3.bf16.msra.mxu0 %v9107_v48  ;;  %v9116_v27 = vld [vmem:[%s11539_s1 + $0x88] sm:$0xff]   ;;  %v9533_v30 = vpack.c.bf16 %v358_v26, %v357_v25  ;;  %v9121_v35 = vld [vmem:[%s11539_s1 + $0xc0] sm:$0xff]   ;;  %v1081_v4 = vld [vmem:[#allocation2 + $0x11] sm:$0xff] }
  0x32   : > { %8317 = vmatprep.subr.bf16.mxu0 %v9108_v52  ;;  %v9120_v36 = vld [vmem:[%s11539_s1 + $0xc8] sm:$0xff]   ;;  %v1083_v22 = vld [vmem:[#allocation2 + $0x31] sm:$0xff] }
  0x33   : > { %8364 = vmatpush3.bf16.msra.mxu1 %v9112_v54  ;;  %v359_v31 = vld [vmem:[#allocation2 + $0x127] sm:$0xff]  ;;  %v360_v33 = vld [vmem:[#allocation2 + $0x12f] sm:$0xff]  ;;  %v9584_v54 = vpack.c.bf16 %v9435_v59, %v9429_v56  ;;  %v275_v59 = vld [vmem:[%s9316_s10 + $0xf8] sm:$0xff] }
  0x34   : > { %8238 = vmatmul.mubr.bf16.gmra.mxu0 %v9439_v60  ;;  %8365 = vmatprep.subr.bf16.mxu1 %v9114_v0  ;;  %v361_v37 = vld [vmem:[#allocation2 + $0x147] sm:$0xff]  ;;  %v362_v38 = vld [vmem:[#allocation2 + $0x14f] sm:$0xff]  ;;  %v9557_v42 = vpack.c.bf16 %v360_v33, %v359_v31  ;;  %308 = vst [vmem:[#allocation2 + $0x210] sm:$0xff] %v275_v59 }
  0x35   : > { %8286 = vmatmul.mubr.bf16.gmra.mxu1 %v9443_v61  ;;  %8241 = vmatprep.mubr.bf16.mxu0 %v9445_v62  ;;  %v9563_v48 = vpack.c.bf16 %v362_v38, %v361_v37  ;;  %v363_v51 = vld [vmem:[#allocation2 + $0x167] sm:$0xff]  ;;  %v364_v40 = vld [vmem:[#allocation2 + $0x16f] sm:$0xff] }
  0x36   : > { %8289 = vmatprep.mubr.bf16.mxu1 %v9455_v1  ;;  %8318 = vmatpush3.bf16.msra.mxu0 %v9108_v52  ;;  %v365_v41 = vld [vmem:[#allocation2 + $0x187] sm:$0xff]  ;;  %v366_v52 = vld [vmem:[#allocation2 + $0x18f] sm:$0xff]  ;;  %v9580_v53 = vpack.c.bf16 %v364_v40, %v363_v51  ;;  %v9126_v40 = vld [vmem:[%s11539_s1 + $0x118] sm:$0xff]  }
  0x37   : > { %8319 = vmatprep.subr.bf16.mxu0 %v9109_v63  ;;  %8366 = vmatpush3.bf16.msra.mxu1 %v9114_v0  ;;  %v9586_v55 = vpack.c.bf16 %v366_v52, %v365_v41  ;;  %v367_v58 = vld [vmem:[#allocation2 + $0x1a7] sm:$0xff]  ;;  %v370_v6 = vld [vmem:[#allocation2 + $0x1cf] sm:$0xff]  ;;  %v9133_v41 = vld [vmem:[%s11539_s1 + $0x158] sm:$0xff]  }
  0x38   : > { %8367 = vmatprep.subr.bf16.mxu1 %v9115_v8  ;;  %v369_v0 = vld [vmem:[#allocation2 + $0x1c7] sm:$0xff]  ;;  %v274_v56 = vld [vmem:[%s9316_s10 + $0xf0] sm:$0xff] }
  0x39   : > { %307 = vst [vmem:[#allocation2 + $0x208] sm:$0xff] %v274_v56  ;;  %v9604_v3 = vpack.c.bf16 %v370_v6, %v369_v0  ;;  %v371_v9 = vld [vmem:[#allocation2 + $0x1e7] sm:$0xff]  ;;  %v1091_v38 = vld [vmem:[#allocation2 + $0xb1] sm:$0xff] }
  0x3a   : > { %8320 = vmatpush3.bf16.msra.mxu0 %v9109_v63  ;;  %v368_v63 = vld [vmem:[#allocation2 + $0x1af] sm:$0xff] }
  0x3b   : > { %8321 = vmatprep.subr.bf16.mxu0 %v9110_v11  ;;  %8368 = vmatpush3.bf16.msra.mxu1 %v9115_v8  ;;  %v9598_v7 = vpack.c.bf16 %v368_v63, %v367_v58  ;;  %v9608_v8 = vpack.c.bf16 %v9489_v14, %v9484_v12  ;;  %v1080_v10 = vld [vmem:[#allocation2 + $0x9] sm:$0xff]  ;;  %v9620_v12 = vpack.c.bf16 %v9496_v16, %v9493_v15  ;;  %v1095_v63 = vld [vmem:[#allocation2 + $0xf1] sm:$0xff] }
  0x3c   : > { %8242 = vmatmul.mubr.bf16.gmra.mxu0 %v9486_v13  ;;  %8369 = vmatprep.subr.bf16.mxu1 %v9117_v21  ;;  %v1112_v14 = vpack.c.bf16 %v1081_v4, %v1080_v10  ;;  %v1084_v23 = vld [vmem:[#allocation2 + $0x49] sm:$0xff]  ;;  %v1097_v6 = vld [vmem:[#allocation2 + $0x111] sm:$0xff] }
  0x3d   : > { %8290 = vmatmul.mubr.bf16.gmra.mxu1 %v9500_v17  ;;  %8245 = vmatprep.mubr.bf16.mxu0 %v9502_v18  ;;  %v9123_v15 = vld [vmem:[%s11539_s1 + $0x130] sm:$0xff]   ;;  %v9124_v31 = vld [vmem:[%s11539_s1 + $0x128] sm:$0xff]  }
  0x3e   : > { %8293 = vmatprep.mubr.bf16.mxu1 %v9509_v19  ;;  %8322 = vmatpush3.bf16.msra.mxu0 %v9110_v11  ;;  %v372_v11 = vld [vmem:[#allocation2 + $0x1ef] sm:$0xff] }
  0x3f   : > { %8323 = vmatprep.subr.bf16.mxu0 %v9113_v20  ;;  %8370 = vmatpush3.bf16.msra.mxu1 %v9117_v21  ;;  %v9616_v5 = vpack.c.bf16 %v372_v11, %v371_v9  ;;  %v1082_v21 = vld [vmem:[#allocation2 + $0x29] sm:$0xff]  ;;  %v1099_v4 = vld [vmem:[#allocation2 + $0x131] sm:$0xff] }
  0x40   : > { %8371 = vmatprep.subr.bf16.mxu1 %v9118_v24  ;;  %v9625_v25 = vpack.c.bf16 %v1083_v22, %v1082_v21  ;;  %v1086_v16 = vld [vmem:[#allocation2 + $0x69] sm:$0xff]  ;;  %v1101_v21 = vld [vmem:[#allocation2 + $0x151] sm:$0xff]  ;;  %v9137_v22 = vld [vmem:[%s11539_s1 + $0x140] sm:$0xff]  }
  0x41   : > { %v9130_v33 = vld [vmem:[%s11539_s1 + $0x168] sm:$0xff]  }
  0x42   : > { %8324 = vmatpush3.bf16.msra.mxu0 %v9113_v20  ;;  %v9613_v20 = vpack.c.bf16 %v275_v59, %v274_v56  ;;  %v1090_v37 = vld [vmem:[#allocation2 + $0xa9] sm:$0xff] }
  0x43   : > { %8325 = vmatprep.subr.bf16.mxu0 %v9116_v27  ;;  %8372 = vmatpush3.bf16.msra.mxu1 %v9118_v24  ;;  %v1085_v24 = vld [vmem:[#allocation2 + $0x51] sm:$0xff]  ;;  %v1092_v51 = vld [vmem:[#allocation2 + $0xc9] sm:$0xff]  ;;  %v9667_v52 = vpack.c.bf16 %v1091_v38, %v1090_v37 }
  0x44   : > { %8246 = vmatmul.mubr.bf16.gmra.mxu0 %v9527_v28  ;;  %8373 = vmatprep.subr.bf16.mxu1 %v9120_v36  ;;  %v9627_v26 = vpack.c.bf16 %v1085_v24, %v1084_v23  ;;  %v1096_v0 = vld [vmem:[#allocation2 + $0x109] sm:$0xff]  ;;  %v9138_v23 = vld [vmem:[%s11539_s1 + $0x1b8] sm:$0xff]  }
  0x45   : > { %8294 = vmatmul.mubr.bf16.gmra.mxu1 %v9531_v29  ;;  %8249 = vmatprep.mubr.bf16.mxu0 %v9533_v30  ;;  %v9134_v56 = vld [vmem:[%s11539_s1 + $0x150] sm:$0xff]   ;;  %v9132_v59 = vld [vmem:[%s11539_s1 + $0x108] sm:$0xff]   ;;  %v9689_v11 = vpack.c.bf16 %v1097_v6, %v1096_v0  ;;  %v9143_v24 = vld [vmem:[%s11539_s1 + $0x1f8] sm:$0xff]  }
  0x46   : > { %8297 = vmatprep.mubr.bf16.mxu1 %v9537_v32  ;;  %8326 = vmatpush3.bf16.msra.mxu0 %v9116_v27  ;;  %v9128_v27 = vld [vmem:[%s11539_s1 + $0x170] sm:$0xff]   ;;  %v9136_v9 = vld [vmem:[%s11539_s1 + $0x148] sm:$0xff]  }
  0x47   : > { %8327 = vmatprep.subr.bf16.mxu0 %v9119_v34  ;;  %8374 = vmatpush3.bf16.msra.mxu1 %v9120_v36  ;;  %v1089_v36 = vld [vmem:[#allocation2 + $0x91] sm:$0xff]  ;;  %v1108_v37 = vld [vmem:[#allocation2 + $0x1c9] sm:$0xff] }
  0x48   : > { %8375 = vmatprep.subr.bf16.mxu1 %v9121_v35  ;;  %v2565_v0 = vld [vmem:[#allocation2 + $0x87] sm:$0xff]  ;;  %v2566_v6 = vld [vmem:[#allocation2 + $0x8f] sm:$0xff] }
  0x4a   : > { %8328 = vmatpush3.bf16.msra.mxu0 %v9119_v34  ;;  %v1088_v34 = vld [vmem:[#allocation2 + $0x89] sm:$0xff] }
  0x4b   : > { %8409 = vmatprep.subr.bf16.mxu0 %v9555_v39  ;;  %8376 = vmatpush3.bf16.msra.mxu1 %v9121_v35 }
  0x4c   : > { %8250 = vmatmul.mubr.bf16.gmra.mxu0 %v9557_v42  ;;  %8457 = vmatprep.subr.bf16.mxu1 %v9573_v50 }
  0x4d   : > { %8298 = vmatmul.mubr.bf16.gmra.mxu1 %v9561_v43  ;;  %8253 = vmatprep.mubr.bf16.mxu0 %v9563_v48 }
  0x4e   : > { %8301 = vmatprep.mubr.bf16.mxu1 %v9567_v49 }
  0x54   : > { %8254 = vmatmul.mubr.bf16.gmra.mxu0 %v9580_v53 }
  0x55   : > { %8302 = vmatmul.mubr.bf16.gmra.mxu1 %v9584_v54  ;;  %8257 = vmatprep.mubr.bf16.mxu0 %v9586_v55 }
  0x56   : > { %8305 = vmatprep.mubr.bf16.mxu1 %v9590_v57 }
  0x5c   : > { %8258 = vmatmul.mubr.bf16.gmra.mxu0 %v9598_v7 }
  0x5d   : > { %8306 = vmatmul.mubr.bf16.gmra.mxu1 %v9602_v2  ;;  %8261 = vmatprep.mubr.bf16.mxu0 %v9604_v3 }
  0x5e   : > { %8309 = vmatprep.mubr.bf16.mxu1 %v9608_v8 }
  0x64   : > { %8262 = vmatmul.mubr.bf16.gmra.mxu0 %v9616_v5 }
  0x65   : > { %8310 = vmatmul.mubr.bf16.gmra.mxu1 %v9620_v12  ;;  %8329 = vmatprep.mubr.bf16.mxu0 %v1112_v14  ;;  %v1100_v14 = vld [vmem:[#allocation2 + $0x149] sm:$0xff] }
  0x66   : > { %8377 = vmatprep.mubr.bf16.mxu1 %v9399_v44  ;;  %v1087_v44 = vld [vmem:[#allocation2 + $0x71] sm:$0xff] }
  0x67   : > { %v9647_v35 = vpack.c.bf16 %v1087_v44, %v1086_v16  ;;  %v9709_v16 = vpack.c.bf16 %v1101_v21, %v1100_v14  ;;  %v1105_v44 = vld [vmem:[#allocation2 + $0x191] sm:$0xff]  ;;  %v2567_v14 = vld [vmem:[#allocation2 + $0xa7] sm:$0xff] }
  0x6c   : > { %8330 = vmatmul.mubr.bf16.vlgmr.msra.gmra.mxu0 %v9625_v25 }
  0x6d   : > { %8410 = vmatpush3.bf16.msra.mxu0 %v9555_v39  ;;  %8378 = vmatmul.mubr.bf16.vlgmr.msra.gmra.mxu1 %v9403_v46  ;;  %v9649_v46 = vpack.c.bf16 %v1089_v36, %v1088_v34  ;;  %v9125_v39 = vld [vmem:[%s11539_s1 + $0x120] sm:$0xff]  }
  0x6e   : > { %8333 = vmatprep.mubr.bf16.mxu0 %v9627_v26  ;;  %8411 = vmatprep.subr.bf16.mxu0 %v9123_v15 }
  0x6f   : > { %8381 = vmatprep.mubr.bf16.mxu1 %v9439_v60  ;;  %8458 = vmatpush3.bf16.msra.mxu1 %v9573_v50  ;;  %v1093_v60 = vld [vmem:[#allocation2 + $0xd1] sm:$0xff]  ;;  %v9131_v50 = vld [vmem:[%s11539_s1 + $0x160] sm:$0xff]  }
  0x70   : > { %8459 = vmatprep.subr.bf16.mxu1 %v9128_v27  ;;  %v9669_v58 = vpack.c.bf16 %v1093_v60, %v1092_v51  ;;  %v1111_v51 = vld [vmem:[#allocation2 + $0x1f1] sm:$0xff]  ;;  %v1480_v60 = vld [vmem:[#allocation2 + $0x207] sm:$0xff] }
  0x71   : > { %8412 = vmatpush3.bf16.msra.mxu0 %v9123_v15 }
  0x72   : > { %8413 = vmatprep.subr.bf16.mxu0 %v9124_v31 }
  0x73   : > { %8460 = vmatpush3.bf16.msra.mxu1 %v9128_v27  ;;  %v1103_v27 = vld [vmem:[#allocation2 + $0x171] sm:$0xff] }
  0x74   : > { %8334 = vmatmul.mubr.bf16.gmra.mxu0 %v9647_v35  ;;  %8461 = vmatprep.subr.bf16.mxu1 %v9130_v33 }
  0x75   : > { %8382 = vmatmul.mubr.bf16.gmra.mxu1 %v9445_v62  ;;  %8337 = vmatprep.mubr.bf16.mxu0 %v9649_v46  ;;  %v1094_v62 = vld [vmem:[#allocation2 + $0xe9] sm:$0xff] }
  0x76   : > { %8385 = vmatprep.mubr.bf16.mxu1 %v9486_v13  ;;  %8414 = vmatpush3.bf16.msra.mxu0 %v9124_v31  ;;  %v9129_v13 = vld [vmem:[%s11539_s1 + $0x110] sm:$0xff]   ;;  %v9687_v10 = vpack.c.bf16 %v1095_v63, %v1094_v62 }
  0x77   : > { %8415 = vmatprep.subr.bf16.mxu0 %v9125_v39  ;;  %8462 = vmatpush3.bf16.msra.mxu1 %v9130_v33  ;;  %v1106_v31 = vld [vmem:[#allocation2 + $0x1a9] sm:$0xff]  ;;  %v1107_v33 = vld [vmem:[#allocation2 + $0x1b1] sm:$0xff] }
  0x78   : > { %8463 = vmatprep.subr.bf16.mxu1 %v9131_v50  ;;  %v9723_v38 = vpack.c.bf16 %v1107_v33, %v1106_v31  ;;  %v2564_v63 = vld [vmem:[#allocation2 + $0x6f] sm:$0xff] }
  0x7a   : > { %8416 = vmatpush3.bf16.msra.mxu0 %v9125_v39  ;;  %v1110_v39 = vld [vmem:[#allocation2 + $0x1e9] sm:$0xff] }
  0x7b   : > { %8417 = vmatprep.subr.bf16.mxu0 %v9126_v40  ;;  %8464 = vmatpush3.bf16.msra.mxu1 %v9131_v50  ;;  %v9731_v50 = vpack.c.bf16 %v1111_v51, %v1110_v39 }
  0x7c   : > { %8338 = vmatmul.mubr.bf16.gmra.mxu0 %v9667_v52  ;;  %8465 = vmatprep.subr.bf16.mxu1 %v9133_v41 }
  0x7d   : > { %8386 = vmatmul.mubr.bf16.gmra.mxu1 %v9502_v18  ;;  %8341 = vmatprep.mubr.bf16.mxu0 %v9669_v58  ;;  %v1098_v18 = vld [vmem:[#allocation2 + $0x129] sm:$0xff] }
  0x7e   : > { %8389 = vmatprep.mubr.bf16.mxu1 %v9527_v28  ;;  %8418 = vmatpush3.bf16.msra.mxu0 %v9126_v40  ;;  %v9135_v28 = vld [vmem:[%s11539_s1 + $0x100] sm:$0xff]   ;;  %v9707_v15 = vpack.c.bf16 %v1099_v4, %v1098_v18  ;;  %v9140_v40 = vld [vmem:[%s11539_s1 + $0x1a8] sm:$0xff]   ;;  %v9155_v18 = vld [vmem:[%s11539_s1 + $0x230] sm:$0xff]  }
  0x7f   : > { %8419 = vmatprep.subr.bf16.mxu0 %v9129_v13  ;;  %8466 = vmatpush3.bf16.msra.mxu1 %v9133_v41  ;;  %v9154_v41 = vld [vmem:[%s11539_s1 + $0x238] sm:$0xff]  }
  0x80   : > { %8467 = vmatprep.subr.bf16.mxu1 %v9134_v56 }
  0x82   : > { %8420 = vmatpush3.bf16.msra.mxu0 %v9129_v13  ;;  %v2934_v13 = vld [vmem:[#allocation2 + $0x70] sm:$0xff] }
  0x83   : > { %8421 = vmatprep.subr.bf16.mxu0 %v9132_v59  ;;  %8468 = vmatpush3.bf16.msra.mxu1 %v9134_v56 }
  0x84   : > { %8342 = vmatmul.mubr.bf16.gmra.mxu0 %v9687_v10  ;;  %8469 = vmatprep.subr.bf16.mxu1 %v9136_v9 }
  0x85   : > { %8390 = vmatmul.mubr.bf16.gmra.mxu1 %v9533_v30  ;;  %8345 = vmatprep.mubr.bf16.mxu0 %v9689_v11  ;;  %v1102_v30 = vld [vmem:[#allocation2 + $0x169] sm:$0xff] }
  0x86   : > { %8393 = vmatprep.mubr.bf16.mxu1 %v9557_v42  ;;  %8422 = vmatpush3.bf16.msra.mxu0 %v9132_v59  ;;  %v1104_v42 = vld [vmem:[#allocation2 + $0x189] sm:$0xff]  ;;  %v9715_v34 = vpack.c.bf16 %v1103_v27, %v1102_v30 }
  0x87   : > { %8423 = vmatprep.subr.bf16.mxu0 %v9135_v28  ;;  %8470 = vmatpush3.bf16.msra.mxu1 %v9136_v9  ;;  %v9717_v36 = vpack.c.bf16 %v1105_v44, %v1104_v42  ;;  %v2935_v59 = vld [vmem:[#allocation2 + $0x88] sm:$0xff]  ;;  %v2936_v9 = vld [vmem:[#allocation2 + $0x90] sm:$0xff] }
  0x88   : > { %8471 = vmatprep.subr.bf16.mxu1 %v9137_v22  ;;  %v2965_v4 = vpack.c.bf16 %v2936_v9, %v2935_v59  ;;  %v2569_v30 = vld [vmem:[#allocation2 + $0xc7] sm:$0xff]  ;;  %v2570_v27 = vld [vmem:[#allocation2 + $0xcf] sm:$0xff] }
  0x89   : > { %v9156_v42 = vld [vmem:[%s11539_s1 + $0x228] sm:$0xff]  }
  0x8a   : > { %8424 = vmatpush3.bf16.msra.mxu0 %v9135_v28  ;;  %v2576_v59 = vld [vmem:[#allocation2 + $0x12f] sm:$0xff] }
  0x8b   : > { %8472 = vmatpush3.bf16.msra.mxu1 %v9137_v22  ;;  %8505 = vmatprep.subr.bf16.mxu0 %v9138_v23  ;;  %v2568_v22 = vld [vmem:[#allocation2 + $0xaf] sm:$0xff] }
  0x8c   : > { %8346 = vmatmul.mubr.bf16.gmra.mxu0 %v9707_v15  ;;  %8553 = vmatprep.subr.bf16.mxu1 %v9143_v24  ;;  %v2945_v9 = vld [vmem:[#allocation2 + $0x128] sm:$0xff] }
  0x8d   : > { %8394 = vmatmul.mubr.bf16.gmra.mxu1 %v9563_v48  ;;  %8349 = vmatprep.mubr.bf16.mxu0 %v9709_v16  ;;  %v1109_v48 = vld [vmem:[#allocation2 + $0x1d1] sm:$0xff] }
  0x8e   : > { %8397 = vmatprep.mubr.bf16.mxu1 %v9580_v53  ;;  %v9725_v53 = vpack.c.bf16 %v1109_v48, %v1108_v37  ;;  %v2596_v37 = vpack.c.bf16 %v2568_v22, %v2567_v14  ;;  %v2948_v22 = vld [vmem:[#allocation2 + $0x150] sm:$0xff] }
  0x94   : > { %8350 = vmatmul.mubr.bf16.gmra.mxu0 %v9715_v34 }
  0x95   : > { %8398 = vmatmul.mubr.bf16.gmra.mxu1 %v9586_v55  ;;  %8353 = vmatprep.mubr.bf16.mxu0 %v9717_v36  ;;  %v1481_v55 = vld [vmem:[#allocation2 + $0x20f] sm:$0xff] }
  0x96   : > { %8401 = vmatprep.mubr.bf16.mxu1 %v9598_v7  ;;  %v9733_v7 = vpack.c.bf16 %v1481_v55, %v1480_v60 }
  0x9c   : > { %8354 = vmatmul.mubr.bf16.gmra.mxu0 %v9723_v38 }
  0x9d   : > { %8402 = vmatmul.mubr.bf16.gmra.mxu1 %v9604_v3  ;;  %8357 = vmatprep.mubr.bf16.mxu0 %v9725_v53  ;;  %v9139_v3 = vld [vmem:[%s11539_s1 + $0x1b0] sm:$0xff]  }
  0x9e   : > { %8405 = vmatprep.mubr.bf16.mxu1 %v9616_v5  ;;  %v9144_v5 = vld [vmem:[%s11539_s1 + $0x1f0] sm:$0xff]  }
  0xa4   : > { %8358 = vmatmul.mubr.bf16.gmra.mxu0 %v9731_v50 }
  0xa5   : > { %8406 = vmatmul.mubr.bf16.gmra.mxu1 %v9733_v7  ;;  %8425 = vmatprep.mubr.bf16.mxu0 %v9401_v45  ;;  %v9146_v45 = vld [vmem:[%s11539_s1 + $0x1e8] sm:$0xff]  }
  0xa6   : > { %8473 = vmatprep.mubr.bf16.mxu1 %v9625_v25  ;;  %v9147_v25 = vld [vmem:[%s11539_s1 + $0x1e0] sm:$0xff]  }
  0xac   : > { %8426 = vmatmul.mubr.bf16.vlgmr.msra.gmra.mxu0 %v9405_v47  ;;  %v9141_v47 = vld [vmem:[%s11539_s1 + $0x1a0] sm:$0xff]  }
  0xad   : > { %8506 = vmatpush3.bf16.msra.mxu0 %v9138_v23  ;;  %8474 = vmatmul.mubr.bf16.vlgmr.msra.gmra.mxu1 %v9627_v26  ;;  %v9149_v26 = vld [vmem:[%s11539_s1 + $0x1d8] sm:$0xff]   ;;  %v2937_v23 = vld [vmem:[#allocation2 + $0xa8] sm:$0xff] }
  0xae   : > { %8429 = vmatprep.mubr.bf16.mxu0 %v9443_v61  ;;  %8507 = vmatprep.subr.bf16.mxu0 %v9139_v3  ;;  %v9142_v61 = vld [vmem:[%s11539_s1 + $0x198] sm:$0xff]  }
  0xaf   : > { %8477 = vmatprep.mubr.bf16.mxu1 %v9647_v35  ;;  %8554 = vmatpush3.bf16.msra.mxu1 %v9143_v24  ;;  %v9148_v35 = vld [vmem:[%s11539_s1 + $0x188] sm:$0xff]   ;;  %v2938_v24 = vld [vmem:[#allocation2 + $0xb0] sm:$0xff] }
  0xb0   : > { %8555 = vmatprep.subr.bf16.mxu1 %v9144_v5 }
  0xb1   : > { %8508 = vmatpush3.bf16.msra.mxu0 %v9139_v3 }
  0xb2   : > { %8509 = vmatprep.subr.bf16.mxu0 %v9140_v40 }
  0xb3   : > { %8556 = vmatpush3.bf16.msra.mxu1 %v9144_v5 }
  0xb4   : > { %8430 = vmatmul.mubr.bf16.gmra.mxu0 %v9455_v1  ;;  %8557 = vmatprep.subr.bf16.mxu1 %v9146_v45  ;;  %v9145_v1 = vld [vmem:[%s11539_s1 + $0x190] sm:$0xff]  }
  0xb5   : > { %8478 = vmatmul.mubr.bf16.gmra.mxu1 %v9649_v46  ;;  %8433 = vmatprep.mubr.bf16.mxu0 %v9500_v17  ;;  %v9150_v17 = vld [vmem:[%s11539_s1 + $0x1d0] sm:$0xff]   ;;  %v9153_v46 = vld [vmem:[%s11539_s1 + $0x1c0] sm:$0xff]  }
  0xb6   : > { %8481 = vmatprep.mubr.bf16.mxu1 %v9667_v52  ;;  %8510 = vmatpush3.bf16.msra.mxu0 %v9140_v40  ;;  %v2931_v52 = vld [vmem:[#allocation2 + $0x48] sm:$0xff] }
  0xb7   : > { %8511 = vmatprep.subr.bf16.mxu0 %v9141_v47  ;;  %8558 = vmatpush3.bf16.msra.mxu1 %v9146_v45  ;;  %v2571_v45 = vld [vmem:[#allocation2 + $0xe7] sm:$0xff] }
  0xb8   : > { %8559 = vmatprep.subr.bf16.mxu1 %v9147_v25 }
  0xba   : > { %8512 = vmatpush3.bf16.msra.mxu0 %v9141_v47  ;;  %v2572_v47 = vld [vmem:[#allocation2 + $0xef] sm:$0xff] }
  0xbb   : > { %8513 = vmatprep.subr.bf16.mxu0 %v9142_v61  ;;  %8560 = vmatpush3.bf16.msra.mxu1 %v9147_v25  ;;  %v2941_v25 = vld [vmem:[#allocation2 + $0xe8] sm:$0xff] }
  0xbc   : > { %8434 = vmatmul.mubr.bf16.gmra.mxu0 %v9509_v19  ;;  %8561 = vmatprep.subr.bf16.mxu1 %v9149_v26  ;;  %v9152_v19 = vld [vmem:[%s11539_s1 + $0x1c8] sm:$0xff]  }
  0xbd   : > { %8482 = vmatmul.mubr.bf16.gmra.mxu1 %v9669_v58  ;;  %8437 = vmatprep.mubr.bf16.mxu0 %v9531_v29  ;;  %v9151_v29 = vld [vmem:[%s11539_s1 + $0x180] sm:$0xff]  }
  0xbe   : > { %8485 = vmatprep.mubr.bf16.mxu1 %v9687_v10  ;;  %8514 = vmatpush3.bf16.msra.mxu0 %v9142_v61 }
  0xbf   : > { %8515 = vmatprep.subr.bf16.mxu0 %v9145_v1  ;;  %8562 = vmatpush3.bf16.msra.mxu1 %v9149_v26 }
  0xc0   : > { %8563 = vmatprep.subr.bf16.mxu1 %v9150_v17 }
  0xc2   : > { %8516 = vmatpush3.bf16.msra.mxu0 %v9145_v1  ;;  %v2942_v1 = vld [vmem:[#allocation2 + $0xf0] sm:$0xff] }
  0xc3   : > { %8517 = vmatprep.subr.bf16.mxu0 %v9148_v35  ;;  %8564 = vmatpush3.bf16.msra.mxu1 %v9150_v17  ;;  %v2573_v17 = vld [vmem:[#allocation2 + $0x107] sm:$0xff] }
  0xc4   : > { %8438 = vmatmul.mubr.bf16.gmra.mxu0 %v9537_v32  ;;  %8565 = vmatprep.subr.bf16.mxu1 %v9152_v19  ;;  %v2220_v32 = vld [vmem:[#allocation2 + $0x209] sm:$0xff] }
  0xc5   : > { %8486 = vmatmul.mubr.bf16.gmra.mxu1 %v9689_v11  ;;  %8441 = vmatprep.mubr.bf16.mxu0 %v9561_v43  ;;  %v2221_v43 = vld [vmem:[#allocation2 + $0x211] sm:$0xff]  ;;  %v2595_v11 = vpack.c.bf16 %v2566_v6, %v2565_v0 }
  0xc6   : > { %8489 = vmatprep.mubr.bf16.mxu1 %v9707_v15  ;;  %8518 = vmatpush3.bf16.msra.mxu0 %v9148_v35  ;;  %v9812_v58 = vpack.c.bf16 %v2221_v43, %v2220_v32  ;;  %v2574_v35 = vld [vmem:[#allocation2 + $0x10f] sm:$0xff] }
  0xc7   : > { %8519 = vmatprep.subr.bf16.mxu0 %v9151_v29  ;;  %8566 = vmatpush3.bf16.msra.mxu1 %v9152_v19 }
  0xc8   : > { %8567 = vmatprep.subr.bf16.mxu1 %v9153_v46 }
  0xca   : > { %8520 = vmatpush3.bf16.msra.mxu0 %v9151_v29  ;;  %v2943_v29 = vld [vmem:[#allocation2 + $0x108] sm:$0xff] }
  0xcb   : > { %8568 = vmatpush3.bf16.msra.mxu1 %v9153_v46  ;;  %8601 = vmatprep.subr.bf16.mxu0 %v9154_v41  ;;  %v2944_v46 = vld [vmem:[#allocation2 + $0x110] sm:$0xff] }
  0xcc   : > { %8442 = vmatmul.mubr.bf16.gmra.mxu0 %v9567_v49  ;;  %v2561_v49 = vld [vmem:[#allocation2 + $0x47] sm:$0xff] }
  0xcd   : > { %8490 = vmatmul.mubr.bf16.gmra.mxu1 %v9709_v16  ;;  %8445 = vmatprep.mubr.bf16.mxu0 %v9584_v54  ;;  %v2562_v54 = vld [vmem:[#allocation2 + $0x4f] sm:$0xff] }
  0xce   : > { %8493 = vmatprep.mubr.bf16.mxu1 %v9715_v34  ;;  %v2593_v62 = vpack.c.bf16 %v2562_v54, %v2561_v49  ;;  %v2939_v34 = vld [vmem:[#allocation2 + $0xc8] sm:$0xff]  ;;  %v2598_v49 = vpack.c.bf16 %v2572_v47, %v2571_v45  ;;  %v2950_v45 = vld [vmem:[#allocation2 + $0x170] sm:$0xff] }
  0xcf   : > { %v2581_v47 = vld [vmem:[#allocation2 + $0x187] sm:$0xff] }
  0xd4   : > { %8446 = vmatmul.mubr.bf16.gmra.mxu0 %v9590_v57  ;;  %v2932_v57 = vld [vmem:[#allocation2 + $0x50] sm:$0xff] }
  0xd5   : > { %8494 = vmatmul.mubr.bf16.gmra.mxu1 %v9717_v36  ;;  %8449 = vmatprep.mubr.bf16.mxu0 %v9602_v2  ;;  %v2963_v2 = vpack.c.bf16 %v2932_v57, %v2931_v52  ;;  %v2940_v36 = vld [vmem:[#allocation2 + $0xd0] sm:$0xff]  ;;  %v2968_v52 = vpack.c.bf16 %v2942_v1, %v2941_v25  ;;  %v2599_v57 = vpack.c.bf16 %v2574_v35, %v2573_v17  ;;  %v2951_v1 = vld [vmem:[#allocation2 + $0x188] sm:$0xff] }
  0xd6   : > { %8497 = vmatprep.mubr.bf16.mxu1 %v9723_v38  ;;  %v2966_v38 = vpack.c.bf16 %v2938_v24, %v2937_v23  ;;  %v2967_v60 = vpack.c.bf16 %v2940_v36, %v2939_v34  ;;  %v9160_v23 = vld [vmem:[%s11539_s1 + $0x208] sm:$0xff]   ;;  %v2952_v17 = vld [vmem:[#allocation2 + $0x190] sm:$0xff] }
  0xd7   : > { %v2582_v25 = vld [vmem:[#allocation2 + $0x18f] sm:$0xff] }
  0xdc   : > { %8450 = vmatmul.mubr.bf16.gmra.mxu0 %v9608_v8  ;;  %v2563_v8 = vld [vmem:[#allocation2 + $0x67] sm:$0xff] }
  0xdd   : > { %8498 = vmatmul.mubr.bf16.gmra.mxu1 %v9725_v53  ;;  %8453 = vmatprep.mubr.bf16.mxu0 %v9620_v12  ;;  %v2933_v12 = vld [vmem:[#allocation2 + $0x68] sm:$0xff]  ;;  %v2594_v56 = vpack.c.bf16 %v2564_v63, %v2563_v8  ;;  %v2597_v53 = vpack.c.bf16 %v2570_v27, %v2569_v30  ;;  %v2969_v8 = vpack.c.bf16 %v2944_v46, %v2943_v29 }
  0xde   : > { %8501 = vmatprep.mubr.bf16.mxu1 %v9731_v50  ;;  %v2964_v10 = vpack.c.bf16 %v2934_v13, %v2933_v12  ;;  %v9157_v50 = vld [vmem:[%s11539_s1 + $0x220] sm:$0xff]   ;;  %v9159_v12 = vld [vmem:[%s11539_s1 + $0x210] sm:$0xff]  }
  0xe4   : > { %8454 = vmatmul.mubr.bf16.gmra.mxu0 %v9613_v20 }
  0xe5   : > { %8502 = vmatmul.mubr.bf16.gmra.mxu1 %v9812_v58  ;;  %8521 = vmatprep.mubr.bf16.mxu0 %v2593_v62 }
  0xe6   : > { %8569 = vmatprep.mubr.bf16.mxu1 %v2963_v2 }
  0xec   : > { %v8235_v28 = vpop.f32.mrf.mxu0  ;;  %8522 = vmatmul.mubr.bf16.vlgmr.msra.gmra.mxu0 %v2594_v56  ;;  %v2575_v56 = vld [vmem:[#allocation2 + $0x127] sm:$0xff] }
  0xed   : > { %v8283_v21 = vpop.f32.mrf.mxu1  ;;  %8602 = vmatpush3.bf16.msra.mxu0 %v9154_v41  ;;  %8570 = vmatmul.mubr.bf16.vlgmr.msra.gmra.mxu1 %v2964_v10  ;;  %v9158_v41 = vld [vmem:[%s11539_s1 + $0x218] sm:$0xff]   ;;  %v2600_v30 = vpack.c.bf16 %v2576_v59, %v2575_v56 }
  0xee   : > { %v9819_v15 = vadd.f32 %v8283_v21, %v8235_v28  ;;  %v519_v16 = vpop.f32.mrf.mxu0  ;;  %8525 = vmatprep.mubr.bf16.mxu0 %v2595_v11  ;;  %8603 = vmatprep.subr.bf16.mxu0 %v9155_v18  ;;  %v2578_v28 = vld [vmem:[#allocation2 + $0x14f] sm:$0xff] }
  0xef   : > { %v889_v44 = vpop.f32.mrf.mxu1  ;;  %8573 = vmatprep.mubr.bf16.mxu1 %v2965_v4  ;;  %v2577_v4 = vld [vmem:[#allocation2 + $0x147] sm:$0xff] }
  0xf0   : > { %v9824_v31 = vadd.f32 %v889_v44, %v519_v16  ;;  %v8236_v33 = vpop.f32.mrf.mxu0  ;;  %v2947_v21 = vld [vmem:[#allocation2 + $0x148] sm:$0xff]  ;;  %v2601_v44 = vpack.c.bf16 %v2578_v28, %v2577_v4 }
  0xf1   : > { %v8284_v48 = vpop.f32.mrf.mxu1  ;;  %8604 = vmatpush3.bf16.msra.mxu0 %v9155_v18  ;;  %v2946_v18 = vld [vmem:[#allocation2 + $0x130] sm:$0xff]  ;;  %v2955_v28 = vld [vmem:[#allocation2 + $0x1c8] sm:$0xff] }
  0xf2   : > { %v9826_v39 = vadd.f32 %v8284_v48, %v8236_v33  ;;  %v522_v51 = vpop.f32.mrf.mxu0  ;;  %8605 = vmatprep.subr.bf16.mxu0 %v9156_v42  ;;  %v2971_v33 = vpack.c.bf16 %v2948_v22, %v2947_v21  ;;  %v9161_v48 = vld [vmem:[%s11539_s1 + $0x200] sm:$0xff]  }
  0xf3   : > { %v892_v55 = vpop.f32.mrf.mxu1 }
  0xf4   : > { %v9831_v3 = vadd.f32 %v892_v55, %v522_v51  ;;  %v8239_v5 = vpop.f32.mrf.mxu0  ;;  %8526 = vmatmul.mubr.bf16.gmra.mxu0 %v2596_v37  ;;  %v2580_v55 = vld [vmem:[#allocation2 + $0x16f] sm:$0xff] }
  0xf5   : > { %v8287_v40 = vpop.f32.mrf.mxu1  ;;  %8574 = vmatmul.mubr.bf16.gmra.mxu1 %v2966_v38  ;;  %8529 = vmatprep.mubr.bf16.mxu0 %v2597_v53 }
  0xf6   : > { %v9833_v61 = vadd.f32 %v8287_v40, %v8239_v5  ;;  %v535_v26 = vpop.f32.mrf.mxu0  ;;  %8577 = vmatprep.mubr.bf16.mxu1 %v2967_v60  ;;  %8606 = vmatpush3.bf16.msra.mxu0 %v9156_v42  ;;  %v2970_v42 = vpack.c.bf16 %v2946_v18, %v2945_v9  ;;  %v2579_v60 = vld [vmem:[#allocation2 + $0x167] sm:$0xff]  ;;  %v2954_v9 = vld [vmem:[#allocation2 + $0x1b0] sm:$0xff] }
  0xf7   : > { %v905_v19 = vpop.f32.mrf.mxu1  ;;  %8607 = vmatprep.subr.bf16.mxu0 %v9157_v50  ;;  %v2602_v29 = vpack.c.bf16 %v2580_v55, %v2579_v60  ;;  %v2586_v18 = vld [vmem:[#allocation2 + $0x1cf] sm:$0xff] }
  0xf8   : > { %v9838_v32 = vadd.f32 %v905_v19, %v535_v26  ;;  %v8240_v43 = vpop.f32.mrf.mxu0 }
  0xf9   : > { %v8288_v54 = vpop.f32.mrf.mxu1 }
  0xfa   : > { %v9840_v62 = vadd.f32 %v8288_v54, %v8240_v43  ;;  %v538_v2 = vpop.f32.mrf.mxu0  ;;  %8608 = vmatpush3.bf16.msra.mxu0 %v9157_v50  ;;  %v2949_v50 = vld [vmem:[#allocation2 + $0x168] sm:$0xff]  ;;  %v2603_v43 = vpack.c.bf16 %v2582_v25, %v2581_v47 }
  0xfb   : > { %v908_v63 = vpop.f32.mrf.mxu1  ;;  %8609 = vmatprep.subr.bf16.mxu0 %v9158_v41 }
  0xfc   : > { %v9845_v13 = vadd.f32 %v908_v63, %v538_v2  ;;  %v8243_v0 = vpop.f32.mrf.mxu0  ;;  %8530 = vmatmul.mubr.bf16.gmra.mxu0 %v2598_v49 }
  0xfd   : > { %v8291_v6 = vpop.f32.mrf.mxu1  ;;  %8578 = vmatmul.mubr.bf16.gmra.mxu1 %v2968_v52  ;;  %8533 = vmatprep.mubr.bf16.mxu0 %v2599_v57  ;;  %v2973_v52 = vpack.c.bf16 %v2952_v17, %v2951_v1 }
  0xfe   : > { %v9847_v10 = vadd.f32 %v8291_v6, %v8243_v0  ;;  %v551_v11 = vpop.f32.mrf.mxu0  ;;  %8581 = vmatprep.mubr.bf16.mxu1 %v2969_v8  ;;  %8610 = vmatpush3.bf16.msra.mxu0 %v9158_v41  ;;  %v2972_v41 = vpack.c.bf16 %v2950_v45, %v2949_v50  ;;  %v2584_v0 = vld [vmem:[#allocation2 + $0x1af] sm:$0xff] }
  0xff   : > { %v921_v14 = vpop.f32.mrf.mxu1  ;;  %8611 = vmatprep.subr.bf16.mxu0 %v9159_v12  ;;  %v2953_v6 = vld [vmem:[#allocation2 + $0x1a8] sm:$0xff] }
 0x100   : > { %v9852_v24 = vadd.f32 %v921_v14, %v551_v11  ;;  %v8244_v16 = vpop.f32.mrf.mxu0  ;;  %v2585_v11 = vld [vmem:[#allocation2 + $0x1c7] sm:$0xff]  ;;  %v2956_v14 = vld [vmem:[#allocation2 + $0x1d0] sm:$0xff] }
 0x101   : > { %v8292_v27 = vpop.f32.mrf.mxu1  ;;  %v2957_v50 = vld [vmem:[#allocation2 + $0x1e8] sm:$0xff] }
 0x102   : > { %v9854_v34 = vadd.f32 %v8292_v27, %v8244_v16  ;;  %v554_v36 = vpop.f32.mrf.mxu0  ;;  %8612 = vmatpush3.bf16.msra.mxu0 %v9159_v12  ;;  %v2583_v12 = vld [vmem:[#allocation2 + $0x1a7] sm:$0xff]  ;;  %v2605_v27 = vpack.c.bf16 %v2586_v18, %v2585_v11 }
 0x103   : > { %v924_v37 = vpop.f32.mrf.mxu1  ;;  %8613 = vmatprep.subr.bf16.mxu0 %v9160_v23  ;;  %v9234_v18 = vld [vmem:[#allocation2] sm:$0xff] }
 0x104   : > { %v9859_v38 = vadd.f32 %v924_v37, %v554_v36  ;;  %v8247_v53 = vpop.f32.mrf.mxu0  ;;  %8534 = vmatmul.mubr.bf16.gmra.mxu0 %v2600_v30  ;;  %v2974_v30 = vpack.c.bf16 %v2954_v9, %v2953_v6  ;;  %v2975_v36 = vpack.c.bf16 %v2956_v14, %v2955_v28 }
 0x105   : > { %v8295_v51 = vpop.f32.mrf.mxu1  ;;  %8582 = vmatmul.mubr.bf16.gmra.mxu1 %v2970_v42  ;;  %8537 = vmatprep.mubr.bf16.mxu0 %v2601_v44 }
 0x106   : > { %v9861_v5 = vadd.f32 %v8295_v51, %v8247_v53  ;;  %v567_v40 = vpop.f32.mrf.mxu0  ;;  %8585 = vmatprep.mubr.bf16.mxu1 %v2971_v33  ;;  %8614 = vmatpush3.bf16.msra.mxu0 %v9160_v23  ;;  %v2604_v23 = vpack.c.bf16 %v2584_v0, %v2583_v12  ;;  %v2587_v53 = vld [vmem:[#allocation2 + $0x1e7] sm:$0xff]  ;;  %v2588_v51 = vld [vmem:[#allocation2 + $0x1ef] sm:$0xff] }
 0x107   : > { %v937_v26 = vpop.f32.mrf.mxu1  ;;  %8615 = vmatprep.subr.bf16.mxu0 %v9161_v48  ;;  %v3302_v12 = vld [vmem:[#allocation2 + $0x51] sm:$0xff] }
 0x108   : > { %v9863_v35 = vadd.f32 %v937_v26, %v567_v40  ;;  %v8248_v19 = vpop.f32.mrf.mxu0  ;;  %v2958_v40 = vld [vmem:[#allocation2 + $0x1f0] sm:$0xff]  ;;  %v2606_v26 = vpack.c.bf16 %v2588_v51, %v2587_v53 }
 0x109   : > { %v8296_v46 = vpop.f32.mrf.mxu1  ;;  %v2976_v17 = vpack.c.bf16 %v2958_v40, %v2957_v50 }
 0x10a   : > { %v9865_v49 = vadd.f32 %v8296_v46, %v8248_v19  ;;  %v570_v54 = vpop.f32.mrf.mxu0  ;;  %8616 = vmatpush3.bf16.msra.mxu0 %v9161_v48 }
 0x10b   : > { %v940_v57 = vpop.f32.mrf.mxu1 }
 0x10c   : > { %v9867_v2 = vadd.f32 %v940_v57, %v570_v54  ;;  %v8251_v8 = vpop.f32.mrf.mxu0  ;;  %8538 = vmatmul.mubr.bf16.gmra.mxu0 %v2602_v29  ;;  %v2591_v54 = vld [vmem:[#allocation2 + $0x227] sm:$0xff] }
 0x10d   : > { %v8299_v63 = vpop.f32.mrf.mxu1  ;;  %8586 = vmatmul.mubr.bf16.gmra.mxu1 %v2972_v41  ;;  %8541 = vmatprep.mubr.bf16.mxu0 %v2603_v43 }
 0x10e   : > { %v9869_v56 = vadd.f32 %v8299_v63, %v8251_v8  ;;  %v583_v59 = vpop.f32.mrf.mxu0  ;;  %8589 = vmatprep.mubr.bf16.mxu1 %v2973_v52  ;;  %v2592_v52 = vld [vmem:[#allocation2 + $0x22f] sm:$0xff] }
 0x10f   : > { %v953_v4 = vpop.f32.mrf.mxu1  ;;  %v3301_v63 = vld [vmem:[#allocation2 + $0x49] sm:$0xff]  ;;  %v2608_v9 = vpack.c.bf16 %v2592_v52, %v2591_v54  ;;  %v3308_v52 = vld [vmem:[#allocation2 + $0xb1] sm:$0xff] }
 0x110   : > { %v9871_v21 = vadd.f32 %v953_v4, %v583_v59  ;;  %v8252_v22 = vpop.f32.mrf.mxu0  ;;  %v9895_v4 = vpack.c.bf16 %v9234_v18, %v9234_v18  ;;  %v3333_v28 = vpack.c.bf16 %v3302_v12, %v3301_v63  ;;  %v3307_v54 = vld [vmem:[#allocation2 + $0xa9] sm:$0xff]  ;;  %v3310_v12 = vld [vmem:[#allocation2 + $0xd1] sm:$0xff] }
 0x111   : > { %v8300_v16 = vpop.f32.mrf.mxu1  ;;  %v3309_v63 = vld [vmem:[#allocation2 + $0xc9] sm:$0xff]  ;;  %v3336_v18 = vpack.c.bf16 %v3308_v52, %v3307_v54 }
 0x112   : > { %v9873_v42 = vadd.f32 %v8300_v16, %v8252_v22  ;;  %v9875_v44 = vpop.f32.mrf.mxu0  ;;  %v3303_v16 = vld [vmem:[#allocation2 + $0x69] sm:$0xff] }
 0x113   : > { %v9877_v33 = vpop.f32.mrf.mxu1 }
 0x114   : > { %v8255_v37 = vpop.f32.mrf.mxu0  ;;  %8542 = vmatmul.mubr.bf16.gmra.mxu0 %v2604_v23 }
 0x115   : > { %v8303_v48 = vpop.f32.mrf.mxu1  ;;  %8590 = vmatmul.mubr.bf16.gmra.mxu1 %v2974_v30  ;;  %8545 = vmatprep.mubr.bf16.mxu0 %v2605_v27  ;;  %v3304_v30 = vld [vmem:[#allocation2 + $0x71] sm:$0xff] }
 0x116   : > { %v9879_v60 = vadd.f32 %v8303_v48, %v8255_v37  ;;  %v599_v55 = vpop.f32.mrf.mxu0  ;;  %8593 = vmatprep.mubr.bf16.mxu1 %v2975_v36  ;;  %v3305_v37 = vld [vmem:[#allocation2 + $0x89] sm:$0xff]  ;;  %v3306_v48 = vld [vmem:[#allocation2 + $0x91] sm:$0xff]  ;;  %v3334_v50 = vpack.c.bf16 %v3304_v30, %v3303_v16 }
 0x117   : > { %v969_v45 = vpop.f32.mrf.mxu1 }
 0x118   : > { %v9881_v47 = vadd.f32 %v969_v45, %v599_v55  ;;  %v8256_v25 = vpop.f32.mrf.mxu0  ;;  %v3335_v45 = vpack.c.bf16 %v3306_v48, %v3305_v37 }
 0x119   : > { %v8304_v1 = vpop.f32.mrf.mxu1 }
 0x11a   : > { %v9883_v19 = vadd.f32 %v8304_v1, %v8256_v25  ;;  %v9885_v29 = vpop.f32.mrf.mxu0 }
 0x11b   : > { %v9887_v46 = vpop.f32.mrf.mxu1 }
 0x11c   : > { %v8259_v41 = vpop.f32.mrf.mxu0  ;;  %8546 = vmatmul.mubr.bf16.gmra.mxu0 %v2606_v26 }
 0x11d   : > { %v8307_v43 = vpop.f32.mrf.mxu1  ;;  %8594 = vmatmul.mubr.bf16.gmra.mxu1 %v2976_v17  ;;  %8549 = vmatprep.mubr.bf16.mxu0 %v9733_v7 }
 0x11e   : > { %v9890_v57 = vadd.f32 %v8307_v43, %v8259_v41  ;;  %v615_v8 = vpop.f32.mrf.mxu0  ;;  %8597 = vmatprep.mubr.bf16.mxu1 %v9613_v20 }
 0x11f   : > { %v985_v0 = vpop.f32.mrf.mxu1 }
 0x120   : > { %v9893_v6 = vadd.f32 %v985_v0, %v615_v8  ;;  %v8260_v59 = vpop.f32.mrf.mxu0 }
 0x121   : > { %v8308_v11 = vpop.f32.mrf.mxu1 }
 0x122   : > { %v9897_v7 = vadd.f32 %v8308_v11, %v8260_v59  ;;  %v9899_v14 = vpop.f32.mrf.mxu0 }
 0x123   : > { %v9901_v22 = vpop.f32.mrf.mxu1 }
 0x124   : > { %v8263_v23 = vpop.f32.mrf.mxu0  ;;  %8550 = vmatmul.mubr.bf16.gmra.mxu0 %v2608_v9 }
 0x125   : > { %v8311_v20 = vpop.f32.mrf.mxu1  ;;  %8598 = vmatmul.mubr.bf16.gmra.mxu1 %v9895_v4  ;;  %8617 = vmatprep.mubr.bf16.mxu0 %v3333_v28 }
 0x126   : > { %v9904_v27 = vadd.f32 %v8311_v20, %v8263_v23  ;;  %v631_v36 = vpop.f32.mrf.mxu0 }
 0x127   : > { %v1001_v53 = vpop.f32.mrf.mxu1 }
 0x128   : > { %v9906_v51 = vadd.f32 %v1001_v53, %v631_v36  ;;  %v8264_v55 = vpop.f32.mrf.mxu0 }
 0x129   : > { %v8312_v40 = vpop.f32.mrf.mxu1 }
 0x12a   : > { %v9908_v25 = vadd.f32 %v8312_v40, %v8264_v55  ;;  %v9910_v26 = vpop.f32.mrf.mxu0  ;;  %v3311_v55 = vld [vmem:[#allocation2 + $0xe9] sm:$0xff] }
 0x12b   : > { %v9912_v1 = vpop.f32.mrf.mxu1  ;;  %v3313_v40 = vld [vmem:[#allocation2 + $0x109] sm:$0xff] }
 0x12c   : > { %v8331_v17 = vpop.f32.mrf.mxu0  ;;  %8618 = vmatmul.mubr.bf16.vlgmr.msra.gmra.mxu0 %v3334_v50 }
 0x12d   : > { %v1388_v41 = vadd.f32 %v8331_v17, %v9819_v15  ;;  %v8379_v43 = vpop.f32.mrf.mxu1  ;;  %8621 = vmatprep.mubr.bf16.mxu0 %v3335_v45  ;;  %v3337_v15 = vpack.c.bf16 %v3310_v12, %v3309_v63  ;;  %v3314_v45 = vld [vmem:[#allocation2 + $0x111] sm:$0xff] }
 0x12e   : > { %v1259_v8 = vpop.f32.mrf.mxu0 }
 0x12f   : > { %v1386_v0 = vadd.f32 %v1259_v8, %v9824_v31  ;;  %v9916_v59 = vadd.f32 %v8379_v43, %v1388_v41  ;;  %v1629_v9 = vpop.f32.mrf.mxu1 }
 0x130   : > { %v8332_v11 = vpop.f32.mrf.mxu0 }
 0x131   : > { %v1389_v28 = vadd.f32 %v8332_v11, %v9826_v39  ;;  %v9919_v23 = vadd.f32 %v1629_v9, %v1386_v0  ;;  %v8380_v20 = vpop.f32.mrf.mxu1  ;;  %v3312_v39 = vld [vmem:[#allocation2 + $0xf1] sm:$0xff] }
 0x132   : > { %v1262_v16 = vpop.f32.mrf.mxu0  ;;  %v3338_v54 = vpack.c.bf16 %v3312_v39, %v3311_v55 }
 0x133   : > { %v9922_v30 = vadd.f32 %v1262_v16, %v9831_v3  ;;  %v9924_v36 = vadd.f32 %v8380_v20, %v1389_v28  ;;  %v9926_v37 = vpop.f32.mrf.mxu1  ;;  %v3315_v20 = vld [vmem:[#allocation2 + $0x129] sm:$0xff] }
 0x134   : > { %v8335_v31 = vpop.f32.mrf.mxu0  ;;  %8622 = vmatmul.mubr.bf16.gmra.mxu0 %v3336_v18  ;;  %v3317_v16 = vld [vmem:[#allocation2 + $0x149] sm:$0xff] }
 0x135   : > { %v1392_v48 = vadd.f32 %v8335_v31, %v9833_v61  ;;  %v8383_v53 = vpop.f32.mrf.mxu1  ;;  %8625 = vmatprep.mubr.bf16.mxu0 %v3337_v15  ;;  %v3339_v61 = vpack.c.bf16 %v3314_v45, %v3313_v40  ;;  %v3318_v31 = vld [vmem:[#allocation2 + $0x151] sm:$0xff] }
 0x136   : > { %v1275_v50 = vpop.f32.mrf.mxu0 }
 0x137   : > { %v1390_v17 = vadd.f32 %v1275_v50, %v9838_v32  ;;  %v9930_v41 = vadd.f32 %v8383_v53, %v1392_v48  ;;  %v1645_v3 = vpop.f32.mrf.mxu1 }
 0x138   : > { %v8336_v43 = vpop.f32.mrf.mxu0 }
 0x139   : > { %v1393_v52 = vadd.f32 %v8336_v43, %v9840_v62  ;;  %v9933_v8 = vadd.f32 %v1645_v3, %v1390_v17  ;;  %v8384_v63 = vpop.f32.mrf.mxu1  ;;  %v3316_v62 = vld [vmem:[#allocation2 + $0x131] sm:$0xff] }
 0x13a   : > { %v1278_v12 = vpop.f32.mrf.mxu0  ;;  %v3340_v39 = vpack.c.bf16 %v3316_v62, %v3315_v20 }
 0x13b   : > { %v9936_v0 = vadd.f32 %v1278_v12, %v9845_v13  ;;  %v9938_v9 = vadd.f32 %v8384_v63, %v1393_v52  ;;  %v9940_v11 = vpop.f32.mrf.mxu1  ;;  %v3320_v12 = vld [vmem:[#allocation2 + $0x171] sm:$0xff] }
 0x13c   : > { %v8339_v32 = vpop.f32.mrf.mxu0  ;;  %8626 = vmatmul.mubr.bf16.gmra.mxu0 %v3338_v54 }
 0x13d   : > { %v1396_v18 = vadd.f32 %v8339_v32, %v9847_v10  ;;  %v8387_v28 = vpop.f32.mrf.mxu1  ;;  %8629 = vmatprep.mubr.bf16.mxu0 %v3339_v61  ;;  %v3341_v10 = vpack.c.bf16 %v3318_v31, %v3317_v16  ;;  %v3319_v61 = vld [vmem:[#allocation2 + $0x169] sm:$0xff] }
 0x13e   : > { %v1291_v15 = vpop.f32.mrf.mxu0  ;;  %v3342_v16 = vpack.c.bf16 %v3320_v12, %v3319_v61 }
 0x13f   : > { %v1394_v48 = vadd.f32 %v1291_v15, %v9852_v24  ;;  %v9944_v53 = vadd.f32 %v8387_v28, %v1396_v18  ;;  %v1661_v13 = vpop.f32.mrf.mxu1  ;;  %v9162_v24 = vld [vmem:[%s11539_s1 + $0x278] sm:$0xff]  }
 0x140   : > { %v8340_v55 = vpop.f32.mrf.mxu0  ;;  %8649 = vmatprep.subr.bf16.mxu1 %v9162_v24  ;;  %v3322_v18 = vld [vmem:[#allocation2 + $0x191] sm:$0xff] }
 0x141   : > { %v1397_v50 = vadd.f32 %v8340_v55, %v9854_v34  ;;  %v9947_v40 = vadd.f32 %v1661_v13, %v1394_v48  ;;  %v8388_v45 = vpop.f32.mrf.mxu1  ;;  %8650 = vmatpush3.bf16.msra.mxu1 %v9162_v24  ;;  %v3323_v24 = vld [vmem:[#allocation2 + $0x1a9] sm:$0xff] }
 0x142   : > { %v1294_v17 = vpop.f32.mrf.mxu0 }
 0x143   : > { %v9950_v3 = vadd.f32 %v1294_v17, %v9859_v38  ;;  %v9952_v43 = vadd.f32 %v8388_v45, %v1397_v50  ;;  %v9954_v54 = vpop.f32.mrf.mxu1  ;;  %v3321_v38 = vld [vmem:[#allocation2 + $0x189] sm:$0xff] }
 0x144   : > { %v8343_v52 = vpop.f32.mrf.mxu0  ;;  %8630 = vmatmul.mubr.bf16.gmra.mxu0 %v3340_v39  ;;  %v3343_v13 = vpack.c.bf16 %v3322_v18, %v3321_v38 }
 0x145   : > { %v1400_v34 = vadd.f32 %v8343_v52, %v9861_v5  ;;  %v8391_v63 = vpop.f32.mrf.mxu1  ;;  %8633 = vmatprep.mubr.bf16.mxu0 %v3341_v10  ;;  %v3324_v52 = vld [vmem:[#allocation2 + $0x1b1] sm:$0xff] }
 0x146   : > { %v1307_v32 = vpop.f32.mrf.mxu0  ;;  %v3344_v18 = vpack.c.bf16 %v3324_v52, %v3323_v24 }
 0x147   : > { %v1398_v28 = vadd.f32 %v1307_v32, %v9863_v35  ;;  %v9961_v20 = vadd.f32 %v8391_v63, %v1400_v34  ;;  %v1677_v62 = vpop.f32.mrf.mxu1  ;;  %v9163_v35 = vld [vmem:[%s11539_s1 + $0x270] sm:$0xff]  }
 0x148   : > { %v8344_v15 = vpop.f32.mrf.mxu0  ;;  %8651 = vmatprep.subr.bf16.mxu1 %v9163_v35  ;;  %v3326_v63 = vld [vmem:[#allocation2 + $0x1d1] sm:$0xff] }
 0x149   : > { %v1401_v31 = vadd.f32 %v8344_v15, %v9865_v49  ;;  %v9964_v48 = vadd.f32 %v1677_v62, %v1398_v28  ;;  %v8392_v5 = vpop.f32.mrf.mxu1  ;;  %8652 = vmatpush3.bf16.msra.mxu1 %v9163_v35 }
 0x14a   : > { %v1310_v55 = vpop.f32.mrf.mxu0 }
 0x14b   : > { %v9967_v39 = vadd.f32 %v1310_v55, %v9867_v2  ;;  %v9969_v50 = vadd.f32 %v8392_v5, %v1401_v31  ;;  %v9971_v45 = vpop.f32.mrf.mxu1  ;;  %v3325_v2 = vld [vmem:[#allocation2 + $0x1c9] sm:$0xff] }
 0x14c   : > { %11545 = vst [vmem:[#allocation5_spill] sm:$0xff] %v9971_v45  ;;  %v8347_v10 = vpop.f32.mrf.mxu0  ;;  %8634 = vmatmul.mubr.bf16.gmra.mxu0 %v3342_v16  ;;  %v3345_v15 = vpack.c.bf16 %v3326_v63, %v3325_v2 }
 0x14d   : > { %11544 = vst [vmem:[#allocation4_spill] sm:$0xff] %v9967_v39  ;;  %v1404_v49 = vadd.f32 %v8347_v10, %v9869_v56  ;;  %v8395_v17 = vpop.f32.mrf.mxu1  ;;  %8637 = vmatprep.mubr.bf16.mxu0 %v3343_v13  ;;  %v3328_v10 = vld [vmem:[#allocation2 + $0x1f1] sm:$0xff] }
 0x14e   : > { %v1323_v34 = vpop.f32.mrf.mxu0 }
 0x14f   : > { %v1402_v61 = vadd.f32 %v1323_v34, %v9871_v21  ;;  %v9978_v12 = vadd.f32 %v8395_v17, %v1404_v49  ;;  %v1693_v32 = vpop.f32.mrf.mxu1  ;;  %v9164_v21 = vld [vmem:[%s11539_s1 + $0x268] sm:$0xff]  }
 0x150   : > { %v8348_v38 = vpop.f32.mrf.mxu0  ;;  %8653 = vmatprep.subr.bf16.mxu1 %v9164_v21 }
 0x151   : > { %v1405_v28 = vadd.f32 %v8348_v38, %v9873_v42  ;;  %v9981_v62 = vadd.f32 %v1693_v32, %v1402_v61  ;;  %v8396_v56 = vpop.f32.mrf.mxu1  ;;  %v3327_v42 = vld [vmem:[#allocation2 + $0x1e9] sm:$0xff]  ;;  %8654 = vmatpush3.bf16.msra.mxu1 %v9164_v21  ;;  %v9167_v38 = vld [vmem:[%s11539_s1 + $0x2b8] sm:$0xff]  }
 0x152   : > { %v9983_v16 = vpop.f32.mrf.mxu0  ;;  %v3346_v2 = vpack.c.bf16 %v3328_v10, %v3327_v42  ;;  %8697 = vmatprep.subr.bf16.mxu0 %v9167_v38  ;;  %v3331_v21 = vld [vmem:[#allocation2 + $0x229] sm:$0xff] }
 0x153   : > { %11546 = vst [vmem:[#allocation6_spill] sm:$0xff] %v9983_v16  ;;  %v9985_v31 = vadd.f32 %v8396_v56, %v1405_v28  ;;  %v9987_v5 = vpop.f32.mrf.mxu1  ;;  %8698 = vmatpush3.bf16.msra.mxu0 %v9167_v38  ;;  %v9166_v38 = vld [vmem:[%s11539_s1 + $0x258] sm:$0xff]  }
 0x154   : > { %11547 = vst [vmem:[#allocation7_spill] sm:$0xff] %v9987_v5  ;;  %v8351_v13 = vpop.f32.mrf.mxu0  ;;  %8638 = vmatmul.mubr.bf16.gmra.mxu0 %v3344_v18 }
 0x155   : > { %v1408_v55 = vadd.f32 %v8351_v13, %v9879_v60  ;;  %v8399_v35 = vpop.f32.mrf.mxu1  ;;  %8641 = vmatprep.mubr.bf16.mxu0 %v3345_v15  ;;  %v3332_v13 = vld [vmem:[#allocation2 + $0x231] sm:$0xff] }
 0x156   : > { %v1339_v49 = vpop.f32.mrf.mxu0 }
 0x157   : > { %v1406_v17 = vadd.f32 %v1339_v49, %v9881_v47  ;;  %v9994_v24 = vadd.f32 %v8399_v35, %v1408_v55  ;;  %v1709_v52 = vpop.f32.mrf.mxu1  ;;  %v9165_v47 = vld [vmem:[%s11539_s1 + $0x260] sm:$0xff]   ;;  %v9168_v35 = vld [vmem:[%s11539_s1 + $0x2b0] sm:$0xff]  }
 0x158   : > { %v8352_v34 = vpop.f32.mrf.mxu0  ;;  %8655 = vmatprep.subr.bf16.mxu1 %v9165_v47  ;;  %8699 = vmatprep.subr.bf16.mxu0 %v9168_v35 }
 0x159   : > { %v1409_v63 = vadd.f32 %v8352_v34, %v9883_v19  ;;  %v9997_v61 = vadd.f32 %v1709_v52, %v1406_v17  ;;  %v8400_v32 = vpop.f32.mrf.mxu1  ;;  %8656 = vmatpush3.bf16.msra.mxu1 %v9165_v47  ;;  %8700 = vmatpush3.bf16.msra.mxu0 %v9168_v35 }
 0x15a   : > { %v9999_v60 = vpop.f32.mrf.mxu0  ;;  %8657 = vmatprep.subr.bf16.mxu1 %v9166_v38 }
 0x15b   : > { %11548 = vst [vmem:[#allocation8_spill] sm:$0xff] %v9999_v60  ;;  %v10004_v18 = vadd.f32 %v8400_v32, %v1409_v63  ;;  %v10006_v28 = vpop.f32.mrf.mxu1  ;;  %v9170_v63 = vld [vmem:[%s11539_s1 + $0x2a8] sm:$0xff]  }
 0x15c   : > { %11549 = vst [vmem:[#allocation9_spill] sm:$0xff] %v10006_v28  ;;  %v8355_v56 = vpop.f32.mrf.mxu0  ;;  %8642 = vmatmul.mubr.bf16.gmra.mxu0 %v3346_v2  ;;  %8701 = vmatprep.subr.bf16.mxu0 %v9170_v63  ;;  %v3837_v28 = vld [vmem:[#allocation2 + $0xf] sm:$0xff] }
 0x15d   : > { %v1412_v19 = vadd.f32 %v8355_v56, %v9890_v57  ;;  %v8403_v15 = vpop.f32.mrf.mxu1  ;;  %8645 = vmatprep.mubr.bf16.mxu0 %v9812_v58  ;;  %v3348_v57 = vpack.c.bf16 %v3332_v13, %v3331_v21  ;;  %8658 = vmatpush3.bf16.msra.mxu1 %v9166_v38 }
 0x15e   : > { %v1355_v55 = vpop.f32.mrf.mxu0  ;;  %8702 = vmatpush3.bf16.msra.mxu0 %v9170_v63 }
 0x15f   : > { %v1410_v42 = vadd.f32 %v1355_v55, %v9893_v6  ;;  %v10017_v10 = vadd.f32 %v8403_v15, %v1412_v19  ;;  %v1725_v49 = vpop.f32.mrf.mxu1  ;;  %v9171_v15 = vld [vmem:[%s11539_s1 + $0x2a0] sm:$0xff]  }
 0x160   : > { %v8356_v17 = vpop.f32.mrf.mxu0  ;;  %8703 = vmatprep.subr.bf16.mxu0 %v9171_v15 }
 0x161   : > { %v1413_v58 = vadd.f32 %v8356_v17, %v9897_v7  ;;  %v10020_v52 = vadd.f32 %v1725_v49, %v1410_v42  ;;  %v8404_v34 = vpop.f32.mrf.mxu1 }
 0x162   : > { %v10022_v2 = vpop.f32.mrf.mxu0  ;;  %8704 = vmatpush3.bf16.msra.mxu0 %v9171_v15 }
 0x163   : > { %11550 = vst [vmem:[#allocation10_spill] sm:$0xff] %v10022_v2  ;;  %v10027_v32 = vadd.f32 %v8404_v34, %v1413_v58  ;;  %v10029_v6 = vpop.f32.mrf.mxu1  ;;  %v9169_v34 = vld [vmem:[%s11539_s1 + $0x250] sm:$0xff]  }
 0x164   : > { %11551 = vst [vmem:[#allocation11_spill] sm:$0xff] %v10029_v6  ;;  %v8359_v47 = vpop.f32.mrf.mxu0  ;;  %8646 = vmatmul.mubr.bf16.gmra.mxu0 %v3348_v57  ;;  %v9173_v57 = vld [vmem:[%s11539_s1 + $0x298] sm:$0xff]   ;;  %8659 = vmatprep.subr.bf16.mxu1 %v9169_v34 }
 0x165   : > { %v1416_v7 = vadd.f32 %v8359_v47, %v9904_v27  ;;  %v8407_v56 = vpop.f32.mrf.mxu1  ;;  %8705 = vmatprep.subr.bf16.mxu0 %v9173_v57  ;;  %8660 = vmatpush3.bf16.msra.mxu1 %v9169_v34  ;;  %v9177_v34 = vld [vmem:[%s11539_s1 + $0x280] sm:$0xff]  }
 0x166   : > { %v1371_v19 = vpop.f32.mrf.mxu0  ;;  %8706 = vmatpush3.bf16.msra.mxu0 %v9173_v57  ;;  %8713 = vmatprep.mubr.bf16.mxu0 %v9895_v4  ;;  %v3836_v4 = vld [vmem:[#allocation2 + $0x7] sm:$0xff] }
 0x167   : > { %v1414_v21 = vadd.f32 %v1371_v19, %v9906_v51  ;;  %v10039_v13 = vadd.f32 %v8407_v56, %v1416_v7  ;;  %v1741_v55 = vpop.f32.mrf.mxu1  ;;  %v9174_v7 = vld [vmem:[%s11539_s1 + $0x290] sm:$0xff]  }
 0x168   : > { %v8360_v35 = vpop.f32.mrf.mxu0  ;;  %8707 = vmatprep.subr.bf16.mxu0 %v9174_v7 }
 0x169   : > { %v1417_v42 = vadd.f32 %v8360_v35, %v9908_v25  ;;  %v10042_v49 = vadd.f32 %v1741_v55, %v1414_v21  ;;  %v8408_v27 = vpop.f32.mrf.mxu1  ;;  %v9176_v35 = vld [vmem:[%s11539_s1 + $0x288] sm:$0xff]  }
 0x16a   : > { %v10044_v17 = vpop.f32.mrf.mxu0  ;;  %8708 = vmatpush3.bf16.msra.mxu0 %v9174_v7 }
 0x16b   : > { %11552 = vst [vmem:[#allocation12_spill] sm:$0xff] %v10044_v17  ;;  %v10049_v58 = vadd.f32 %v8408_v27, %v1417_v42  ;;  %v10051_v51 = vpop.f32.mrf.mxu1  ;;  %8709 = vmatprep.subr.bf16.mxu0 %v9176_v35  ;;  %v9175_v17 = vld [vmem:[%s11539_s1 + $0x240] sm:$0xff]  }
 0x16c   : > { %11553 = vst [vmem:[#allocation13_spill] sm:$0xff] %v10051_v51  ;;  %v8427_v63 = vpop.f32.mrf.mxu0 }
 0x16d   : > { %v10057_v25 = vadd.f32 %v8427_v63, %v9916_v59  ;;  %v10059_v38 = vpop.f32.mrf.mxu1 }
 0x16e   : > { %v1999_v47 = vpop.f32.mrf.mxu0  ;;  %8710 = vmatpush3.bf16.msra.mxu0 %v9176_v35  ;;  %v9172_v35 = vld [vmem:[%s11539_s1 + $0x248] sm:$0xff]  }
 0x16f   : > { %v10065_v56 = vadd.f32 %v1999_v47, %v9919_v23  ;;  %v10067_v19 = vpop.f32.mrf.mxu1  ;;  %8711 = vmatprep.subr.bf16.mxu0 %v9177_v34  ;;  %8661 = vmatprep.subr.bf16.mxu1 %v9172_v35 }
 0x170   : > { %v8428_v15 = vpop.f32.mrf.mxu0  ;;  %8662 = vmatpush3.bf16.msra.mxu1 %v9172_v35 }
 0x171   : > { %v10070_v59 = vadd.f32 %v8428_v15, %v9924_v36  ;;  %v10072_v21 = vpop.f32.mrf.mxu1  ;;  %8663 = vmatprep.subr.bf16.mxu1 %v9175_v17 }
 0x172   : > { %v10074_v55 = vpop.f32.mrf.mxu0  ;;  %8712 = vmatpush3.bf16.msra.mxu0 %v9177_v34 }
 0x173   : > { %v10079_v42 = vpop.f32.mrf.mxu1 }
 0x174   : > { %v8431_v23 = vpop.f32.mrf.mxu0  ;;  %8664 = vmatpush3.bf16.msra.mxu1 %v9175_v17 }
 0x175   : > { %v10082_v27 = vadd.f32 %v8431_v23, %v9930_v41  ;;  %v10084_v57 = vpop.f32.mrf.mxu1 }
 0x176   : > { %v2015_v36 = vpop.f32.mrf.mxu0 }
 0x177   : > { %v10090_v63 = vadd.f32 %v2015_v36, %v9933_v8  ;;  %v10092_v47 = vpop.f32.mrf.mxu1 }
 0x178   : > { %v8432_v7 = vpop.f32.mrf.mxu0 }
 0x179   : > { %v10095_v15 = vadd.f32 %v8432_v7, %v9938_v9  ;;  %v10097_v41 = vpop.f32.mrf.mxu1 }
 0x17a   : > { %v10102_v23 = vpop.f32.mrf.mxu0 }
 0x17b   : > { %v10104_v51 = vpop.f32.mrf.mxu1 }
 0x17c   : > { %v8435_v8 = vpop.f32.mrf.mxu0 }
 0x17d   : > { %v10108_v36 = vadd.f32 %v8435_v8, %v9944_v53  ;;  %v10110_v9 = vpop.f32.mrf.mxu1  ;;  %v3868_v8 = vpack.c.bf16 %v3837_v28, %v3836_v4  ;;  %v10147_v4 = vld [vmem:[%s11539_s1 + $0x2f8] sm:$0xff]  }
 0x17e   : > { %v2031_v7 = vpop.f32.mrf.mxu0  ;;  %11561 = vst [vmem:[#allocation21_spill] sm:$0xff] %v10147_v4  ;;  %8745 = vmatprep.subr.bf16.mxu1 %v10147_v4 }
 0x17f   : > { %v10116_v6 = vadd.f32 %v2031_v7, %v9947_v40  ;;  %v10118_v34 = vpop.f32.mrf.mxu1  ;;  %8665 = vmatprep.mubr.bf16.mxu1 %v3868_v8 }
 0x180   : > { %v8436_v2 = vpop.f32.mrf.mxu0 }
 0x181   : > { %v10121_v35 = vadd.f32 %v8436_v2, %v9952_v43  ;;  %v10123_v53 = vpop.f32.mrf.mxu1 }
 0x182   : > { %v10125_v5 = vpop.f32.mrf.mxu0 }
 0x183   : > { %v10127_v60 = vpop.f32.mrf.mxu1 }
 0x184   : > { %11554 = vst [vmem:[#allocation14_spill] sm:$0xff] %v10127_v60  ;;  %v8439_v40 = vpop.f32.mrf.mxu0 }
 0x185   : > { %v10130_v7 = vadd.f32 %v8439_v40, %v9961_v20  ;;  %v10132_v45 = vpop.f32.mrf.mxu1 }
 0x186   : > { %11556 = vst [vmem:[#allocation16_spill] sm:$0xff] %v10132_v45  ;;  %v2047_v39 = vpop.f32.mrf.mxu0 }
 0x187   : > { %11555 = vst [vmem:[#allocation15_spill] sm:$0xff] %v10130_v7  ;;  %v10135_v16 = vadd.f32 %v2047_v39, %v9964_v48  ;;  %v10137_v43 = vpop.f32.mrf.mxu1 }
 0x188   : > { %11558 = vst [vmem:[#allocation18_spill] sm:$0xff] %v10137_v43  ;;  %v8440_v2 = vpop.f32.mrf.mxu0 }
 0x189   : > { %11557 = vst [vmem:[#allocation17_spill] sm:$0xff] %v10135_v16  ;;  %v10140_v28 = vadd.f32 %v8440_v2, %v9969_v50  ;;  %v10142_v17 = vpop.f32.mrf.mxu1 }
 0x18a   : > { %11560 = vst [vmem:[#allocation20_spill] sm:$0xff] %v10142_v17  ;;  %v10149_v20 = vpop.f32.mrf.mxu0 }
 0x18b   : > { %11559 = vst [vmem:[#allocation19_spill] sm:$0xff] %v10140_v28  ;;  %11562 = vst [vmem:[#allocation22_spill] sm:$0xff] %v10149_v20  ;;  %v10151_v8 = vpop.f32.mrf.mxu1 }
 0x18c   : > { %11563 = vst [vmem:[#allocation23_spill] sm:$0xff] %v10151_v8  ;;  %v8443_v48 = vpop.f32.mrf.mxu0 }
 0x18d   : > { %v10155_v39 = vadd.f32 %v8443_v48, %v9978_v12  ;;  %v10157_v40 = vpop.f32.mrf.mxu1 }
 0x18e   : > { %11565 = vst [vmem:[#allocation25_spill] sm:$0xff] %v10157_v40  ;;  %v2063_v50 = vpop.f32.mrf.mxu0 }
 0x18f   : > { %11564 = vst [vmem:[#allocation24_spill] sm:$0xff] %v10155_v39  ;;  %v10160_v2 = vadd.f32 %v2063_v50, %v9981_v62  ;;  %v10162_v17 = vpop.f32.mrf.mxu1 }
 0x190   : > { %11567 = vst [vmem:[#allocation27_spill] sm:$0xff] %v10162_v17  ;;  %v8444_v28 = vpop.f32.mrf.mxu0 }
 0x191   : > { %11566 = vst [vmem:[#allocation26_spill] sm:$0xff] %v10160_v2  ;;  %v10165_v43 = vadd.f32 %v8444_v28, %v9985_v31  ;;  %v10167_v20 = vpop.f32.mrf.mxu1 }
 0x192   : > { %11569 = vst [vmem:[#allocation29_spill] sm:$0xff] %v10167_v20  ;;  %v10169_v8 = vpop.f32.mrf.mxu0 }
 0x193   : > { %11568 = vst [vmem:[#allocation28_spill] sm:$0xff] %v10165_v43  ;;  %11570 = vst [vmem:[#allocation30_spill] sm:$0xff] %v10169_v8  ;;  %v10171_v4 = vpop.f32.mrf.mxu1 }
 0x194   : > { %11571 = vst [vmem:[#allocation31_spill] sm:$0xff] %v10171_v4  ;;  %v8447_v12 = vpop.f32.mrf.mxu0 }
 0x195   : > { %v10174_v48 = vadd.f32 %v8447_v12, %v9994_v24  ;;  %v10176_v40 = vpop.f32.mrf.mxu1  ;;  %v10195_v24 = vld [vmem:[%s11539_s1 + $0x338] sm:$0xff]  }
 0x196   : > { %11573 = vst [vmem:[#allocation33_spill] sm:$0xff] %v10176_v40  ;;  %v2079_v62 = vpop.f32.mrf.mxu0  ;;  %11580 = vst [vmem:[#allocation40_spill] sm:$0xff] %v10195_v24  ;;  %8793 = vmatprep.subr.bf16.mxu0 %v10195_v24 }
 0x197   : > { %11572 = vst [vmem:[#allocation32_spill] sm:$0xff] %v10174_v48  ;;  %v10179_v50 = vadd.f32 %v2079_v62, %v9997_v61  ;;  %v10181_v17 = vpop.f32.mrf.mxu1 }
 0x198   : > { %11575 = vst [vmem:[#allocation35_spill] sm:$0xff] %v10181_v17  ;;  %v8448_v31 = vpop.f32.mrf.mxu0 }
 0x199   : > { %11574 = vst [vmem:[#allocation34_spill] sm:$0xff] %v10179_v50  ;;  %v10184_v28 = vadd.f32 %v8448_v31, %v10004_v18  ;;  %v10186_v20 = vpop.f32.mrf.mxu1 }
 0x19a   : > { %11577 = vst [vmem:[#allocation37_spill] sm:$0xff] %v10186_v20  ;;  %v10188_v43 = vpop.f32.mrf.mxu0 }
 0x19b   : > { %11576 = vst [vmem:[#allocation36_spill] sm:$0xff] %v10184_v28  ;;  %11578 = vst [vmem:[#allocation38_spill] sm:$0xff] %v10188_v43  ;;  %v10190_v4 = vpop.f32.mrf.mxu1 }
 0x19c   : > { %11579 = vst [vmem:[#allocation39_spill] sm:$0xff] %v10190_v4  ;;  %v8451_v12 = vpop.f32.mrf.mxu0 }
 0x19d   : > { %v10198_v61 = vadd.f32 %v8451_v12, %v10017_v10  ;;  %v10200_v62 = vpop.f32.mrf.mxu1 }
 0x19e   : > { %11582 = vst [vmem:[#allocation42_spill] sm:$0xff] %v10200_v62  ;;  %v2095_v18 = vpop.f32.mrf.mxu0 }
 0x19f   : > { %11581 = vst [vmem:[#allocation41_spill] sm:$0xff] %v10198_v61  ;;  %v10204_v31 = vadd.f32 %v2095_v18, %v10020_v52  ;;  %v10206_v20 = vpop.f32.mrf.mxu1 }
 0x1a0   : > { %11584 = vst [vmem:[#allocation44_spill] sm:$0xff] %v10206_v20  ;;  %v8452_v4 = vpop.f32.mrf.mxu0 }
 0x1a1   : > { %11583 = vst [vmem:[#allocation43_spill] sm:$0xff] %v10204_v31  ;;  %v10209_v28 = vadd.f32 %v8452_v4, %v10027_v32  ;;  %v10211_v43 = vpop.f32.mrf.mxu1 }
 0x1a2   : > { %11586 = vst [vmem:[#allocation46_spill] sm:$0xff] %v10211_v43  ;;  %v10213_v17 = vpop.f32.mrf.mxu0 }
 0x1a3   : > { %11585 = vst [vmem:[#allocation45_spill] sm:$0xff] %v10209_v28  ;;  %11587 = vst [vmem:[#allocation47_spill] sm:$0xff] %v10213_v17  ;;  %v10215_v10 = vpop.f32.mrf.mxu1 }
 0x1a4   : > { %11588 = vst [vmem:[#allocation48_spill] sm:$0xff] %v10215_v10  ;;  %v8455_v12 = vpop.f32.mrf.mxu0 }
 0x1a5   : > { %v10218_v62 = vadd.f32 %v8455_v12, %v10039_v13  ;;  %v10220_v61 = vpop.f32.mrf.mxu1 }
 0x1a6   : > { %11590 = vst [vmem:[#allocation50_spill] sm:$0xff] %v10220_v61  ;;  %v2111_v52 = vpop.f32.mrf.mxu0 }
 0x1a7   : > { %11589 = vst [vmem:[#allocation49_spill] sm:$0xff] %v10218_v62  ;;  %v10223_v18 = vadd.f32 %v2111_v52, %v10042_v49  ;;  %v10225_v20 = vpop.f32.mrf.mxu1 }
 0x1a8   : > { %11592 = vst [vmem:[#allocation52_spill] sm:$0xff] %v10225_v20  ;;  %v8456_v32 = vpop.f32.mrf.mxu0 }
 0x1a9   : > { %11591 = vst [vmem:[#allocation51_spill] sm:$0xff] %v10223_v18  ;;  %v10228_v4 = vadd.f32 %v8456_v32, %v10049_v58  ;;  %v10230_v43 = vpop.f32.mrf.mxu1 }
 0x1aa   : > { %11594 = vst [vmem:[#allocation54_spill] sm:$0xff] %v10230_v43  ;;  %v10232_v28 = vpop.f32.mrf.mxu0 }
 0x1ab   : > { %11593 = vst [vmem:[#allocation53_spill] sm:$0xff] %v10228_v4  ;;  %11595 = vst [vmem:[#allocation55_spill] sm:$0xff] %v10232_v28  ;;  %v10234_v10 = vpop.f32.mrf.mxu1 }
 0x1ac   : > { %11596 = vst [vmem:[#allocation56_spill] sm:$0xff] %v10234_v10  ;;  %v8523_v13 = vpop.f32.mrf.mxu0 }
 0x1ad   : > { %v8571_v12 = vpop.f32.mrf.mxu1 }
 0x1ae   : > { %v2740_v62 = vpop.f32.mrf.mxu0 }
 0x1af   : > { %v3110_v61 = vpop.f32.mrf.mxu1 }
 0x1b0   : > { %v8524_v17 = vpop.f32.mrf.mxu0 }
 0x1b1   : > { %v10236_v31 = vpop.f32.mrf.mxu1 }
 0x1b2   : > { %v2743_v49 = vpop.f32.mrf.mxu0 }
 0x1b3   : > { %v10240_v20 = vpop.f32.mrf.mxu1 }
 0x1b4   : > { %v10238_v52 = vpop.f32.mrf.mxu0 }
 0x1b5   : > { %v10246_v43 = vpop.f32.mrf.mxu1 }
 0x1b6   : > { %v10242_v58 = vpop.f32.mrf.mxu0 }
 0x1b7   : > { %v10252_v28 = vpop.f32.mrf.mxu1 }
 0x1b8   : > { %v10244_v32 = vpop.f32.mrf.mxu0 }
 0x1b9   : > { %v10258_v40 = vpop.f32.mrf.mxu1 }
 0x1ba   : > { %v10248_v4 = vpop.f32.mrf.mxu0 }
 0x1bb   : > { %v10264_v2 = vpop.f32.mrf.mxu1 }
 0x1bc   : > { %v10250_v10 = vpop.f32.mrf.mxu0  ;;  %11601 = vst [vmem:[#allocation61_spill] sm:$0xff] %v10264_v2 }
 0x1bd   : > { %v10270_v24 = vpop.f32.mrf.mxu1 }
 0x1be   : > { %v10254_v18 = vpop.f32.mrf.mxu0  ;;  %11604 = vst [vmem:[#allocation64_spill] sm:$0xff] %v10270_v24 }
 0x1bf   : > { %11597 = vst [vmem:[#allocation57_spill] sm:$0xff] %v10254_v18  ;;  %v10276_v60 = vpop.f32.mrf.mxu1 }
 0x1c0   : > { %v10256_v50 = vpop.f32.mrf.mxu0  ;;  %11607 = vst [vmem:[#allocation67_spill] sm:$0xff] %v10276_v60 }
 0x1c1   : > { %11598 = vst [vmem:[#allocation58_spill] sm:$0xff] %v10256_v50 }
 0x1c2   : > { %v10260_v48 = vpop.f32.mrf.mxu0 }
 0x1c3   : > { %11599 = vst [vmem:[#allocation59_spill] sm:$0xff] %v10260_v48  ;;  %v10282_v48 = vpop.f32.mrf.mxu1 }
 0x1c4   : > { %v10262_v8 = vpop.f32.mrf.mxu0  ;;  %11610 = vst [vmem:[#allocation70_spill] sm:$0xff] %v10282_v48 }
 0x1c5   : > { %11600 = vst [vmem:[#allocation60_spill] sm:$0xff] %v10262_v8 }
 0x1c6   : > { %v10266_v39 = vpop.f32.mrf.mxu0 }
 0x1c7   : > { %11602 = vst [vmem:[#allocation62_spill] sm:$0xff] %v10266_v39  ;;  %v10288_v39 = vpop.f32.mrf.mxu1 }
 0x1c8   : > { %v10268_v16 = vpop.f32.mrf.mxu0 }
 0x1c9   : > { %11603 = vst [vmem:[#allocation63_spill] sm:$0xff] %v10268_v16 }
 0x1ca   : > { %v10272_v45 = vpop.f32.mrf.mxu0 }
 0x1cb   : > { %11605 = vst [vmem:[#allocation65_spill] sm:$0xff] %v10272_v45  ;;  %v10294_v45 = vpop.f32.mrf.mxu1 }
 0x1cc   : > { %v10274_v7 = vpop.f32.mrf.mxu0  ;;  %11615 = vst [vmem:[#allocation75_spill] sm:$0xff] %v10294_v45 }
 0x1cd   : > { %11606 = vst [vmem:[#allocation66_spill] sm:$0xff] %v10274_v7 }
 0x1ce   : > { %v10278_v50 = vpop.f32.mrf.mxu0 }
 0x1cf   : > { %11608 = vst [vmem:[#allocation68_spill] sm:$0xff] %v10278_v50  ;;  %v10300_v50 = vpop.f32.mrf.mxu1 }
 0x1d0   : > { %v10280_v18 = vpop.f32.mrf.mxu0  ;;  %11618 = vst [vmem:[#allocation78_spill] sm:$0xff] %v10300_v50 }
 0x1d1   : > { %11609 = vst [vmem:[#allocation69_spill] sm:$0xff] %v10280_v18 }
 0x1d2   : > { %v10284_v8 = vpop.f32.mrf.mxu0 }
 0x1d3   : > { %11611 = vst [vmem:[#allocation71_spill] sm:$0xff] %v10284_v8  ;;  %v10306_v8 = vpop.f32.mrf.mxu1 }
 0x1d4   : > { %v10286_v2 = vpop.f32.mrf.mxu0  ;;  %11621 = vst [vmem:[#allocation81_spill] sm:$0xff] %v10306_v8 }
 0x1d5   : > { %11612 = vst [vmem:[#allocation72_spill] sm:$0xff] %v10286_v2  ;;  %v10316_v45 = vpop.f32.mrf.mxu1 }
 0x1d6   : > { %v10290_v16 = vpop.f32.mrf.mxu0 }
 0x1d7   : > { %11613 = vst [vmem:[#allocation73_spill] sm:$0xff] %v10290_v16  ;;  %v1757_v16 = vadd.f32 %v9926_v37, %v9922_v30  ;;  %v2499_v30 = vadd.f32 %v10072_v21, %v10070_v59  ;;  %v2502_v59 = vadd.f32 %v10084_v57, %v10082_v27  ;;  %v1033_v27 = vadd.f32 %v9877_v33, %v9875_v44 }
 0x1d8   : > { %v10292_v24 = vpop.f32.mrf.mxu0  ;;  %v2503_v57 = vadd.f32 %v10097_v41, %v10095_v15  ;;  %v10362_v44 = vadd.f32 %v9901_v22, %v9899_v14 }
 0x1d9   : > { %11614 = vst [vmem:[#allocation74_spill] sm:$0xff] %v10292_v24 }
 0x1da   : > { %v10296_v7 = vpop.f32.mrf.mxu0  ;;  %v2874_v15 = vadd.f32 %v10244_v32, %v2503_v57  ;;  %v11632_v57 = vld [vmem:[#allocation64_spill] sm:$0xff] }
 0x1db   : > { %11616 = vst [vmem:[#allocation76_spill] sm:$0xff] %v10296_v7  ;;  %v2498_v7 = vadd.f32 %v10059_v38, %v10057_v25 }
 0x1dc   : > { %v10298_v60 = vpop.f32.mrf.mxu0 }
 0x1dd   : > { %11617 = vst [vmem:[#allocation77_spill] sm:$0xff] %v10298_v60  ;;  %v2127_v60 = vadd.f32 %v10074_v55, %v1757_v16  ;;  %v2870_v16 = vadd.f32 %v8524_v17, %v2499_v30  ;;  %v1761_v55 = vadd.f32 %v9940_v11, %v9936_v0 }
 0x1de   : > { %v10302_v18 = vpop.f32.mrf.mxu0 }
 0x1df   : > { %11619 = vst [vmem:[#allocation79_spill] sm:$0xff] %v10302_v18  ;;  %v2869_v18 = vadd.f32 %v8523_v13, %v2498_v7  ;;  %v2497_v25 = vadd.f32 %v10079_v42, %v2127_v60  ;;  %v2500_v42 = vadd.f32 %v10092_v47, %v10090_v63  ;;  %v2131_v17 = vadd.f32 %v10102_v23, %v1761_v55 }
 0x1e0   : > { %v10304_v48 = vpop.f32.mrf.mxu0  ;;  %v3240_v11 = vadd.f32 %v10236_v31, %v2870_v16  ;;  %v11625_v16 = vld [vmem:[#allocation6_spill] sm:$0xff] }
 0x1e1   : > { %11620 = vst [vmem:[#allocation80_spill] sm:$0xff] %v10304_v48  ;;  %v2496_v48 = vadd.f32 %v10067_v19, %v10065_v56  ;;  %v10337_v19 = vld [vmem:[%s11540_s2] ss:$0 sm:$0xff]  ;;  %v2871_v63 = vadd.f32 %v10242_v58, %v2500_v42  ;;  %v2501_v33 = vadd.f32 %v10104_v51, %v2131_v17  ;;  %v10370_v58 = vadd.f32 %v9912_v1, %v9910_v26 }
 0x1e2   : > { %v10308_v2 = vpop.f32.mrf.mxu0  ;;  %v2504_v26 = vadd.f32 %v10118_v34, %v10116_v6  ;;  %v1403_v55 = vadd.f32 %v11625_v16, %v1033_v27  ;;  %v11627_v34 = vld [vmem:[#allocation57_spill] sm:$0xff] }
 0x1e3   : > { %11622 = vst [vmem:[#allocation82_spill] sm:$0xff] %v10308_v2  ;;  %v2867_v37 = vadd.f32 %v2740_v62, %v2496_v48  ;;  %v3239_v2 = vadd.f32 %v8571_v12, %v2869_v18  ;;  %v2873_v48 = vadd.f32 %v10238_v52, %v2502_v59  ;;  %v1037_v12 = vadd.f32 %v9887_v46, %v9885_v29  ;;  %v11626_v59 = vld [vmem:[#allocation61_spill] sm:$0xff] }
 0x1e4   : > { %v10312_v24 = vpop.f32.mrf.mxu0  ;;  %v1765_v29 = vadd.f32 %v9954_v54, %v9950_v3  ;;  %v2506_v46 = vadd.f32 %v10110_v9, %v10108_v36  ;;  %v2872_v14 = vadd.f32 %v10248_v4, %v2501_v33  ;;  %v3241_v51 = vadd.f32 %v10252_v28, %v2871_v63  ;;  %v11633_v63 = vld [vmem:[#allocation58_spill] sm:$0xff] }
 0x1e5   : > { %11623 = vst [vmem:[#allocation83_spill] sm:$0xff] %v10312_v24  ;;  %v10327_v24 = vpop.f32.mrf.mxu1  ;;  %v3237_v21 = vadd.f32 %v3110_v61, %v2867_v37  ;;  %v3244_v3 = vadd.f32 %v10258_v40, %v2874_v15  ;;  %v11634_v15 = vld [vmem:[#allocation7_spill] sm:$0xff] }
 0x1e6   : > { %v10319_v50 = vpop.f32.mrf.mxu0  ;;  %v2135_v1 = vadd.f32 %v10125_v5, %v1765_v29  ;;  %v2877_v54 = vadd.f32 %v10250_v10, %v2506_v46  ;;  %v3242_v6 = vadd.f32 %v11626_v59, %v2872_v14  ;;  %v2875_v5 = vadd.f32 %v11627_v34, %v2504_v26  ;;  %v11638_v46 = vld [vmem:[#allocation40_spill] sm:$0xff]  ;;  %v11639_v14 = vld [vmem:[#allocation67_spill] sm:$0xff]  ;;  %v9186_v26 = vld [vmem:[%s11539_s1 + $0x328] sm:$0xff]  }
 0x1e7   : > { %11624 = vst [vmem:[#allocation84_spill] sm:$0xff] %v10319_v50  ;;  %v2868_v50 = vadd.f32 %v2743_v49, %v2497_v25  ;;  %v10341_v7 = vpop.f32.mrf.mxu1 }
 0x1e8   : > { %v10323_v8 = vpop.f32.mrf.mxu0 }
 0x1e9   : > { %v10355_v47 = vpop.f32.mrf.mxu1 }
 0x1ea   : > { %v10330_v38 = vpop.f32.mrf.mxu0 }
 0x1ec   : > { %v8619_v56 = vpop.f32.mrf.mxu0 }
 0x1ed   : > { %v3609_v60 = vadd.f32 %v8619_v56, %v3239_v2  ;;  %v3238_v2 = vadd.f32 %v10240_v20, %v2868_v50  ;;  %v3243_v20 = vadd.f32 %v10246_v43, %v2873_v48  ;;  %v10378_v43 = vpop.f32.mrf.mxu1  ;;  %v2507_v56 = vadd.f32 %v10123_v53, %v10121_v35  ;;  %v11629_v48 = vld [vmem:[#allocation5_spill] sm:$0xff]  ;;  %v11630_v53 = vld [vmem:[#allocation8_spill] sm:$0xff] }
 0x1ee   : > { %v3480_v0 = vpop.f32.mrf.mxu0 }
 0x1ef   : > { %v3710_v62 = vadd.f32 %v10337_v19, %v3609_v60  ;;  %v3607_v18 = vadd.f32 %v3480_v0, %v3237_v21  ;;  %v10392_v40 = vpop.f32.mrf.mxu1  ;;  %v9184_v0 = vld [vmem:[%s11539_s1 + $0x330] sm:$0xff]  }
 0x1f0   : > { %v8620_v61 = vpop.f32.mrf.mxu0 }
 0x1f1   : > { %v3742_v23 = vmax.f32 %v3710_v62, 0.0  ;;  %v3708_v31 = vadd.f32 %v10337_v19, %v3607_v18  ;;  %v3610_v13 = vadd.f32 %v8620_v61, %v3240_v11  ;;  %v11628_v11 = vld [vmem:[#allocation4_spill] sm:$0xff]  ;;  %v1407_v62 = vadd.f32 %v11630_v53, %v1037_v12  ;;  %v11631_v18 = vld [vmem:[#allocation14_spill] sm:$0xff]  ;;  %v11637_v12 = vld [vmem:[#allocation59_spill] sm:$0xff] }
 0x1f2   : > { %v3483_v41 = vpop.f32.mrf.mxu0  ;;  %v1769_v35 = vadd.f32 %v11629_v48, %v11628_v11  ;;  %v2505_v27 = vadd.f32 %v11631_v18, %v2135_v1  ;;  %v11640_v1 = vld [vmem:[#allocation9_spill] sm:$0xff]  ;;  %v11648_v48 = vld [vmem:[#allocation62_spill] sm:$0xff] }
 0x1f3   : > { %3774 = vst [vmem:[#allocation2 + $0x48] sm:$0xff] %v3742_v23  ;;  %v3740_v50 = vmax.f32 %v3708_v31, 0.0  ;;  %v3711_v49 = vadd.f32 %v10337_v19, %v3610_v13  ;;  %v3608_v52 = vadd.f32 %v3483_v41, %v3238_v2  ;;  %v3247_v2 = vadd.f32 %v11632_v57, %v2877_v54  ;;  %v11641_v54 = vld [vmem:[#allocation17_spill] sm:$0xff] }
 0x1f4   : > { %v8623_v22 = vpop.f32.mrf.mxu0  ;;  %v10406_v41 = vadd.f32 %v11634_v15, %v1403_v55 }
 0x1f5   : > { %3772 = vst [vmem:[#allocation2 + $0x28] sm:$0xff] %v3740_v50  ;;  %v3743_v32 = vmax.f32 %v3711_v49, 0.0  ;;  %v3709_v30 = vadd.f32 %v10337_v19, %v3608_v52  ;;  %v3613_v37 = vadd.f32 %v8623_v22, %v3243_v20  ;;  %v11635_v20 = vld [vmem:[#allocation15_spill] sm:$0xff]  ;;  %v2876_v52 = vadd.f32 %v11637_v12, %v2505_v27 }
 0x1f6   : > { %v3496_v36 = vpop.f32.mrf.mxu0  ;;  %v3245_v22 = vadd.f32 %v11639_v14, %v2875_v5  ;;  %v11651_v12 = vld [vmem:[#allocation63_spill] sm:$0xff] }
 0x1f7   : > { %3775 = vst [vmem:[#allocation2 + $0x50] sm:$0xff] %v3743_v32  ;;  %v3741_v9 = vmax.f32 %v3709_v30, 0.0  ;;  %v3714_v28 = vadd.f32 %v10337_v19, %v3613_v37  ;;  %v3611_v4 = vadd.f32 %v3496_v36, %v3241_v51  ;;  %v4240_v25 = vpack.c.bf16 %v3743_v32, %v3742_v23  ;;  %v10413_v51 = vpop.f32.mrf.mxu1  ;;  %v11642_v36 = vld [vmem:[#allocation18_spill] sm:$0xff] }
 0x1f8   : > { %v8624_v21 = vpop.f32.mrf.mxu0  ;;  %v2878_v23 = vadd.f32 %v11633_v63, %v2507_v56  ;;  %v11645_v56 = vld [vmem:[#allocation70_spill] sm:$0xff]  ;;  %v3246_v11 = vadd.f32 %v10288_v39, %v2876_v52 }
 0x1f9   : > { %3773 = vst [vmem:[#allocation2 + $0x30] sm:$0xff] %v3741_v9  ;;  %v3746_v10 = vmax.f32 %v3714_v28, 0.0  ;;  %v3712_v60 = vadd.f32 %v10337_v19, %v3611_v4  ;;  %v3614_v42 = vadd.f32 %v8624_v21, %v3244_v3  ;;  %v4239_v17 = vpack.c.bf16 %v3741_v9, %v3740_v50  ;;  %v11636_v50 = vld [vmem:[#allocation16_spill] sm:$0xff]  ;;  %v11643_v28 = vld [vmem:[#allocation22_spill] sm:$0xff]  ;;  %v10434_v57 = vpop.f32.mrf.mxu1 }
 0x1fa   : > { %v3499_v61 = vpop.f32.mrf.mxu0  ;;  %v2510_v49 = vadd.f32 %v11636_v50, %v11635_v20  ;;  %v10420_v3 = vadd.f32 %v11640_v1, %v1407_v62  ;;  %v2508_v9 = vadd.f32 %v11642_v36, %v11641_v54  ;;  %v2139_v4 = vadd.f32 %v11643_v28, %v1769_v35  ;;  %v9179_v39 = vld [vmem:[%s11539_s1 + $0x2f0] sm:$0xff]   ;;  %v11654_v1 = vld [vmem:[#allocation25_spill] sm:$0xff] }
 0x1fb   : > { %3778 = vst [vmem:[#allocation2 + $0x88] sm:$0xff] %v3746_v10  ;;  %v3744_v31 = vmax.f32 %v3712_v60, 0.0  ;;  %v3715_v13 = vadd.f32 %v10337_v19, %v3614_v42  ;;  %v3612_v33 = vadd.f32 %v3499_v61, %v3242_v6  ;;  %8714 = vmatmul.mubr.bf16.vlgmr.msra.gmra.mxu0 %v4239_v17  ;;  %v3248_v59 = vadd.f32 %v11645_v56, %v2878_v23  ;;  %v11646_v60 = vld [vmem:[#allocation19_spill] sm:$0xff]  ;;  %v11647_v42 = vld [vmem:[#allocation20_spill] sm:$0xff]  ;;  %v11655_v54 = vld [vmem:[#allocation65_spill] sm:$0xff] }
 0x1fc   : > { %v8627_v29 = vpop.f32.mrf.mxu0  ;;  %8717 = vmatprep.mubr.bf16.mxu0 %v4240_v25  ;;  %8794 = vmatpush3.bf16.msra.mxu0 %v11638_v46  ;;  %v11644_v25 = vld [vmem:[#allocation60_spill] sm:$0xff]  ;;  %v2511_v17 = vadd.f32 %v11647_v42, %v11646_v60  ;;  %v2879_v53 = vadd.f32 %v11648_v48, %v2508_v9  ;;  %v11656_v28 = vld [vmem:[#allocation21_spill] sm:$0xff]  ;;  %v11661_v42 = vld [vmem:[#allocation66_spill] sm:$0xff] }
 0x1fd   : > { %3776 = vst [vmem:[#allocation2 + $0x68] sm:$0xff] %v3744_v31  ;;  %v3747_v32 = vmax.f32 %v3715_v13, 0.0  ;;  %v3713_v30 = vadd.f32 %v10337_v19, %v3612_v33  ;;  %v3617_v37 = vadd.f32 %v8627_v29, %v3247_v2  ;;  %8795 = vmatprep.subr.bf16.mxu0 %v9184_v0  ;;  %v2881_v16 = vadd.f32 %v11644_v25, %v2510_v49  ;;  %v3838_v62 = vld [vmem:[#allocation2 + $0x27] sm:$0xff]  ;;  %v11649_v33 = vld [vmem:[#allocation23_spill] sm:$0xff] }
 0x1fe   : > { %v3512_v55 = vpop.f32.mrf.mxu0  ;;  %v3841_v21 = vld [vmem:[#allocation2 + $0x4f] sm:$0xff]  ;;  %v3840_v13 = vld [vmem:[#allocation2 + $0x47] sm:$0xff]  ;;  %v2882_v52 = vadd.f32 %v11651_v12, %v2511_v17 }
 0x1ff   : > { %3779 = vst [vmem:[#allocation2 + $0x90] sm:$0xff] %v3747_v32  ;;  %v3745_v6 = vmax.f32 %v3713_v30, 0.0  ;;  %v10428_v34 = vadd.f32 %v10337_v19, %v3617_v37  ;;  %v3615_v5 = vadd.f32 %v3512_v55, %v3245_v22  ;;  %v4242_v27 = vpack.c.bf16 %v3747_v32, %v3746_v10  ;;  %v9187_v22 = vld [vmem:[%s11539_s1 + $0x320] sm:$0xff]   ;;  %v11652_v32 = vld [vmem:[#allocation10_spill] sm:$0xff]  ;;  %v11662_v48 = vld [vmem:[#allocation81_spill] sm:$0xff] }
 0x200   : > { %v8628_v35 = vpop.f32.mrf.mxu0  ;;  %v3839_v18 = vld [vmem:[#allocation2 + $0x2f] sm:$0xff]  ;;  %8796 = vmatpush3.bf16.msra.mxu0 %v9184_v0  ;;  %v2509_v10 = vadd.f32 %v11649_v33, %v2139_v4  ;;  %v11650_v0 = vld [vmem:[#allocation75_spill] sm:$0xff]  ;;  %v10447_v50 = vpack.c.bf16 %v3841_v21, %v3840_v13  ;;  %v1411_v30 = vadd.f32 %v11652_v32, %v10362_v44  ;;  %v11653_v37 = vld [vmem:[#allocation24_spill] sm:$0xff] }
 0x201   : > { %3777 = vst [vmem:[#allocation2 + $0x70] sm:$0xff] %v3745_v6  ;;  %v3750_v2 = vmax.f32 %v10428_v34, 0.0  ;;  %v10438_v61 = vadd.f32 %v10337_v19, %v3615_v5  ;;  %v3618_v63 = vadd.f32 %v8628_v35, %v3248_v59  ;;  %v10440_v23 = vpack.c.bf16 %v3839_v18, %v3838_v62  ;;  %8797 = vmatprep.subr.bf16.mxu0 %v9186_v26  ;;  %v11657_v4 = vld [vmem:[#allocation78_spill] sm:$0xff]  ;;  %v9180_v44 = vld [vmem:[%s11539_s1 + $0x2e8] sm:$0xff]   ;;  %v11659_v34 = vld [vmem:[#allocation27_spill] sm:$0xff] }
 0x202   : > { %v3251_v15 = vadd.f32 %v11650_v0, %v2881_v16  ;;  %v3515_v20 = vpop.f32.mrf.mxu0  ;;  %v4241_v49 = vpack.c.bf16 %v3745_v6, %v3744_v31  ;;  %v2514_v31 = vadd.f32 %v11654_v1, %v11653_v37  ;;  %v2880_v36 = vadd.f32 %v11655_v54, %v2509_v10  ;;  %v10464_v16 = vpop.f32.mrf.mxu1  ;;  %v11658_v6 = vld [vmem:[#allocation26_spill] sm:$0xff]  ;;  %v11664_v13 = vld [vmem:[#allocation29_spill] sm:$0xff]  ;;  %v11666_v1 = vld [vmem:[#allocation31_spill] sm:$0xff] }
 0x203   : > { %3782 = vst [vmem:[#allocation2 + $0xc8] sm:$0xff] %v3750_v2  ;;  %v3748_v29 = vmax.f32 %v10438_v61, 0.0  ;;  %v3719_v46 = vadd.f32 %v10337_v19, %v3618_v63  ;;  %v3616_v14 = vadd.f32 %v3515_v20, %v3246_v11  ;;  %8666 = vmatmul.mubr.bf16.vlgmr.msra.gmra.mxu1 %v10440_v23  ;;  %v3249_v25 = vadd.f32 %v11657_v4, %v2879_v53  ;;  %v11660_v21 = vld [vmem:[#allocation30_spill] sm:$0xff]  ;;  %v9189_v63 = vld [vmem:[%s11539_s1 + $0x318] sm:$0xff]   ;;  %v3844_v37 = vld [vmem:[#allocation2 + $0x87] sm:$0xff] }
 0x204   : > { %v8631_v9 = vpop.f32.mrf.mxu0  ;;  %8669 = vmatprep.mubr.bf16.mxu1 %v10447_v50  ;;  %8746 = vmatpush3.bf16.msra.mxu1 %v11656_v28  ;;  %v2512_v5 = vadd.f32 %v11659_v34, %v11658_v6  ;;  %v2143_v60 = vadd.f32 %v11660_v21, %v10406_v41  ;;  %v2885_v17 = vadd.f32 %v11661_v42, %v2514_v31  ;;  %v11663_v41 = vld [vmem:[#allocation28_spill] sm:$0xff]  ;;  %v10486_v12 = vpop.f32.mrf.mxu1  ;;  %v11671_v34 = vld [vmem:[#allocation71_spill] sm:$0xff] }
 0x205   : > { %3780 = vst [vmem:[#allocation2 + $0xa8] sm:$0xff] %v3748_v29  ;;  %v3751_v55 = vmax.f32 %v3719_v46, 0.0  ;;  %v3717_v56 = vadd.f32 %v10337_v19, %v3616_v14  ;;  %v3621_v59 = vadd.f32 %v8631_v9, %v3251_v15  ;;  %8718 = vmatmul.mubr.bf16.gmra.mxu0 %v4241_v49  ;;  %8747 = vmatprep.subr.bf16.mxu1 %v9179_v39  ;;  %v3842_v15 = vld [vmem:[#allocation2 + $0x67] sm:$0xff] }
 0x206   : > { %v3528_v11 = vpop.f32.mrf.mxu0  ;;  %8721 = vmatprep.mubr.bf16.mxu0 %v4242_v27  ;;  %8798 = vmatpush3.bf16.msra.mxu0 %v9186_v26  ;;  %v3252_v53 = vadd.f32 %v11662_v48, %v2882_v52  ;;  %v3845_v61 = vld [vmem:[#allocation2 + $0x8f] sm:$0xff]  ;;  %v2515_v33 = vadd.f32 %v11664_v13, %v11663_v41  ;;  %v3250_v27 = vadd.f32 %v10316_v45, %v2880_v36  ;;  %v11665_v26 = vld [vmem:[#allocation68_spill] sm:$0xff]  ;;  %v10516_v42 = vpop.f32.mrf.mxu1 }
 0x207   : > { %3783 = vst [vmem:[#allocation2 + $0xd0] sm:$0xff] %v3751_v55  ;;  %v3749_v35 = vmax.f32 %v3717_v56, 0.0  ;;  %v10477_v62 = vadd.f32 %v10337_v19, %v3621_v59  ;;  %v3619_v18 = vadd.f32 %v3528_v11, %v3249_v25  ;;  %8799 = vmatprep.subr.bf16.mxu0 %v9187_v22  ;;  %v2883_v10 = vadd.f32 %v11665_v26, %v2512_v5  ;;  %v9181_v45 = vld [vmem:[%s11539_s1 + $0x2e0] sm:$0xff]   ;;  %v11667_v9 = vld [vmem:[#allocation69_spill] sm:$0xff]  ;;  %v11668_v56 = vld [vmem:[#allocation11_spill] sm:$0xff] }
 0x208   : > { %v8632_v0 = vpop.f32.mrf.mxu0  ;;  %v3843_v20 = vld [vmem:[#allocation2 + $0x6f] sm:$0xff]  ;;  %8748 = vmatpush3.bf16.msra.mxu1 %v9179_v39  ;;  %v4244_v49 = vpack.c.bf16 %v3751_v55, %v3750_v2  ;;  %v2513_v39 = vadd.f32 %v11666_v1, %v2143_v60  ;;  %v3255_v2 = vadd.f32 %v10327_v24, %v2885_v17  ;;  %v10499_v54 = vpack.c.bf16 %v3845_v61, %v3844_v37 }
 0x209   : > { %3781 = vst [vmem:[#allocation2 + $0xb0] sm:$0xff] %v3749_v35  ;;  %v3754_v52 = vmax.f32 %v10477_v62, 0.0  ;;  %v10490_v46 = vadd.f32 %v10337_v19, %v3619_v18  ;;  %v3622_v14 = vadd.f32 %v8632_v0, %v3252_v53  ;;  %v10492_v32 = vpack.c.bf16 %v3843_v20, %v3842_v15  ;;  %8749 = vmatprep.subr.bf16.mxu1 %v9180_v44  ;;  %v9190_v24 = vld [vmem:[%s11539_s1 + $0x310] sm:$0xff]   ;;  %v9192_v0 = vld [vmem:[%s11539_s1 + $0x308] sm:$0xff]  }
 0x20a   : > { %v3531_v31 = vpop.f32.mrf.mxu0  ;;  %v4243_v36 = vpack.c.bf16 %v3749_v35, %v3748_v29  ;;  %8800 = vmatpush3.bf16.msra.mxu0 %v9187_v22  ;;  %v2886_v28 = vadd.f32 %v11667_v9, %v2515_v33  ;;  %v10509_v59 = vadd.f32 %v11668_v56, %v1411_v30  ;;  %v11669_v29 = vld [vmem:[#allocation32_spill] sm:$0xff]  ;;  %v11670_v22 = vld [vmem:[#allocation33_spill] sm:$0xff]  ;;  %v2884_v5 = vadd.f32 %v11671_v34, %v2513_v39  ;;  %v9182_v30 = vld [vmem:[%s11539_s1 + $0x2d8] sm:$0xff]   ;;  %v10538_v39 = vpop.f32.mrf.mxu1 }
 0x20b   : > { %3786 = vst [vmem:[#allocation2 + $0x108] sm:$0xff] %v3754_v52  ;;  %v3752_v4 = vmax.f32 %v10490_v46, 0.0  ;;  %v3723_v25 = vadd.f32 %v10337_v19, %v3622_v14  ;;  %v3620_v55 = vadd.f32 %v3531_v31, %v3250_v27  ;;  %8670 = vmatmul.mubr.bf16.gmra.mxu1 %v10492_v32  ;;  %8801 = vmatprep.subr.bf16.mxu0 %v9189_v63  ;;  %v11672_v53 = vld [vmem:[#allocation34_spill] sm:$0xff]  ;;  %v11673_v35 = vld [vmem:[#allocation35_spill] sm:$0xff]  ;;  %v11677_v15 = vld [vmem:[#allocation37_spill] sm:$0xff] }
 0x20c   : > { %v2518_v6 = vadd.f32 %v11670_v22, %v11669_v29  ;;  %v8635_v21 = vpop.f32.mrf.mxu0  ;;  %8673 = vmatprep.mubr.bf16.mxu1 %v10499_v54  ;;  %8750 = vmatpush3.bf16.msra.mxu1 %v9180_v44  ;;  %v3253_v60 = vadd.f32 %v10341_v7, %v2883_v10  ;;  %v2516_v62 = vadd.f32 %v11673_v35, %v11672_v53  ;;  %v11674_v44 = vld [vmem:[#allocation38_spill] sm:$0xff]  ;;  %v11675_v7 = vld [vmem:[#allocation72_spill] sm:$0xff] }
 0x20d   : > { %3784 = vst [vmem:[#allocation2 + $0xe8] sm:$0xff] %v3752_v4  ;;  %v3755_v17 = vmax.f32 %v3723_v25, 0.0  ;;  %v3721_v11 = vadd.f32 %v10337_v19, %v3620_v55  ;;  %v3625_v48 = vadd.f32 %v8635_v21, %v3255_v2  ;;  %8722 = vmatmul.mubr.bf16.gmra.mxu0 %v4243_v36  ;;  %8751 = vmatprep.subr.bf16.mxu1 %v9181_v45  ;;  %v3846_v14 = vld [vmem:[#allocation2 + $0xa7] sm:$0xff]  ;;  %v11679_v25 = vld [vmem:[#allocation39_spill] sm:$0xff]  ;;  %v11680_v22 = vld [vmem:[#allocation74_spill] sm:$0xff] }
 0x20e   : > { %v2147_v18 = vadd.f32 %v11674_v44, %v10420_v3  ;;  %v2889_v61 = vadd.f32 %v11675_v7, %v2518_v6  ;;  %v3544_v41 = vpop.f32.mrf.mxu0  ;;  %8725 = vmatprep.mubr.bf16.mxu0 %v4244_v49  ;;  %8802 = vmatpush3.bf16.msra.mxu0 %v9189_v63  ;;  %v3256_v13 = vadd.f32 %v10355_v47, %v2886_v28  ;;  %v3849_v10 = vld [vmem:[#allocation2 + $0xcf] sm:$0xff]  ;;  %v11676_v3 = vld [vmem:[#allocation36_spill] sm:$0xff]  ;;  %v10567_v44 = vpop.f32.mrf.mxu1 }
 0x20f   : > { %3787 = vst [vmem:[#allocation2 + $0x110] sm:$0xff] %v3755_v17  ;;  %v3753_v33 = vmax.f32 %v3721_v11, 0.0  ;;  %v10529_v27 = vadd.f32 %v10337_v19, %v3625_v48  ;;  %v3623_v26 = vadd.f32 %v3544_v41, %v3253_v60  ;;  %8803 = vmatprep.subr.bf16.mxu0 %v9190_v24  ;;  %v2519_v20 = vadd.f32 %v11677_v15, %v11676_v3  ;;  %v11678_v63 = vld [vmem:[#allocation73_spill] sm:$0xff]  ;;  %v11681_v60 = vld [vmem:[#allocation12_spill] sm:$0xff]  ;;  %v11685_v41 = vld [vmem:[#allocation43_spill] sm:$0xff] }
 0x210   : > { %v3254_v49 = vadd.f32 %v10378_v43, %v2884_v5  ;;  %v2887_v46 = vadd.f32 %v11678_v63, %v2516_v62  ;;  %v8636_v47 = vpop.f32.mrf.mxu0  ;;  %v3847_v37 = vld [vmem:[#allocation2 + $0xaf] sm:$0xff]  ;;  %v4246_v1 = vpack.c.bf16 %v3755_v17, %v3754_v52  ;;  %8752 = vmatpush3.bf16.msra.mxu1 %v9181_v45  ;;  %v3848_v28 = vld [vmem:[#allocation2 + $0xc7] sm:$0xff]  ;;  %v2517_v52 = vadd.f32 %v11679_v25, %v2147_v18  ;;  %v10593_v25 = vpop.f32.mrf.mxu1 }
 0x211   : > { %3785 = vst [vmem:[#allocation2 + $0xf0] sm:$0xff] %v3753_v33  ;;  %v3758_v2 = vmax.f32 %v10529_v27, 0.0  ;;  %v10542_v31 = vadd.f32 %v10337_v19, %v3623_v26  ;;  %v3626_v36 = vadd.f32 %v8636_v47, %v3256_v13  ;;  %v10544_v9 = vpack.c.bf16 %v3847_v37, %v3846_v14  ;;  %8753 = vmatprep.subr.bf16.mxu1 %v9182_v30  ;;  %v9185_v43 = vld [vmem:[%s11539_s1 + $0x2d0] sm:$0xff]   ;;  %v11684_v48 = vld [vmem:[#allocation76_spill] sm:$0xff] }
 0x212   : > { %v3259_v45 = vadd.f32 %v10392_v40, %v2889_v61  ;;  %v3547_v55 = vpop.f32.mrf.mxu0  ;;  %v10551_v56 = vpack.c.bf16 %v3849_v10, %v3848_v28  ;;  %v4245_v29 = vpack.c.bf16 %v3753_v33, %v3752_v4  ;;  %8804 = vmatpush3.bf16.msra.mxu0 %v9190_v24  ;;  %v2890_v6 = vadd.f32 %v11680_v22, %v2519_v20  ;;  %v9193_v40 = vld [vmem:[%s11539_s1 + $0x300] sm:$0xff]   ;;  %v11682_v4 = vld [vmem:[#allocation41_spill] sm:$0xff]  ;;  %v11683_v24 = vld [vmem:[#allocation42_spill] sm:$0xff] }
 0x213   : > { %3790 = vst [vmem:[#allocation2 + $0x148] sm:$0xff] %v3758_v2  ;;  %v3756_v34 = vmax.f32 %v10542_v31, 0.0  ;;  %v3727_v5 = vadd.f32 %v10337_v19, %v3626_v36  ;;  %v3624_v21 = vadd.f32 %v3547_v55, %v3254_v49  ;;  %8674 = vmatmul.mubr.bf16.gmra.mxu1 %v10544_v9  ;;  %8805 = vmatprep.subr.bf16.mxu0 %v9192_v0  ;;  %v11686_v13 = vld [vmem:[#allocation44_spill] sm:$0xff]  ;;  %v11690_v47 = vld [vmem:[#allocation46_spill] sm:$0xff] }
 0x214   : > { %v1415_v17 = vadd.f32 %v11681_v60, %v10370_v58  ;;  %v2522_v11 = vadd.f32 %v11683_v24, %v11682_v4  ;;  %v2888_v53 = vadd.f32 %v11684_v48, %v2517_v52  ;;  %v8639_v35 = vpop.f32.mrf.mxu0  ;;  %8677 = vmatprep.mubr.bf16.mxu1 %v10551_v56  ;;  %8754 = vmatpush3.bf16.msra.mxu1 %v9182_v30  ;;  %v9188_v58 = vld [vmem:[%s11539_s1 + $0x2c8] sm:$0xff]   ;;  %v11687_v30 = vld [vmem:[#allocation47_spill] sm:$0xff]  ;;  %v9191_v22 = vld [vmem:[%s11539_s1 + $0x2c0] sm:$0xff]  }
 0x215   : > { %v3257_v62 = vadd.f32 %v10413_v51, %v2887_v46  ;;  %3788 = vst [vmem:[#allocation2 + $0x128] sm:$0xff] %v3756_v34  ;;  %v3759_v18 = vmax.f32 %v3727_v5, 0.0  ;;  %v3725_v7 = vadd.f32 %v10337_v19, %v3624_v21  ;;  %v3629_v61 = vadd.f32 %v8639_v35, %v3259_v45  ;;  %8726 = vmatmul.mubr.bf16.gmra.mxu0 %v4245_v29  ;;  %v11688_v51 = vld [vmem:[#allocation77_spill] sm:$0xff]  ;;  %v11693_v4 = vld [vmem:[#allocation80_spill] sm:$0xff] }
 0x216   : > { %8755 = vmatprep.subr.bf16.mxu1 %v9185_v43  ;;  %v2520_v33 = vadd.f32 %v11686_v13, %v11685_v41  ;;  %v2151_v27 = vadd.f32 %v11687_v30, %v10509_v59  ;;  %v2893_v26 = vadd.f32 %v11688_v51, %v2522_v11  ;;  %v3560_v10 = vpop.f32.mrf.mxu0  ;;  %8729 = vmatprep.mubr.bf16.mxu0 %v4246_v1  ;;  %v3853_v63 = vld [vmem:[#allocation2 + $0x10f] sm:$0xff]  ;;  %v10587_v59 = vld [vmem:[%s11539_s1 + $0x3b8] sm:$0xff]   ;;  %v3850_v31 = vld [vmem:[#allocation2 + $0xe7] sm:$0xff]  ;;  %v3222_v13 = vpop.f32.mrf.mxu1 }
 0x217   : > { %8806 = vmatpush3.bf16.msra.mxu0 %v9192_v0  ;;  %v3260_v3 = vadd.f32 %v10434_v57, %v2890_v6  ;;  %3791 = vst [vmem:[#allocation2 + $0x150] sm:$0xff] %v3759_v18  ;;  %v10579_v15 = vmax.f32 %v3725_v7, 0.0  ;;  %v10582_v20 = vadd.f32 %v10337_v19, %v3629_v61  ;;  %v3627_v49 = vadd.f32 %v3560_v10, %v3257_v62  ;;  %v11689_v46 = vld [vmem:[#allocation45_spill] sm:$0xff]  ;;  %v11691_v57 = vld [vmem:[#allocation79_spill] sm:$0xff]  ;;  %v11697_v61 = vld [vmem:[#allocation82_spill] sm:$0xff] }
 0x218   : > { %8807 = vmatprep.subr.bf16.mxu0 %v9193_v40  ;;  %v2523_v14 = vadd.f32 %v11690_v47, %v11689_v46  ;;  %v3258_v0 = vadd.f32 %v10464_v16, %v2888_v53  ;;  %v2891_v37 = vadd.f32 %v11691_v57, %v2520_v33  ;;  %v8640_v1 = vpop.f32.mrf.mxu0  ;;  %v3851_v36 = vld [vmem:[#allocation2 + $0xef] sm:$0xff]  ;;  %v4248_v28 = vpack.c.bf16 %v3759_v18, %v3758_v2  ;;  %v3852_v16 = vld [vmem:[#allocation2 + $0x107] sm:$0xff]  ;;  %v11698_v51 = vld [vmem:[#allocation51_spill] sm:$0xff] }
 0x219   : > { %8756 = vmatpush3.bf16.msra.mxu1 %v9185_v43  ;;  %3789 = vst [vmem:[#allocation2 + $0x130] sm:$0xff] %v10579_v15  ;;  %v3762_v52 = vmax.f32 %v10582_v20, 0.0  ;;  %v10598_v45 = vadd.f32 %v10337_v19, %v3627_v49  ;;  %v3630_v55 = vadd.f32 %v8640_v1, %v3260_v3  ;;  %v10600_v29 = vpack.c.bf16 %v3851_v36, %v3850_v31  ;;  %v11692_v2 = vld [vmem:[#allocation48_spill] sm:$0xff]  ;;  %v11694_v35 = vld [vmem:[#allocation13_spill] sm:$0xff]  ;;  %v11696_v18 = vld [vmem:[#allocation50_spill] sm:$0xff] }
 0x21a   : > { %8757 = vmatprep.subr.bf16.mxu1 %v9188_v58  ;;  %v2521_v43 = vadd.f32 %v11692_v2, %v2151_v27  ;;  %v3263_v6 = vadd.f32 %v10486_v12, %v2893_v26  ;;  %v3563_v5 = vpop.f32.mrf.mxu0  ;;  %v10607_v21 = vpack.c.bf16 %v3853_v63, %v3852_v16  ;;  %v4247_v60 = vpack.c.bf16 %v10579_v15, %v3756_v34  ;;  %v11695_v62 = vld [vmem:[#allocation49_spill] sm:$0xff]  ;;  %v11699_v26 = vld [vmem:[#allocation52_spill] sm:$0xff]  ;;  %v11700_v3 = vld [vmem:[#allocation55_spill] sm:$0xff] }
 0x21b   : > { %8808 = vmatpush3.bf16.msra.mxu0 %v9193_v40  ;;  %v2894_v24 = vadd.f32 %v11693_v4, %v2523_v14  ;;  %3794 = vst [vmem:[#allocation2 + $0x188] sm:$0xff] %v3762_v52  ;;  %v3760_v11 = vmax.f32 %v10598_v45, 0.0  ;;  %v3731_v48 = vadd.f32 %v10337_v19, %v3630_v55  ;;  %v3628_v53 = vadd.f32 %v3563_v5, %v3258_v0  ;;  %v11701_v20 = vld [vmem:[#allocation83_spill] sm:$0xff]  ;;  %v11702_v57 = vld [vmem:[#allocation53_spill] sm:$0xff]  ;;  %v11704_v36 = vld [vmem:[#allocation84_spill] sm:$0xff] }
 0x21c   : > { %8678 = vmatmul.mubr.bf16.gmra.mxu1 %v10600_v29  ;;  %8889 = vmatprep.subr.bf16.mxu0 %v10587_v59  ;;  %v1785_v12 = vadd.f32 %v11694_v35, %v1415_v17  ;;  %v2526_v7 = vadd.f32 %v11696_v18, %v11695_v62  ;;  %v2892_v34 = vadd.f32 %v11697_v61, %v2521_v43  ;;  %v8643_v40 = vpop.f32.mrf.mxu0  ;;  %v10625_v17 = vld [vmem:[%s11539_s1 + $0x378] sm:$0xff]   ;;  %v3854_v16 = vld [vmem:[#allocation2 + $0x127] sm:$0xff] }
 0x21d   : > { %8681 = vmatprep.mubr.bf16.mxu1 %v10607_v21  ;;  %8758 = vmatpush3.bf16.msra.mxu1 %v9188_v58  ;;  %v3261_v41 = vadd.f32 %v10516_v42, %v2891_v37  ;;  %3792 = vst [vmem:[#allocation2 + $0x168] sm:$0xff] %v3760_v11  ;;  %v3763_v33 = vmax.f32 %v3731_v48, 0.0  ;;  %v3729_v30 = vadd.f32 %v10337_v19, %v3628_v53  ;;  %v11703_v37 = vld [vmem:[#allocation54_spill] sm:$0xff]  ;;  %v3856_v4 = vld [vmem:[#allocation2 + $0x147] sm:$0xff] }
 0x21e   : > { %v3633_v27 = vadd.f32 %v8643_v40, %v3263_v6  ;;  %8730 = vmatmul.mubr.bf16.gmra.mxu0 %v4247_v60  ;;  %8759 = vmatprep.subr.bf16.mxu1 %v9191_v22  ;;  %v2524_v10 = vadd.f32 %v11699_v26, %v11698_v51  ;;  %v2155_v58 = vadd.f32 %v11700_v3, %v1785_v12  ;;  %v3576_v49 = vpop.f32.mrf.mxu0  ;;  %v3857_v0 = vld [vmem:[#allocation2 + $0x14f] sm:$0xff] }
 0x21f   : > { %v2897_v42 = vadd.f32 %v11701_v20, %v2526_v7  ;;  %8733 = vmatprep.mubr.bf16.mxu0 %v4248_v28  ;;  %v3264_v63 = vadd.f32 %v10538_v39, %v2894_v24  ;;  %3795 = vst [vmem:[#allocation2 + $0x190] sm:$0xff] %v3763_v33  ;;  %v3761_v46 = vmax.f32 %v3729_v30, 0.0  ;;  %v3631_v14 = vadd.f32 %v3576_v49, %v3261_v41  ;;  %v8600_v28 = vpop.f32.mrf.mxu1  ;;  %v11705_v24 = vld [vmem:[#allocation56_spill] sm:$0xff] }
 0x220   : > { %v3734_v47 = vadd.f32 %v10337_v19, %v3633_v27  ;;  %v2527_v1 = vadd.f32 %v11703_v37, %v11702_v57  ;;  %v3262_v31 = vadd.f32 %v10567_v44, %v2892_v34  ;;  %v2895_v45 = vadd.f32 %v11704_v36, %v2524_v10  ;;  %v8644_v55 = vpop.f32.mrf.mxu0  ;;  %v3855_v2 = vld [vmem:[#allocation2 + $0x12f] sm:$0xff] }
 0x221   : > { %v4250_v43 = vpack.c.bf16 %v3763_v33, %v3762_v52  ;;  %8760 = vmatpush3.bf16.msra.mxu1 %v9191_v22  ;;  %3793 = vst [vmem:[#allocation2 + $0x170] sm:$0xff] %v3761_v46  ;;  %v3732_v6 = vadd.f32 %v10337_v19, %v3631_v14  ;;  %v3634_v5 = vadd.f32 %v8644_v55, %v3264_v63  ;;  %v3225_v34 = vpop.f32.mrf.mxu1 }
 0x222   : > { %v3766_v39 = vmax.f32 %v3734_v47, 0.0  ;;  %v10638_v60 = vpack.c.bf16 %v3855_v2, %v3854_v16  ;;  %8841 = vmatprep.subr.bf16.mxu1 %v10625_v17  ;;  %v2525_v44 = vadd.f32 %v11705_v24, %v2155_v58  ;;  %v3267_v48 = vadd.f32 %v10593_v25, %v2897_v42  ;;  %v3579_v53 = vpop.f32.mrf.mxu0 }
 0x223   : > { %v10643_v35 = vpack.c.bf16 %v3857_v0, %v3856_v4  ;;  %v10645_v52 = vpack.c.bf16 %v3761_v46, %v3760_v11  ;;  %v2898_v22 = vadd.f32 %v10323_v8, %v2527_v1  ;;  %v3764_v12 = vmax.f32 %v3732_v6, 0.0  ;;  %v3860_v46 = vld [vmem:[#allocation2 + $0x187] sm:$0xff]  ;;  %v4577_v4 = vld [vmem:[#allocation2 + $0x11] sm:$0xff] }
 0x224   : > { %3798 = vst [vmem:[#allocation2 + $0x1c8] sm:$0xff] %v3766_v39  ;;  %v3735_v62 = vadd.f32 %v10337_v19, %v3634_v5  ;;  %v3632_v18 = vadd.f32 %v3579_v53, %v3262_v31  ;;  %8682 = vmatmul.mubr.bf16.gmra.mxu1 %v10638_v60  ;;  %v2896_v7 = vadd.f32 %v10330_v38, %v2525_v44  ;;  %v8647_v61 = vpop.f32.mrf.mxu0  ;;  %v3858_v10 = vld [vmem:[#allocation2 + $0x167] sm:$0xff] }
 0x225   : > { %8685 = vmatprep.mubr.bf16.mxu1 %v10643_v35  ;;  %v3265_v25 = vadd.f32 %v3222_v13, %v2895_v45  ;;  %3796 = vst [vmem:[#allocation2 + $0x1a8] sm:$0xff] %v3764_v12  ;;  %v3637_v8 = vadd.f32 %v8647_v61, %v3267_v48  ;;  %v3268_v33 = vadd.f32 %v8600_v28, %v2898_v22  ;;  %v9200_v22 = vld [vmem:[%s11539_s1 + $0x3b0] sm:$0xff]  }
 0x226   : > { %v10652_v40 = vmax.f32 %v3735_v62, 0.0  ;;  %v3733_v11 = vadd.f32 %v10337_v19, %v3632_v18  ;;  %8734 = vmatmul.mubr.bf16.gmra.mxu0 %v10645_v52  ;;  %v3592_v41 = vpop.f32.mrf.mxu0  ;;  %v3861_v51 = vld [vmem:[#allocation2 + $0x18f] sm:$0xff]  ;;  %v3266_v13 = vadd.f32 %v3225_v34, %v2896_v7 }
 0x227   : > { %8737 = vmatprep.mubr.bf16.mxu0 %v4250_v43  ;;  %v3738_v38 = vadd.f32 %v10337_v19, %v3637_v8  ;;  %v3635_v27 = vadd.f32 %v3592_v41, %v3265_v25  ;;  %v10662_v14 = vpack.c.bf16 %v3861_v51, %v3860_v46  ;;  %v4579_v62 = vld [vmem:[#allocation2 + $0x31] sm:$0xff]  ;;  %v9202_v7 = vld [vmem:[%s11539_s1 + $0x3a8] sm:$0xff]  }
 0x228   : > { %3799 = vst [vmem:[#allocation2 + $0x1d0] sm:$0xff] %v10652_v40  ;;  %v3765_v30 = vmax.f32 %v3733_v11, 0.0  ;;  %v8648_v26 = vpop.f32.mrf.mxu0  ;;  %v3859_v3 = vld [vmem:[#allocation2 + $0x16f] sm:$0xff]  ;;  %v4252_v58 = vpack.c.bf16 %v10652_v40, %v3766_v39 }
 0x229   : > { %v3770_v20 = vmax.f32 %v3738_v38, 0.0  ;;  %v3736_v42 = vadd.f32 %v10337_v19, %v3635_v27  ;;  %v3638_v49 = vadd.f32 %v8648_v26, %v3268_v33  ;;  %v10660_v63 = vpack.c.bf16 %v3859_v3, %v3858_v10  ;;  %v4581_v18 = vld [vmem:[#allocation2 + $0x51] sm:$0xff]  ;;  %v4582_v34 = vld [vmem:[#allocation2 + $0x69] sm:$0xff] }
 0x22a   : > { %3797 = vst [vmem:[#allocation2 + $0x1b0] sm:$0xff] %v3765_v30  ;;  %v3595_v47 = vpop.f32.mrf.mxu0  ;;  %v10664_v0 = vpack.c.bf16 %v3765_v30, %v3764_v12  ;;  %v4578_v12 = vld [vmem:[#allocation2 + $0x29] sm:$0xff]  ;;  %v4583_v11 = vld [vmem:[#allocation2 + $0x71] sm:$0xff] }
 0x22b   : > { %3802 = vst [vmem:[#allocation2 + $0x208] sm:$0xff] %v3770_v20  ;;  %v3768_v57 = vmax.f32 %v3736_v42, 0.0  ;;  %v3739_v37 = vadd.f32 %v10337_v19, %v3638_v49  ;;  %v3636_v1 = vadd.f32 %v3595_v47, %v3266_v13  ;;  %v3864_v39 = vld [vmem:[#allocation2 + $0x1c7] sm:$0xff]  ;;  %v10695_v61 = vpack.c.bf16 %v4579_v62, %v4578_v12  ;;  %v9195_v25 = vld [vmem:[%s11539_s1 + $0x370] sm:$0xff]   ;;  %v9205_v33 = vld [vmem:[%s11539_s1 + $0x398] sm:$0xff]  }
 0x22c   : > { %8686 = vmatmul.mubr.bf16.gmra.mxu1 %v10660_v63  ;;  %v3862_v2 = vld [vmem:[#allocation2 + $0x1a7] sm:$0xff]  ;;  %v4585_v41 = vld [vmem:[#allocation2 + $0x91] sm:$0xff] }
 0x22d   : > { %8689 = vmatprep.mubr.bf16.mxu1 %v10662_v14  ;;  %3800 = vst [vmem:[#allocation2 + $0x1e8] sm:$0xff] %v3768_v57  ;;  %v3771_v31 = vmax.f32 %v3739_v37, 0.0  ;;  %v3737_v36 = vadd.f32 %v10337_v19, %v3636_v1  ;;  %v4576_v19 = vld [vmem:[#allocation2 + $0x9] sm:$0xff]  ;;  %v9198_v38 = vld [vmem:[%s11539_s1 + $0x358] sm:$0xff]  }
 0x22e   : > { %8738 = vmatmul.mubr.bf16.gmra.mxu0 %v10664_v0  ;;  %v4608_v48 = vpack.c.bf16 %v4577_v4, %v4576_v19  ;;  %v4584_v8 = vld [vmem:[#allocation2 + $0x89] sm:$0xff]  ;;  %v4587_v51 = vld [vmem:[#allocation2 + $0xb1] sm:$0xff] }
 0x22f   : > { %8741 = vmatprep.mubr.bf16.mxu0 %v4252_v58  ;;  %3803 = vst [vmem:[#allocation2 + $0x210] sm:$0xff] %v3771_v31  ;;  %v3769_v45 = vmax.f32 %v3737_v36, 0.0  ;;  %v3865_v55 = vld [vmem:[#allocation2 + $0x1cf] sm:$0xff]  ;;  %v10671_v16 = vpack.c.bf16 %v3771_v31, %v3770_v20  ;;  %v10721_v30 = vpack.c.bf16 %v4585_v41, %v4584_v8 }
 0x230   : > { %v10677_v5 = vpack.c.bf16 %v3865_v55, %v3864_v39  ;;  %v4586_v27 = vld [vmem:[#allocation2 + $0xa9] sm:$0xff]  ;;  %v4589_v26 = vld [vmem:[#allocation2 + $0xd1] sm:$0xff] }
 0x231   : > { %v3863_v43 = vld [vmem:[#allocation2 + $0x1af] sm:$0xff]  ;;  %3801 = vst [vmem:[#allocation2 + $0x1f0] sm:$0xff] %v3769_v45  ;;  %v10675_v6 = vpack.c.bf16 %v3769_v45, %v3768_v57  ;;  %v10736_v3 = vpack.c.bf16 %v4587_v51, %v4586_v27  ;;  %v9215_v57 = vld [vmem:[%s11539_s1 + $0x438] sm:$0xff]  }
 0x232   : > { %v10673_v28 = vpack.c.bf16 %v3863_v43, %v3862_v2  ;;  %v4588_v13 = vld [vmem:[#allocation2 + $0xc9] sm:$0xff]  ;;  %v4591_v49 = vld [vmem:[#allocation2 + $0xf1] sm:$0xff] }
 0x233   : > { %v9208_v10 = vld [vmem:[%s11539_s1 + $0x388] sm:$0xff]   ;;  %v10741_v58 = vpack.c.bf16 %v4589_v26, %v4588_v13  ;;  %v4593_v47 = vld [vmem:[#allocation2 + $0x111] sm:$0xff] }
 0x234   : > { %8690 = vmatmul.mubr.bf16.gmra.mxu1 %v10673_v28  ;;  %v3866_v24 = vld [vmem:[#allocation2 + $0x1e7] sm:$0xff]  ;;  %v4595_v36 = vld [vmem:[#allocation2 + $0x131] sm:$0xff] }
 0x235   : > { %8693 = vmatprep.mubr.bf16.mxu1 %v10677_v5  ;;  %v9204_v20 = vld [vmem:[%s11539_s1 + $0x348] sm:$0xff]   ;;  %v4597_v55 = vld [vmem:[#allocation2 + $0x151] sm:$0xff] }
 0x236   : > { %8742 = vmatmul.mubr.bf16.gmra.mxu0 %v10675_v6  ;;  %v4590_v42 = vld [vmem:[#allocation2 + $0xe9] sm:$0xff]  ;;  %v4599_v39 = vld [vmem:[#allocation2 + $0x171] sm:$0xff] }
 0x237   : > { %8809 = vmatprep.mubr.bf16.mxu0 %v10440_v23  ;;  %v4580_v23 = vld [vmem:[#allocation2 + $0x49] sm:$0xff]  ;;  %v10756_v37 = vpack.c.bf16 %v4591_v49, %v4590_v42  ;;  %v9221_v13 = vld [vmem:[%s11539_s1 + $0x418] sm:$0xff]  }
 0x238   : > { %v3867_v44 = vld [vmem:[#allocation2 + $0x1ef] sm:$0xff] }
 0x239   : > { %v10683_v53 = vpack.c.bf16 %v3867_v44, %v3866_v24  ;;  %v4592_v46 = vld [vmem:[#allocation2 + $0x109] sm:$0xff] }
 0x23a   : > { %v10761_v1 = vpack.c.bf16 %v4593_v47, %v4592_v46  ;;  %v4594_v31 = vld [vmem:[#allocation2 + $0x129] sm:$0xff] }
 0x23b   : > { %v4596_v45 = vld [vmem:[#allocation2 + $0x149] sm:$0xff]  ;;  %v10770_v2 = vpack.c.bf16 %v4595_v36, %v4594_v31 }
 0x23c   : > { %8694 = vmatmul.mubr.bf16.gmra.mxu1 %v10683_v53  ;;  %v10772_v43 = vpack.c.bf16 %v4597_v55, %v4596_v45  ;;  %v4600_v19 = vld [vmem:[#allocation2 + $0x189] sm:$0xff] }
 0x23d   : > { %8761 = vmatprep.mubr.bf16.mxu1 %v4608_v48  ;;  %v4602_v44 = vld [vmem:[#allocation2 + $0x1a9] sm:$0xff]  ;;  %v4603_v48 = vld [vmem:[#allocation2 + $0x1b1] sm:$0xff] }
 0x23e   : > { %8810 = vmatmul.mubr.bf16.vlgmr.msra.gmra.mxu0 %v10447_v50  ;;  %v10700_v50 = vpack.c.bf16 %v4581_v18, %v4580_v23  ;;  %v4977_v12 = vld [vmem:[#allocation2 + $0x20f] sm:$0xff]  ;;  %v4976_v23 = vld [vmem:[#allocation2 + $0x207] sm:$0xff] }
 0x23f   : > { %8813 = vmatprep.mubr.bf16.mxu0 %v10492_v32  ;;  %8890 = vmatpush3.bf16.msra.mxu0 %v10587_v59  ;;  %v9203_v32 = vld [vmem:[%s11539_s1 + $0x3a0] sm:$0xff]   ;;  %v9196_v59 = vld [vmem:[%s11539_s1 + $0x368] sm:$0xff]   ;;  %v10791_v18 = vpack.c.bf16 %v4977_v12, %v4976_v23  ;;  %v5321_v8 = vld [vmem:[#allocation2 + $0x70] sm:$0xff] }
 0x240   : > { %8891 = vmatprep.subr.bf16.mxu0 %v9200_v22  ;;  %v5318_v41 = vld [vmem:[#allocation2 + $0x48] sm:$0xff]  ;;  %v5323_v27 = vld [vmem:[#allocation2 + $0x90] sm:$0xff] }
 0x241   : > { %v5325_v51 = vld [vmem:[#allocation2 + $0xb0] sm:$0xff]  ;;  %v5322_v26 = vld [vmem:[#allocation2 + $0x88] sm:$0xff] }
 0x242   : > { %v5327_v42 = vld [vmem:[#allocation2 + $0xd0] sm:$0xff]  ;;  %v9224_v46 = vld [vmem:[%s11539_s1 + $0x408] sm:$0xff]  }
 0x243   : > { %8892 = vmatpush3.bf16.msra.mxu0 %v9200_v22  ;;  %v4605_v22 = vld [vmem:[#allocation2 + $0x1d1] sm:$0xff]  ;;  %v5326_v47 = vld [vmem:[#allocation2 + $0xc8] sm:$0xff] }
 0x244   : > { %8762 = vmatmul.mubr.bf16.vlgmr.msra.gmra.mxu1 %v10695_v61  ;;  %8893 = vmatprep.subr.bf16.mxu0 %v9202_v7  ;;  %v5329_v49 = vld [vmem:[#allocation2 + $0xf0] sm:$0xff]  ;;  %v9220_v31 = vld [vmem:[%s11539_s1 + $0x3c8] sm:$0xff]  }
 0x245   : > { %8765 = vmatprep.mubr.bf16.mxu1 %v10700_v50  ;;  %8842 = vmatpush3.bf16.msra.mxu1 %v10625_v17  ;;  %v10716_v17 = vpack.c.bf16 %v4583_v11, %v4582_v34  ;;  %v9216_v34 = vld [vmem:[%s11539_s1 + $0x430] sm:$0xff]   ;;  %v10864_v45 = vld [vmem:[#allocation2 + $0x128] sm:$0xff] }
 0x246   : > { %8814 = vmatmul.mubr.bf16.gmra.mxu0 %v10499_v54  ;;  %8843 = vmatprep.subr.bf16.mxu1 %v9195_v25  ;;  %v9197_v54 = vld [vmem:[%s11539_s1 + $0x360] sm:$0xff]   ;;  %v5319_v11 = vld [vmem:[#allocation2 + $0x50] sm:$0xff]  ;;  %v5330_v55 = vld [vmem:[#allocation2 + $0x108] sm:$0xff] }
 0x247   : > { %8817 = vmatprep.mubr.bf16.mxu0 %v10544_v9  ;;  %8894 = vmatpush3.bf16.msra.mxu0 %v9202_v7  ;;  %v9206_v9 = vld [vmem:[%s11539_s1 + $0x390] sm:$0xff]   ;;  %v6056_v12 = vld [vmem:[#allocation2 + $0x47] sm:$0xff] }
 0x248   : > { %8895 = vmatprep.subr.bf16.mxu0 %v9203_v32  ;;  %v4607_v7 = vld [vmem:[#allocation2 + $0x1f1] sm:$0xff] }
 0x249   : > { %8844 = vmatpush3.bf16.msra.mxu1 %v9195_v25  ;;  %v5331_v36 = vld [vmem:[#allocation2 + $0x110] sm:$0xff] }
 0x24a   : > { %8845 = vmatprep.subr.bf16.mxu1 %v9196_v59 }
 0x24b   : > { %8896 = vmatpush3.bf16.msra.mxu0 %v9203_v32  ;;  %v5316_v32 = vld [vmem:[#allocation2 + $0x28] sm:$0xff] }
 0x24c   : > { %8766 = vmatmul.mubr.bf16.gmra.mxu1 %v10716_v17  ;;  %8897 = vmatprep.subr.bf16.mxu0 %v9205_v33 }
 0x24d   : > { %8769 = vmatprep.mubr.bf16.mxu1 %v10721_v30  ;;  %8846 = vmatpush3.bf16.msra.mxu1 %v9196_v59 }
 0x24e   : > { %8818 = vmatmul.mubr.bf16.gmra.mxu0 %v10551_v56  ;;  %8847 = vmatprep.subr.bf16.mxu1 %v9197_v54  ;;  %v9201_v56 = vld [vmem:[%s11539_s1 + $0x350] sm:$0xff]  }
 0x24f   : > { %8821 = vmatprep.mubr.bf16.mxu0 %v10600_v29  ;;  %8898 = vmatpush3.bf16.msra.mxu0 %v9205_v33  ;;  %v9209_v29 = vld [vmem:[%s11539_s1 + $0x380] sm:$0xff]   ;;  %v10807_v33 = vpack.c.bf16 %v5319_v11, %v5318_v41  ;;  %v9228_v41 = vld [vmem:[%s11539_s1 + $0x468] sm:$0xff]  }
 0x250   : > { %8899 = vmatprep.subr.bf16.mxu0 %v9206_v9 }
 0x251   : > { %8848 = vmatpush3.bf16.msra.mxu1 %v9197_v54  ;;  %v5320_v54 = vld [vmem:[#allocation2 + $0x68] sm:$0xff] }
 0x252   : > { %8849 = vmatprep.subr.bf16.mxu1 %v9198_v38 }
 0x253   : > { %8900 = vmatpush3.bf16.msra.mxu0 %v9206_v9  ;;  %v9211_v9 = vld [vmem:[%s11539_s1 + $0x3f0] sm:$0xff]  }
 0x254   : > { %8770 = vmatmul.mubr.bf16.gmra.mxu1 %v10736_v3  ;;  %8901 = vmatprep.subr.bf16.mxu0 %v9208_v10 }
 0x255   : > { %8773 = vmatprep.mubr.bf16.mxu1 %v10741_v58  ;;  %8850 = vmatpush3.bf16.msra.mxu1 %v9198_v38  ;;  %v10812_v38 = vpack.c.bf16 %v5321_v8, %v5320_v54  ;;  %v6063_v54 = vld [vmem:[#allocation2 + $0xaf] sm:$0xff] }
 0x256   : > { %8822 = vmatmul.mubr.bf16.gmra.mxu0 %v10607_v21  ;;  %8851 = vmatprep.subr.bf16.mxu1 %v9201_v56  ;;  %v9207_v21 = vld [vmem:[%s11539_s1 + $0x340] sm:$0xff]  }
 0x257   : > { %8825 = vmatprep.mubr.bf16.mxu0 %v10638_v60  ;;  %8902 = vmatpush3.bf16.msra.mxu0 %v9208_v10  ;;  %v9210_v60 = vld [vmem:[%s11539_s1 + $0x3f8] sm:$0xff]   ;;  %v10827_v10 = vpack.c.bf16 %v5323_v27, %v5322_v26  ;;  %v6062_v27 = vld [vmem:[#allocation2 + $0xa7] sm:$0xff] }
 0x258   : > { %8903 = vmatprep.subr.bf16.mxu0 %v9209_v29  ;;  %v6064_v26 = vld [vmem:[#allocation2 + $0xc7] sm:$0xff] }
 0x259   : > { %8852 = vmatpush3.bf16.msra.mxu1 %v9201_v56  ;;  %v9213_v56 = vld [vmem:[%s11539_s1 + $0x3e0] sm:$0xff]  }
 0x25a   : > { %8853 = vmatprep.subr.bf16.mxu1 %v9204_v20 }
 0x25b   : > { %8904 = vmatpush3.bf16.msra.mxu0 %v9209_v29 }
 0x25c   : > { %8774 = vmatmul.mubr.bf16.gmra.mxu1 %v10756_v37  ;;  %8985 = vmatprep.subr.bf16.mxu0 %v9215_v57 }
 0x25d   : > { %8777 = vmatprep.mubr.bf16.mxu1 %v10761_v1  ;;  %8854 = vmatpush3.bf16.msra.mxu1 %v9204_v20  ;;  %v9214_v20 = vld [vmem:[%s11539_s1 + $0x3d8] sm:$0xff]  }
 0x25e   : > { %8826 = vmatmul.mubr.bf16.gmra.mxu0 %v10643_v35  ;;  %8855 = vmatprep.subr.bf16.mxu1 %v9207_v21  ;;  %v4598_v35 = vld [vmem:[#allocation2 + $0x169] sm:$0xff] }
 0x25f   : > { %8829 = vmatprep.mubr.bf16.mxu0 %v10660_v63  ;;  %v4601_v63 = vld [vmem:[#allocation2 + $0x191] sm:$0xff]  ;;  %v10778_v4 = vpack.c.bf16 %v4599_v39, %v4598_v35  ;;  %v10866_v35 = vpack.c.bf16 %v5331_v36, %v5330_v55  ;;  %v5356_v39 = vpack.c.bf16 %v10579_v15, %v10864_v45  ;;  %v6066_v55 = vld [vmem:[#allocation2 + $0xe7] sm:$0xff] }
 0x260   : > { %v10780_v24 = vpack.c.bf16 %v4601_v63, %v4600_v19  ;;  %v5335_v19 = vld [vmem:[#allocation2 + $0x150] sm:$0xff]  ;;  %v5334_v63 = vld [vmem:[#allocation2 + $0x148] sm:$0xff] }
 0x261   : > { %8856 = vmatpush3.bf16.msra.mxu1 %v9207_v21  ;;  %v9217_v21 = vld [vmem:[%s11539_s1 + $0x3d0] sm:$0xff]  }
 0x262   : > { %8937 = vmatprep.subr.bf16.mxu1 %v9210_v60  ;;  %v5339_v15 = vld [vmem:[#allocation2 + $0x190] sm:$0xff] }
 0x264   : > { %8778 = vmatmul.mubr.bf16.gmra.mxu1 %v10770_v2 }
 0x265   : > { %8781 = vmatprep.mubr.bf16.mxu1 %v10772_v43 }
 0x266   : > { %8830 = vmatmul.mubr.bf16.gmra.mxu0 %v10662_v14  ;;  %v4604_v14 = vld [vmem:[#allocation2 + $0x1c9] sm:$0xff] }
 0x267   : > { %8833 = vmatprep.mubr.bf16.mxu0 %v10673_v28  ;;  %v10786_v28 = vpack.c.bf16 %v4603_v48, %v4602_v44  ;;  %v10788_v62 = vpack.c.bf16 %v4605_v22, %v4604_v14  ;;  %v10879_v44 = vpack.c.bf16 %v5335_v19, %v5334_v63  ;;  %v5716_v14 = vld [vmem:[#allocation2 + $0x209] sm:$0xff] }
 0x268   : > { %v9231_v63 = vld [vmem:[%s11539_s1 + $0x450] sm:$0xff]  }
 0x26c   : > { %8782 = vmatmul.mubr.bf16.gmra.mxu1 %v10778_v4 }
 0x26d   : > { %8785 = vmatprep.mubr.bf16.mxu1 %v10780_v24 }
 0x26e   : > { %8834 = vmatmul.mubr.bf16.gmra.mxu0 %v10677_v5  ;;  %v4606_v5 = vld [vmem:[#allocation2 + $0x1e9] sm:$0xff] }
 0x26f   : > { %8837 = vmatprep.mubr.bf16.mxu0 %v10683_v53  ;;  %v5317_v53 = vld [vmem:[#allocation2 + $0x30] sm:$0xff]  ;;  %v10796_v25 = vpack.c.bf16 %v4607_v7, %v4606_v5 }
 0x270   : > { %v5348_v59 = vpack.c.bf16 %v5317_v53, %v5316_v32  ;;  %v6061_v5 = vld [vmem:[#allocation2 + $0x8f] sm:$0xff] }
 0x274   : > { %8786 = vmatmul.mubr.bf16.gmra.mxu1 %v10786_v28 }
 0x275   : > { %8789 = vmatprep.mubr.bf16.mxu1 %v10788_v62 }
 0x276   : > { %8838 = vmatmul.mubr.bf16.gmra.mxu0 %v10791_v18 }
 0x277   : > { %8905 = vmatprep.mubr.bf16.mxu0 %v10695_v61  ;;  %v9218_v61 = vld [vmem:[%s11539_s1 + $0x428] sm:$0xff]  }
 0x27c   : > { %8790 = vmatmul.mubr.bf16.gmra.mxu1 %v10796_v25 }
 0x27d   : > { %8857 = vmatprep.mubr.bf16.mxu1 %v5348_v59  ;;  %v9227_v59 = vld [vmem:[%s11539_s1 + $0x470] sm:$0xff]  }
 0x27e   : > { %8906 = vmatmul.mubr.bf16.vlgmr.msra.gmra.mxu0 %v10700_v50  ;;  %v9219_v50 = vld [vmem:[%s11539_s1 + $0x420] sm:$0xff]  }
 0x27f   : > { %8909 = vmatprep.mubr.bf16.mxu0 %v10716_v17  ;;  %8986 = vmatpush3.bf16.msra.mxu0 %v9215_v57  ;;  %v9212_v17 = vld [vmem:[%s11539_s1 + $0x3e8] sm:$0xff]   ;;  %v10847_v57 = vpack.c.bf16 %v5327_v42, %v5326_v47  ;;  %v9230_v47 = vld [vmem:[%s11539_s1 + $0x458] sm:$0xff]  }
 0x280   : > { %8987 = vmatprep.subr.bf16.mxu0 %v9216_v34 }
 0x283   : > { %8988 = vmatpush3.bf16.msra.mxu0 %v9216_v34 }
 0x284   : > { %8858 = vmatmul.mubr.bf16.vlgmr.msra.gmra.mxu1 %v10807_v33  ;;  %8989 = vmatprep.subr.bf16.mxu0 %v9218_v61 }
 0x285   : > { %8861 = vmatprep.mubr.bf16.mxu1 %v10812_v38  ;;  %8938 = vmatpush3.bf16.msra.mxu1 %v9210_v60 }
 0x286   : > { %8910 = vmatmul.mubr.bf16.gmra.mxu0 %v10721_v30  ;;  %8939 = vmatprep.subr.bf16.mxu1 %v9211_v9  ;;  %v5324_v30 = vld [vmem:[#allocation2 + $0xa8] sm:$0xff] }
 0x287   : > { %8913 = vmatprep.mubr.bf16.mxu0 %v10736_v3  ;;  %8990 = vmatpush3.bf16.msra.mxu0 %v9218_v61  ;;  %v10832_v29 = vpack.c.bf16 %v5325_v51, %v5324_v30  ;;  %v9222_v3 = vld [vmem:[%s11539_s1 + $0x410] sm:$0xff]   ;;  %v9229_v30 = vld [vmem:[%s11539_s1 + $0x460] sm:$0xff]  }
 0x288   : > { %8991 = vmatprep.subr.bf16.mxu0 %v9219_v50 }
 0x289   : > { %8940 = vmatpush3.bf16.msra.mxu1 %v9211_v9 }
 0x28a   : > { %8941 = vmatprep.subr.bf16.mxu1 %v9212_v17 }
 0x28b   : > { %8992 = vmatpush3.bf16.msra.mxu0 %v9219_v50 }
 0x28c   : > { %8862 = vmatmul.mubr.bf16.gmra.mxu1 %v10827_v10  ;;  %8993 = vmatprep.subr.bf16.mxu0 %v9221_v13 }
 0x28d   : > { %8865 = vmatprep.mubr.bf16.mxu1 %v10832_v29  ;;  %8942 = vmatpush3.bf16.msra.mxu1 %v9212_v17 }
 0x28e   : > { %8914 = vmatmul.mubr.bf16.gmra.mxu0 %v10741_v58  ;;  %8943 = vmatprep.subr.bf16.mxu1 %v9213_v56  ;;  %v5328_v58 = vld [vmem:[#allocation2 + $0xe8] sm:$0xff] }
 0x28f   : > { %8917 = vmatprep.mubr.bf16.mxu0 %v10756_v37  ;;  %8994 = vmatpush3.bf16.msra.mxu0 %v9221_v13  ;;  %v10852_v60 = vpack.c.bf16 %v5329_v49, %v5328_v58  ;;  %v9225_v37 = vld [vmem:[%s11539_s1 + $0x400] sm:$0xff]   ;;  %v6091_v13 = vpack.c.bf16 %v6063_v54, %v6062_v27  ;;  %v6067_v58 = vld [vmem:[#allocation2 + $0xef] sm:$0xff] }
 0x290   : > { %8995 = vmatprep.subr.bf16.mxu0 %v9222_v3 }
 0x291   : > { %8944 = vmatpush3.bf16.msra.mxu1 %v9213_v56 }
 0x292   : > { %8945 = vmatprep.subr.bf16.mxu1 %v9214_v20 }
 0x293   : > { %8996 = vmatpush3.bf16.msra.mxu0 %v9222_v3 }
 0x294   : > { %8866 = vmatmul.mubr.bf16.gmra.mxu1 %v10847_v57  ;;  %8997 = vmatprep.subr.bf16.mxu0 %v9224_v46 }
 0x295   : > { %8869 = vmatprep.mubr.bf16.mxu1 %v10852_v60  ;;  %8946 = vmatpush3.bf16.msra.mxu1 %v9214_v20 }
 0x296   : > { %8918 = vmatmul.mubr.bf16.gmra.mxu0 %v10761_v1  ;;  %8947 = vmatprep.subr.bf16.mxu1 %v9217_v21  ;;  %v9223_v1 = vld [vmem:[%s11539_s1 + $0x3c0] sm:$0xff]  }
 0x297   : > { %8921 = vmatprep.mubr.bf16.mxu0 %v10770_v2  ;;  %8998 = vmatpush3.bf16.msra.mxu0 %v9224_v46  ;;  %v9226_v2 = vld [vmem:[%s11539_s1 + $0x478] sm:$0xff]  }
 0x298   : > { %8999 = vmatprep.subr.bf16.mxu0 %v9225_v37 }
 0x299   : > { %8948 = vmatpush3.bf16.msra.mxu1 %v9217_v21 }
 0x29a   : > { %8949 = vmatprep.subr.bf16.mxu1 %v9220_v31 }
 0x29b   : > { %9000 = vmatpush3.bf16.msra.mxu0 %v9225_v37  ;;  %v6069_v37 = vld [vmem:[#allocation2 + $0x10f] sm:$0xff] }
 0x29c   : > { %8870 = vmatmul.mubr.bf16.gmra.mxu1 %v10866_v35 }
 0x29d   : > { %8873 = vmatprep.mubr.bf16.mxu1 %v5356_v39  ;;  %8950 = vmatpush3.bf16.msra.mxu1 %v9220_v31 }
 0x29e   : > { %8922 = vmatmul.mubr.bf16.gmra.mxu0 %v10772_v43  ;;  %8951 = vmatprep.subr.bf16.mxu1 %v9223_v1  ;;  %v5338_v43 = vld [vmem:[#allocation2 + $0x188] sm:$0xff] }
 0x29f   : > { %8925 = vmatprep.mubr.bf16.mxu0 %v10778_v4  ;;  %v10885_v48 = vpack.c.bf16 %v5339_v15, %v5338_v43  ;;  %v10890_v4 = vld [vmem:[#allocation2 + $0x1c8] sm:$0xff] }
 0x2a1   : > { %8952 = vmatpush3.bf16.msra.mxu1 %v9223_v1  ;;  %v6441_v1 = vld [vmem:[#allocation2 + $0x130] sm:$0xff] }
 0x2a2   : > { %9033 = vmatprep.subr.bf16.mxu1 %v9226_v2 }
 0x2a4   : > { %8874 = vmatmul.mubr.bf16.gmra.mxu1 %v10879_v44 }
 0x2a5   : > { %8877 = vmatprep.mubr.bf16.mxu1 %v10645_v52  ;;  %v5717_v52 = vld [vmem:[#allocation2 + $0x211] sm:$0xff] }
 0x2a6   : > { %8926 = vmatmul.mubr.bf16.gmra.mxu0 %v10780_v24  ;;  %v5361_v24 = vpack.c.bf16 %v10652_v40, %v10890_v4  ;;  %v10895_v22 = vpack.c.bf16 %v5717_v52, %v5716_v14  ;;  %v6059_v40 = vld [vmem:[#allocation2 + $0x6f] sm:$0xff]  ;;  %v6465_v52 = vpack.c.bf16 %v6441_v1, %v10864_v45 }
 0x2a7   : > { %8929 = vmatprep.mubr.bf16.mxu0 %v10786_v28 }
 0x2ac   : > { %8878 = vmatmul.mubr.bf16.gmra.mxu1 %v10885_v48 }
 0x2ad   : > { %8881 = vmatprep.mubr.bf16.mxu1 %v10664_v0  ;;  %v6057_v0 = vld [vmem:[#allocation2 + $0x4f] sm:$0xff] }
 0x2ae   : > { %8930 = vmatmul.mubr.bf16.gmra.mxu0 %v10788_v62  ;;  %v6088_v28 = vpack.c.bf16 %v6057_v0, %v6056_v12 }
 0x2af   : > { %8933 = vmatprep.mubr.bf16.mxu0 %v10796_v25  ;;  %v6060_v25 = vld [vmem:[#allocation2 + $0x87] sm:$0xff] }
 0x2b0   : > { %v6090_v34 = vpack.c.bf16 %v6061_v5, %v6060_v25  ;;  %v6073_v5 = vld [vmem:[#allocation2 + $0x14f] sm:$0xff] }
 0x2b4   : > { %8882 = vmatmul.mubr.bf16.gmra.mxu1 %v5361_v24 }
 0x2b5   : > { %8885 = vmatprep.mubr.bf16.mxu1 %v10675_v6  ;;  %v6058_v6 = vld [vmem:[#allocation2 + $0x67] sm:$0xff] }
 0x2b6   : > { %8934 = vmatmul.mubr.bf16.gmra.mxu0 %v10895_v22  ;;  %v6089_v53 = vpack.c.bf16 %v6059_v40, %v6058_v6  ;;  %v6070_v6 = vld [vmem:[#allocation2 + $0x127] sm:$0xff] }
 0x2b7   : > { %9001 = vmatprep.mubr.bf16.mxu0 %v10807_v33 }
 0x2bb   : > { %v8715_v62 = vpop.f32.mrf.mxu0 }
 0x2bc   : > { %8886 = vmatmul.mubr.bf16.gmra.mxu1 %v10671_v16 }
 0x2bd   : > { %8953 = vmatprep.mubr.bf16.mxu1 %v6088_v28  ;;  %v4385_v23 = vpop.f32.mrf.mxu0  ;;  %v9232_v28 = vld [vmem:[%s11539_s1 + $0x448] sm:$0xff]  }
 0x2be   : > { %9002 = vmatmul.mubr.bf16.vlgmr.msra.gmra.mxu0 %v10812_v38  ;;  %v6065_v38 = vld [vmem:[#allocation2 + $0xcf] sm:$0xff] }
 0x2bf   : > { %9005 = vmatprep.mubr.bf16.mxu0 %v10827_v10  ;;  %v8716_v7 = vpop.f32.mrf.mxu0 }
 0x2c1   : > { %v4388_v32 = vpop.f32.mrf.mxu0 }
 0x2c3   : > { %v8667_v16 = vpop.f32.mrf.mxu1 }
 0x2c4   : > { %8954 = vmatmul.mubr.bf16.vlgmr.msra.gmra.mxu1 %v6089_v53  ;;  %v10906_v11 = vadd.f32 %v8715_v62, %v8667_v16  ;;  %v6445_v53 = vld [vmem:[#allocation2 + $0x170] sm:$0xff]  ;;  %v9233_v16 = vld [vmem:[%s11539_s1 + $0x440] sm:$0xff]  }
 0x2c5   : > { %8957 = vmatprep.mubr.bf16.mxu1 %v6090_v34  ;;  %9034 = vmatpush3.bf16.msra.mxu1 %v9226_v2  ;;  %v4015_v8 = vpop.f32.mrf.mxu1  ;;  %v8719_v61 = vpop.f32.mrf.mxu0  ;;  %v6068_v2 = vld [vmem:[#allocation2 + $0x107] sm:$0xff] }
 0x2c6   : > { %9006 = vmatmul.mubr.bf16.gmra.mxu0 %v10832_v29  ;;  %9035 = vmatprep.subr.bf16.mxu1 %v9227_v59  ;;  %v10912_v33 = vadd.f32 %v4385_v23, %v4015_v8  ;;  %v6092_v29 = vpack.c.bf16 %v6065_v38, %v6064_v26  ;;  %v6071_v23 = vld [vmem:[#allocation2 + $0x12f] sm:$0xff] }
 0x2c7   : > { %9009 = vmatprep.mubr.bf16.mxu0 %v10847_v57  ;;  %v8668_v9 = vpop.f32.mrf.mxu1  ;;  %v4401_v50 = vpop.f32.mrf.mxu0 }
 0x2c8   : > { %v10915_v17 = vadd.f32 %v8716_v7, %v8668_v9 }
 0x2c9   : > { %9036 = vmatpush3.bf16.msra.mxu1 %v9227_v59  ;;  %v4018_v51 = vpop.f32.mrf.mxu1  ;;  %v8720_v10 = vpop.f32.mrf.mxu0  ;;  %v6072_v59 = vld [vmem:[#allocation2 + $0x147] sm:$0xff] }
 0x2ca   : > { %9037 = vmatprep.subr.bf16.mxu1 %v9228_v41  ;;  %v10920_v56 = vadd.f32 %v4388_v32, %v4018_v51  ;;  %v6095_v32 = vpack.c.bf16 %v6071_v23, %v6070_v6  ;;  %v6453_v23 = vld [vmem:[#allocation2 + $0x1f0] sm:$0xff] }
 0x2cb   : > { %v8671_v3 = vpop.f32.mrf.mxu1  ;;  %v4404_v20 = vpop.f32.mrf.mxu0 }
 0x2cc   : > { %8958 = vmatmul.mubr.bf16.gmra.mxu1 %v6091_v13  ;;  %v10922_v42 = vadd.f32 %v8719_v61, %v8671_v3  ;;  %v6444_v61 = vld [vmem:[#allocation2 + $0x168] sm:$0xff] }
 0x2cd   : > { %8961 = vmatprep.mubr.bf16.mxu1 %v6092_v29  ;;  %9038 = vmatpush3.bf16.msra.mxu1 %v9228_v41  ;;  %v4031_v49 = vpop.f32.mrf.mxu1  ;;  %v8723_v46 = vpop.f32.mrf.mxu0  ;;  %v6467_v9 = vpack.c.bf16 %v6445_v53, %v6444_v61  ;;  %v6075_v13 = vld [vmem:[#allocation2 + $0x16f] sm:$0xff]  ;;  %v6074_v3 = vld [vmem:[#allocation2 + $0x167] sm:$0xff] }
 0x2ce   : > { %9010 = vmatmul.mubr.bf16.gmra.mxu0 %v10852_v60  ;;  %9039 = vmatprep.subr.bf16.mxu1 %v9229_v30  ;;  %v10928_v57 = vadd.f32 %v4401_v50, %v4031_v49  ;;  %v6093_v60 = vpack.c.bf16 %v6067_v58, %v6066_v55  ;;  %v6448_v55 = vld [vmem:[#allocation2 + $0x1a8] sm:$0xff]  ;;  %v6455_v53 = vld [vmem:[#allocation2 + $0x210] sm:$0xff] }
 0x2cf   : > { %9013 = vmatprep.mubr.bf16.mxu0 %v10866_v35  ;;  %v8672_v21 = vpop.f32.mrf.mxu1  ;;  %v4417_v31 = vpop.f32.mrf.mxu0  ;;  %v6094_v35 = vpack.c.bf16 %v6069_v37, %v6068_v2 }
 0x2d0   : > { %v10931_v36 = vadd.f32 %v8720_v10, %v8672_v21  ;;  %v6077_v10 = vld [vmem:[#allocation2 + $0x18f] sm:$0xff] }
 0x2d1   : > { %9040 = vmatpush3.bf16.msra.mxu1 %v9229_v30  ;;  %v4034_v39 = vpop.f32.mrf.mxu1  ;;  %v8724_v19 = vpop.f32.mrf.mxu0  ;;  %v6451_v21 = vld [vmem:[#allocation2 + $0x1d0] sm:$0xff] }
 0x2d2   : > { %9041 = vmatprep.subr.bf16.mxu1 %v9230_v47  ;;  %v10936_v15 = vadd.f32 %v4404_v20, %v4034_v39  ;;  %v6449_v20 = vld [vmem:[#allocation2 + $0x1b0] sm:$0xff]  ;;  %v6470_v2 = vpack.c.bf16 %v6451_v21, %v10890_v4 }
 0x2d3   : > { %v8675_v43 = vpop.f32.mrf.mxu1  ;;  %v4420_v14 = vpop.f32.mrf.mxu0  ;;  %v6469_v39 = vpack.c.bf16 %v6449_v20, %v6448_v55 }
 0x2d4   : > { %8962 = vmatmul.mubr.bf16.gmra.mxu1 %v6093_v60  ;;  %v10939_v24 = vadd.f32 %v8723_v46, %v8675_v43  ;;  %v6097_v46 = vpack.c.bf16 %v6075_v13, %v6074_v3  ;;  %v6079_v43 = vld [vmem:[#allocation2 + $0x1af] sm:$0xff] }
 0x2d5   : > { %8965 = vmatprep.mubr.bf16.mxu1 %v6094_v35  ;;  %9042 = vmatpush3.bf16.msra.mxu1 %v9230_v47  ;;  %v4047_v0 = vpop.f32.mrf.mxu1  ;;  %v8727_v12 = vpop.f32.mrf.mxu0  ;;  %v6076_v47 = vld [vmem:[#allocation2 + $0x187] sm:$0xff] }
 0x2d6   : > { %9014 = vmatmul.mubr.bf16.gmra.mxu0 %v6465_v52  ;;  %9043 = vmatprep.subr.bf16.mxu1 %v9231_v63  ;;  %v10944_v62 = vadd.f32 %v4417_v31, %v4047_v0  ;;  %v6098_v31 = vpack.c.bf16 %v6077_v10, %v6076_v47  ;;  %v6081_v52 = vld [vmem:[#allocation2 + $0x1cf] sm:$0xff] }
 0x2d7   : > { %9017 = vmatprep.mubr.bf16.mxu0 %v10879_v44  ;;  %v8676_v40 = vpop.f32.mrf.mxu1  ;;  %v4433_v45 = vpop.f32.mrf.mxu0  ;;  %v6096_v44 = vpack.c.bf16 %v6073_v5, %v6072_v59 }
 0x2d8   : > { %v10947_v7 = vadd.f32 %v8724_v19, %v8676_v40 }
 0x2d9   : > { %9044 = vmatpush3.bf16.msra.mxu1 %v9231_v63  ;;  %v4050_v25 = vpop.f32.mrf.mxu1  ;;  %v8728_v34 = vpop.f32.mrf.mxu0 }
 0x2da   : > { %9045 = vmatprep.subr.bf16.mxu1 %v9232_v28  ;;  %v10952_v8 = vadd.f32 %v4420_v14, %v4050_v25 }
 0x2db   : > { %v4436_v54 = vpop.f32.mrf.mxu0 }
 0x2dc   : > { %v8679_v41 = vpop.f32.mrf.mxu1  ;;  %8966 = vmatmul.mubr.bf16.gmra.mxu1 %v6095_v32  ;;  %v6452_v32 = vld [vmem:[#allocation2 + $0x1e8] sm:$0xff] }
 0x2dd   : > { %v10954_v38 = vadd.f32 %v8727_v12, %v8679_v41  ;;  %8969 = vmatprep.mubr.bf16.mxu1 %v6096_v44  ;;  %9046 = vmatpush3.bf16.msra.mxu1 %v9232_v28  ;;  %v6078_v28 = vld [vmem:[#allocation2 + $0x1a7] sm:$0xff] }
 0x2de   : > { %v4063_v50 = vpop.f32.mrf.mxu1  ;;  %v8731_v27 = vpop.f32.mrf.mxu0  ;;  %9018 = vmatmul.mubr.bf16.gmra.mxu0 %v6467_v9  ;;  %9047 = vmatprep.subr.bf16.mxu1 %v9233_v16  ;;  %v6099_v5 = vpack.c.bf16 %v6079_v43, %v6078_v28  ;;  %v6454_v44 = vld [vmem:[#allocation2 + $0x208] sm:$0xff] }
 0x2df   : > { %v10956_v51 = vadd.f32 %v4433_v45, %v4063_v50  ;;  %9021 = vmatprep.mubr.bf16.mxu0 %v10885_v48  ;;  %v6080_v45 = vld [vmem:[#allocation2 + $0x1c7] sm:$0xff]  ;;  %v6472_v41 = vpack.c.bf16 %v6455_v53, %v6454_v44 }
 0x2e0   : > { %v8680_v26 = vpop.f32.mrf.mxu1  ;;  %v4449_v30 = vpop.f32.mrf.mxu0  ;;  %v6100_v25 = vpack.c.bf16 %v6081_v52, %v6080_v45  ;;  %v6797_v52 = vld [vmem:[#allocation2 + $0x51] sm:$0xff] }
 0x2e1   : > { %v10959_v29 = vadd.f32 %v8728_v34, %v8680_v26  ;;  %9048 = vmatpush3.bf16.msra.mxu1 %v9233_v16  ;;  %v6471_v16 = vpack.c.bf16 %v6453_v23, %v6452_v32 }
 0x2e2   : > { %v4066_v49 = vpop.f32.mrf.mxu1  ;;  %v8732_v58 = vpop.f32.mrf.mxu0 }
 0x2e3   : > { %v10961_v37 = vadd.f32 %v4436_v54, %v4066_v49 }
 0x2e4   : > { %v8683_v1 = vpop.f32.mrf.mxu1  ;;  %8970 = vmatmul.mubr.bf16.gmra.mxu1 %v6097_v46  ;;  %v4452_v48 = vpop.f32.mrf.mxu0  ;;  %v9235_v46 = vld [vmem:[#allocation2] sm:$0xff] }
 0x2e5   : > { %v10963_v60 = vadd.f32 %v8731_v27, %v8683_v1  ;;  %8973 = vmatprep.mubr.bf16.mxu1 %v6098_v31  ;;  %v6083_v27 = vld [vmem:[#allocation2 + $0x1ef] sm:$0xff]  ;;  %v6473_v47 = vpack.c.bf16 %v9235_v46, %v9235_v46  ;;  %v6086_v1 = vld [vmem:[#allocation2 + $0x227] sm:$0xff] }
 0x2e6   : > { %v4079_v19 = vpop.f32.mrf.mxu1  ;;  %v8735_v63 = vpop.f32.mrf.mxu0  ;;  %9022 = vmatmul.mubr.bf16.gmra.mxu0 %v6469_v39 }
 0x2e7   : > { %v10966_v35 = vadd.f32 %v4449_v30, %v4079_v19  ;;  %9025 = vmatprep.mubr.bf16.mxu0 %v6470_v2  ;;  %v6082_v30 = vld [vmem:[#allocation2 + $0x1e7] sm:$0xff] }
 0x2e8   : > { %v8684_v14 = vpop.f32.mrf.mxu1  ;;  %v4465_v0 = vpop.f32.mrf.mxu0  ;;  %v6101_v20 = vpack.c.bf16 %v6083_v27, %v6082_v30 }
 0x2e9   : > { %v10968_v12 = vadd.f32 %v8732_v58, %v8684_v14  ;;  %v6796_v14 = vld [vmem:[#allocation2 + $0x49] sm:$0xff] }
 0x2ea   : > { %v4082_v40 = vpop.f32.mrf.mxu1  ;;  %v8736_v6 = vpop.f32.mrf.mxu0  ;;  %v6828_v45 = vpack.c.bf16 %v6797_v52, %v6796_v14  ;;  %v6805_v14 = vld [vmem:[#allocation2 + $0xd1] sm:$0xff] }
 0x2eb   : > { %v10970_v4 = vadd.f32 %v4452_v48, %v4082_v40  ;;  %v6087_v48 = vld [vmem:[#allocation2 + $0x22f] sm:$0xff] }
 0x2ec   : > { %v8687_v59 = vpop.f32.mrf.mxu1  ;;  %8974 = vmatmul.mubr.bf16.gmra.mxu1 %v6099_v5  ;;  %v4468_v34 = vpop.f32.mrf.mxu0  ;;  %v6103_v43 = vpack.c.bf16 %v6087_v48, %v6086_v1 }
 0x2ed   : > { %v10972_v61 = vadd.f32 %v8735_v63, %v8687_v59  ;;  %8977 = vmatprep.mubr.bf16.mxu1 %v6100_v25 }
 0x2ee   : > { %v4095_v54 = vpop.f32.mrf.mxu1  ;;  %v8739_v9 = vpop.f32.mrf.mxu0  ;;  %9026 = vmatmul.mubr.bf16.gmra.mxu0 %v6471_v16  ;;  %v6799_v16 = vld [vmem:[#allocation2 + $0x71] sm:$0xff] }
 0x2ef   : > { %v10974_v50 = vadd.f32 %v4465_v0, %v4095_v54  ;;  %9029 = vmatprep.mubr.bf16.mxu0 %v6472_v41  ;;  %v6800_v41 = vld [vmem:[#allocation2 + $0x89] sm:$0xff]  ;;  %v6801_v54 = vld [vmem:[#allocation2 + $0x91] sm:$0xff] }
 0x2f0   : > { %v8688_v13 = vpop.f32.mrf.mxu1  ;;  %v4481_v26 = vpop.f32.mrf.mxu0 }
 0x2f1   : > { %v10976_v10 = vadd.f32 %v8736_v6, %v8688_v13 }
 0x2f2   : > { %v4098_v3 = vpop.f32.mrf.mxu1  ;;  %v8740_v49 = vpop.f32.mrf.mxu0 }
 0x2f3   : > { %v10978_v58 = vadd.f32 %v4468_v34, %v4098_v3  ;;  %v6798_v34 = vld [vmem:[#allocation2 + $0x69] sm:$0xff] }
 0x2f4   : > { %v8691_v21 = vpop.f32.mrf.mxu1  ;;  %8978 = vmatmul.mubr.bf16.gmra.mxu1 %v6101_v20  ;;  %v4484_v31 = vpop.f32.mrf.mxu0  ;;  %v6830_v20 = vpack.c.bf16 %v6801_v54, %v6800_v41 }
 0x2f5   : > { %v10980_v55 = vadd.f32 %v8739_v9, %v8691_v21  ;;  %8981 = vmatprep.mubr.bf16.mxu1 %v10791_v18 }
 0x2f6   : > { %v4111_v39 = vpop.f32.mrf.mxu1  ;;  %v8743_v2 = vpop.f32.mrf.mxu0  ;;  %9030 = vmatmul.mubr.bf16.gmra.mxu0 %v6473_v47 }
 0x2f7   : > { %v10983_v19 = vadd.f32 %v4481_v26, %v4111_v39  ;;  %v6829_v26 = vpack.c.bf16 %v6799_v16, %v6798_v34  ;;  %v6802_v39 = vld [vmem:[#allocation2 + $0xa9] sm:$0xff] }
 0x2f8   : > { %v8692_v63 = vpop.f32.mrf.mxu1  ;;  %v4497_v0 = vpop.f32.mrf.mxu0 }
 0x2f9   : > { %v10985_v28 = vadd.f32 %v8740_v49, %v8692_v63 }
 0x2fa   : > { %v4114_v23 = vpop.f32.mrf.mxu1  ;;  %v8744_v40 = vpop.f32.mrf.mxu0 }
 0x2fb   : > { %v10987_v5 = vadd.f32 %v4484_v31, %v4114_v23 }
 0x2fc   : > { %v8695_v18 = vpop.f32.mrf.mxu1  ;;  %8982 = vmatmul.mubr.bf16.gmra.mxu1 %v6103_v43  ;;  %v4500_v6 = vpop.f32.mrf.mxu0  ;;  %v6804_v43 = vld [vmem:[#allocation2 + $0xc9] sm:$0xff] }
 0x2fd   : > { %v10989_v53 = vadd.f32 %v8743_v2, %v8695_v18  ;;  %9049 = vmatprep.mubr.bf16.mxu1 %v6828_v45  ;;  %v6803_v2 = vld [vmem:[#allocation2 + $0xb1] sm:$0xff] }
 0x2fe   : > { %v4127_v25 = vpop.f32.mrf.mxu1  ;;  %v8811_v32 = vpop.f32.mrf.mxu0  ;;  %v6831_v45 = vpack.c.bf16 %v6803_v2, %v6802_v39 }
 0x2ff   : > { %v10991_v59 = vadd.f32 %v4497_v0, %v4127_v25  ;;  %v6832_v25 = vpack.c.bf16 %v6805_v14, %v6804_v43 }
 0x300   : > { %v8696_v44 = vpop.f32.mrf.mxu1  ;;  %v5125_v9 = vpop.f32.mrf.mxu0 }
 0x301   : > { %v10993_v27 = vadd.f32 %v8744_v40, %v8696_v44 }
 0x302   : > { %v4130_v13 = vpop.f32.mrf.mxu1  ;;  %v8812_v30 = vpop.f32.mrf.mxu0 }
 0x303   : > { %v10995_v3 = vadd.f32 %v4500_v6, %v4130_v13  ;;  %v6807_v13 = vld [vmem:[#allocation2 + $0xf1] sm:$0xff] }
 0x304   : > { %v8763_v49 = vpop.f32.mrf.mxu1  ;;  %9050 = vmatmul.mubr.bf16.vlgmr.msra.gmra.mxu1 %v6829_v26  ;;  %v5128_v46 = vpop.f32.mrf.mxu0 }
 0x305   : > { %v4884_v47 = vadd.f32 %v8763_v49, %v10906_v11  ;;  %9053 = vmatprep.mubr.bf16.mxu1 %v6830_v20 }
 0x306   : > { %v4755_v21 = vpop.f32.mrf.mxu1  ;;  %v8815_v31 = vpop.f32.mrf.mxu0 }
 0x307   : > { %v10998_v1 = vadd.f32 %v8811_v32, %v4884_v47  ;;  %v4882_v48 = vadd.f32 %v4755_v21, %v10912_v33 }
 0x308   : > { %v8764_v63 = vpop.f32.mrf.mxu1  ;;  %v5141_v52 = vpop.f32.mrf.mxu0 }
 0x309   : > { %v11001_v0 = vadd.f32 %v5125_v9, %v4882_v48  ;;  %v4885_v23 = vadd.f32 %v8764_v63, %v10915_v17  ;;  %v6806_v9 = vld [vmem:[#allocation2 + $0xe9] sm:$0xff] }
 0x30a   : > { %v4758_v40 = vpop.f32.mrf.mxu1  ;;  %v8816_v11 = vpop.f32.mrf.mxu0  ;;  %v6833_v21 = vpack.c.bf16 %v6807_v13, %v6806_v9 }
 0x30b   : > { %v11004_v18 = vadd.f32 %v8812_v30, %v4885_v23  ;;  %v4883_v6 = vadd.f32 %v4758_v40, %v10920_v56  ;;  %v6808_v30 = vld [vmem:[#allocation2 + $0x109] sm:$0xff]  ;;  %v6809_v56 = vld [vmem:[#allocation2 + $0x111] sm:$0xff] }
 0x30c   : > { %v8767_v32 = vpop.f32.mrf.mxu1  ;;  %9054 = vmatmul.mubr.bf16.gmra.mxu1 %v6831_v45  ;;  %v5144_v33 = vpop.f32.mrf.mxu0  ;;  %v6834_v39 = vpack.c.bf16 %v6809_v56, %v6808_v30  ;;  %v6810_v40 = vld [vmem:[#allocation2 + $0x129] sm:$0xff]  ;;  %v6811_v45 = vld [vmem:[#allocation2 + $0x131] sm:$0xff] }
 0x30d   : > { %v11007_v34 = vadd.f32 %v5128_v46, %v4883_v6  ;;  %v4888_v16 = vadd.f32 %v8767_v32, %v10922_v42  ;;  %9057 = vmatprep.mubr.bf16.mxu1 %v6832_v25  ;;  %v6812_v6 = vld [vmem:[#allocation2 + $0x149] sm:$0xff] }
 0x30e   : > { %v4771_v44 = vpop.f32.mrf.mxu1  ;;  %v8819_v41 = vpop.f32.mrf.mxu0 }
 0x30f   : > { %v11010_v54 = vadd.f32 %v8815_v31, %v4888_v16  ;;  %v4886_v17 = vadd.f32 %v4771_v44, %v10928_v57  ;;  %v6835_v44 = vpack.c.bf16 %v6811_v45, %v6810_v40 }
 0x310   : > { %v8768_v26 = vpop.f32.mrf.mxu1  ;;  %v5157_v20 = vpop.f32.mrf.mxu0 }
 0x311   : > { %v11013_v49 = vadd.f32 %v5141_v52, %v4886_v17  ;;  %v4889_v46 = vadd.f32 %v8768_v26, %v10931_v36 }
 0x312   : > { %v4774_v47 = vpop.f32.mrf.mxu1  ;;  %v8820_v42 = vpop.f32.mrf.mxu0 }
 0x313   : > { %v11016_v48 = vadd.f32 %v8816_v11, %v4889_v46  ;;  %v4887_v31 = vadd.f32 %v4774_v47, %v10936_v15  ;;  %v6813_v15 = vld [vmem:[#allocation2 + $0x151] sm:$0xff]  ;;  %v6814_v47 = vld [vmem:[#allocation2 + $0x169] sm:$0xff] }
 0x314   : > { %v8771_v2 = vpop.f32.mrf.mxu1  ;;  %9058 = vmatmul.mubr.bf16.gmra.mxu1 %v6833_v21  ;;  %v5160_v57 = vpop.f32.mrf.mxu0  ;;  %v6836_v9 = vpack.c.bf16 %v6813_v15, %v6812_v6  ;;  %v6815_v21 = vld [vmem:[#allocation2 + $0x171] sm:$0xff] }
 0x315   : > { %v11019_v63 = vadd.f32 %v5144_v33, %v4887_v31  ;;  %v4892_v43 = vadd.f32 %v8771_v2, %v10939_v24  ;;  %9061 = vmatprep.mubr.bf16.mxu1 %v6834_v39  ;;  %v6816_v31 = vld [vmem:[#allocation2 + $0x189] sm:$0xff] }
 0x316   : > { %v4787_v14 = vpop.f32.mrf.mxu1  ;;  %v8823_v52 = vpop.f32.mrf.mxu0 }
 0x317   : > { %v11022_v23 = vadd.f32 %v8819_v41, %v4892_v43  ;;  %v4890_v36 = vadd.f32 %v4787_v14, %v10944_v62  ;;  %v6837_v14 = vpack.c.bf16 %v6815_v21, %v6814_v47 }
 0x318   : > { %v8772_v11 = vpop.f32.mrf.mxu1  ;;  %v5173_v25 = vpop.f32.mrf.mxu0 }
 0x319   : > { %v11025_v32 = vadd.f32 %v5157_v20, %v4890_v36  ;;  %v4893_v33 = vadd.f32 %v8772_v11, %v10947_v7 }
 0x31a   : > { %v4790_v16 = vpop.f32.mrf.mxu1  ;;  %v8824_v24 = vpop.f32.mrf.mxu0 }
 0x31b   : > { %v11028_v17 = vadd.f32 %v8820_v42, %v4893_v33  ;;  %v4891_v41 = vadd.f32 %v4790_v16, %v10952_v8  ;;  %v6817_v8 = vld [vmem:[#allocation2 + $0x191] sm:$0xff]  ;;  %v6818_v16 = vld [vmem:[#allocation2 + $0x1a9] sm:$0xff] }
 0x31c   : > { %v8775_v13 = vpop.f32.mrf.mxu1  ;;  %9062 = vmatmul.mubr.bf16.gmra.mxu1 %v6835_v44  ;;  %v5176_v62 = vpop.f32.mrf.mxu0  ;;  %v6838_v40 = vpack.c.bf16 %v6817_v8, %v6816_v31  ;;  %v6819_v44 = vld [vmem:[#allocation2 + $0x1b1] sm:$0xff] }
 0x31d   : > { %v11031_v26 = vadd.f32 %v5160_v57, %v4891_v41  ;;  %v4896_v30 = vadd.f32 %v8775_v13, %v10954_v38  ;;  %9065 = vmatprep.mubr.bf16.mxu1 %v6836_v9  ;;  %v6820_v41 = vld [vmem:[#allocation2 + $0x1c9] sm:$0xff] }
 0x31e   : > { %v4803_v56 = vpop.f32.mrf.mxu1  ;;  %v8827_v20 = vpop.f32.mrf.mxu0 }
 0x31f   : > { %v11034_v46 = vadd.f32 %v8823_v52, %v4896_v30  ;;  %v4894_v7 = vadd.f32 %v4803_v56, %v10956_v51  ;;  %v6839_v56 = vpack.c.bf16 %v6819_v44, %v6818_v16  ;;  %v6826_v44 = vld [vmem:[#allocation2 + $0x229] sm:$0xff] }
 0x320   : > { %v8776_v42 = vpop.f32.mrf.mxu1  ;;  %v5189_v39 = vpop.f32.mrf.mxu0 }
 0x321   : > { %v11037_v2 = vadd.f32 %v5173_v25, %v4894_v7  ;;  %v4897_v57 = vadd.f32 %v8776_v42, %v10959_v29 }
 0x322   : > { %v4806_v43 = vpop.f32.mrf.mxu1  ;;  %v8828_v38 = vpop.f32.mrf.mxu0 }
 0x323   : > { %v11040_v36 = vadd.f32 %v8824_v24, %v4897_v57  ;;  %v4895_v52 = vadd.f32 %v4806_v43, %v10961_v37  ;;  %v6821_v37 = vld [vmem:[#allocation2 + $0x1d1] sm:$0xff]  ;;  %v6822_v43 = vld [vmem:[#allocation2 + $0x1e9] sm:$0xff] }
 0x324   : > { %v8779_v45 = vpop.f32.mrf.mxu1  ;;  %9066 = vmatmul.mubr.bf16.gmra.mxu1 %v6837_v14  ;;  %v5192_v51 = vpop.f32.mrf.mxu0  ;;  %v6840_v47 = vpack.c.bf16 %v6821_v37, %v6820_v41  ;;  %v6823_v14 = vld [vmem:[#allocation2 + $0x1f1] sm:$0xff] }
 0x325   : > { %v11043_v11 = vadd.f32 %v5176_v62, %v4895_v52  ;;  %v4900_v6 = vadd.f32 %v8779_v45, %v10963_v60  ;;  %9069 = vmatprep.mubr.bf16.mxu1 %v6838_v40 }
 0x326   : > { %v4819_v15 = vpop.f32.mrf.mxu1  ;;  %v8831_v25 = vpop.f32.mrf.mxu0 }
 0x327   : > { %v11046_v33 = vadd.f32 %v8827_v20, %v4900_v6  ;;  %v4898_v29 = vadd.f32 %v4819_v15, %v10966_v35 }
 0x328   : > { %v8780_v24 = vpop.f32.mrf.mxu1  ;;  %v5205_v9 = vpop.f32.mrf.mxu0 }
 0x329   : > { %v11049_v13 = vadd.f32 %v5189_v39, %v4898_v29  ;;  %v4901_v62 = vadd.f32 %v8780_v24, %v10968_v12  ;;  %v6827_v24 = vld [vmem:[#allocation2 + $0x231] sm:$0xff] }
 0x32a   : > { %v4822_v30 = vpop.f32.mrf.mxu1  ;;  %v8832_v60 = vpop.f32.mrf.mxu0 }
 0x32b   : > { %v11052_v7 = vadd.f32 %v8828_v38, %v4901_v62  ;;  %v4899_v20 = vadd.f32 %v4822_v30, %v10970_v4  ;;  %v6843_v30 = vpack.c.bf16 %v6827_v24, %v6826_v44 }
 0x32c   : > { %v8783_v21 = vpop.f32.mrf.mxu1  ;;  %9070 = vmatmul.mubr.bf16.gmra.mxu1 %v6839_v56  ;;  %v5208_v35 = vpop.f32.mrf.mxu0 }
 0x32d   : > { %v11055_v42 = vadd.f32 %v5192_v51, %v4899_v20  ;;  %v4904_v31 = vadd.f32 %v8783_v21, %v10972_v61  ;;  %9073 = vmatprep.mubr.bf16.mxu1 %v6840_v47  ;;  %v6841_v51 = vpack.c.bf16 %v6823_v14, %v6822_v43 }
 0x32e   : > { %v4835_v8 = vpop.f32.mrf.mxu1  ;;  %v8835_v39 = vpop.f32.mrf.mxu0 }
 0x32f   : > { %v11058_v57 = vadd.f32 %v8831_v25, %v4904_v31  ;;  %v4902_v12 = vadd.f32 %v4835_v8, %v10974_v50 }
 0x330   : > { %v8784_v38 = vpop.f32.mrf.mxu1  ;;  %v5221_v52 = vpop.f32.mrf.mxu0 }
 0x331   : > { %v11061_v4 = vadd.f32 %v5205_v9, %v4902_v12  ;;  %v4905_v40 = vadd.f32 %v8784_v38, %v10976_v10 }
 0x332   : > { %v4838_v45 = vpop.f32.mrf.mxu1  ;;  %v8836_v6 = vpop.f32.mrf.mxu0 }
 0x333   : > { %v11064_v15 = vadd.f32 %v8832_v60, %v4905_v40  ;;  %v4903_v61 = vadd.f32 %v4838_v45, %v10978_v58 }
 0x334   : > { %v8787_v29 = vpop.f32.mrf.mxu1  ;;  %9074 = vmatmul.mubr.bf16.gmra.mxu1 %v6841_v51  ;;  %v5224_v25 = vpop.f32.mrf.mxu0 }
 0x335   : > { %v11067_v16 = vadd.f32 %v5208_v35, %v4903_v61  ;;  %v4908_v50 = vadd.f32 %v8787_v29, %v10980_v55  ;;  %9077 = vmatprep.mubr.bf16.mxu1 %v10895_v22 }
 0x336   : > { %v4851_v41 = vpop.f32.mrf.mxu1  ;;  %v8839_v10 = vpop.f32.mrf.mxu0 }
 0x337   : > { %v11071_v37 = vadd.f32 %v8835_v39, %v4908_v50  ;;  %v4906_v9 = vadd.f32 %v4851_v41, %v10983_v19 }
 0x338   : > { %v8788_v62 = vpop.f32.mrf.mxu1  ;;  %v5237_v58 = vpop.f32.mrf.mxu0 }
 0x339   : > { %v11074_v56 = vadd.f32 %v5221_v52, %v4906_v9  ;;  %v4909_v60 = vadd.f32 %v8788_v62, %v10985_v28 }
 0x33a   : > { %v4854_v20 = vpop.f32.mrf.mxu1  ;;  %v8840_v47 = vpop.f32.mrf.mxu0 }
 0x33b   : > { %v11077_v55 = vadd.f32 %v8836_v6, %v4909_v60  ;;  %v4907_v22 = vadd.f32 %v4854_v20, %v10987_v5 }
 0x33c   : > { %v8791_v21 = vpop.f32.mrf.mxu1  ;;  %9078 = vmatmul.mubr.bf16.gmra.mxu1 %v6843_v30  ;;  %v5240_v35 = vpop.f32.mrf.mxu0 }
 0x33d   : > { %v11080_v31 = vadd.f32 %v5224_v25, %v4907_v22  ;;  %v4912_v19 = vadd.f32 %v8791_v21, %v10989_v53 }
 0x33e   : > { %v4867_v8 = vpop.f32.mrf.mxu1  ;;  %v11083_v39 = vpop.f32.mrf.mxu0 }
 0x33f   : > { %v11085_v12 = vadd.f32 %v8839_v10, %v4912_v19  ;;  %v4910_v28 = vadd.f32 %v4867_v8, %v10991_v59 }
 0x340   : > { %v8792_v43 = vpop.f32.mrf.mxu1  ;;  %v11088_v14 = vpop.f32.mrf.mxu0 }
 0x341   : > { %v11090_v38 = vadd.f32 %v5237_v58, %v4910_v28  ;;  %v4913_v5 = vadd.f32 %v8792_v43, %v10993_v27 }
 0x342   : > { %v4870_v52 = vpop.f32.mrf.mxu1  ;;  %v11093_v40 = vpop.f32.mrf.mxu0 }
 0x343   : > { %v11095_v45 = vadd.f32 %v8840_v47, %v4913_v5  ;;  %v4911_v53 = vadd.f32 %v4870_v52, %v10995_v3 }
 0x344   : > { %v8859_v51 = vpop.f32.mrf.mxu1  ;;  %v11098_v6 = vpop.f32.mrf.mxu0 }
 0x345   : > { %v11100_v61 = vadd.f32 %v5240_v35, %v4911_v53  ;;  %v11103_v59 = vadd.f32 %v8859_v51, %v10998_v1 }
 0x346   : > { %v5495_v29 = vpop.f32.mrf.mxu1  ;;  %v11105_v25 = vpop.f32.mrf.mxu0 }
 0x347   : > { %v11108_v27 = vadd.f32 %v5495_v29, %v11001_v0 }
 0x348   : > { %v8860_v50 = vpop.f32.mrf.mxu1  ;;  %v11110_v44 = vpop.f32.mrf.mxu0 }
 0x349   : > { %v11113_v24 = vadd.f32 %v8860_v50, %v11004_v18 }
 0x34a   : > { %v5498_v3 = vpop.f32.mrf.mxu1  ;;  %v11115_v41 = vpop.f32.mrf.mxu0 }
 0x34b   : > { %v11118_v10 = vadd.f32 %v5498_v3, %v11007_v34 }
 0x34c   : > { %v8863_v1 = vpop.f32.mrf.mxu1  ;;  %v11120_v9 = vpop.f32.mrf.mxu0 }
 0x34d   : > { %v11123_v62 = vadd.f32 %v8863_v1, %v11010_v54 }
 0x34e   : > { %v5511_v0 = vpop.f32.mrf.mxu1  ;;  %v11125_v30 = vpop.f32.mrf.mxu0 }
 0x34f   : > { %v11128_v58 = vadd.f32 %v5511_v0, %v11013_v49 }
 0x350   : > { %v8864_v18 = vpop.f32.mrf.mxu1  ;;  %v11130_v60 = vpop.f32.mrf.mxu0 }
 0x351   : > { %v11133_v20 = vadd.f32 %v8864_v18, %v11016_v48 }
 0x352   : > { %v5514_v34 = vpop.f32.mrf.mxu1  ;;  %v11135_v47 = vpop.f32.mrf.mxu0 }
 0x353   : > { %v11138_v22 = vadd.f32 %v5514_v34, %v11019_v63 }
 0x354   : > { %v8867_v54 = vpop.f32.mrf.mxu1  ;;  %v11140_v21 = vpop.f32.mrf.mxu0 }
 0x355   : > { %v11143_v35 = vadd.f32 %v8867_v54, %v11022_v23 }
 0x356   : > { %v5527_v49 = vpop.f32.mrf.mxu1  ;;  %v11145_v19 = vpop.f32.mrf.mxu0 }
 0x357   : > { %v11148_v8 = vadd.f32 %v5527_v49, %v11025_v32 }
 0x358   : > { %v8868_v48 = vpop.f32.mrf.mxu1  ;;  %v11150_v28 = vpop.f32.mrf.mxu0 }
 0x359   : > { %v11153_v43 = vadd.f32 %v8868_v48, %v11028_v17 }
 0x35a   : > { %v5530_v63 = vpop.f32.mrf.mxu1  ;;  %v11155_v5 = vpop.f32.mrf.mxu0 }
 0x35b   : > { %11706 = vst [vmem:[#allocation6_spill] sm:$0xff] %v11155_v5  ;;  %v11158_v52 = vadd.f32 %v5530_v63, %v11031_v26 }
 0x35c   : > { %v8871_v23 = vpop.f32.mrf.mxu1  ;;  %v11160_v53 = vpop.f32.mrf.mxu0 }
 0x35d   : > { %11707 = vst [vmem:[#allocation61_spill] sm:$0xff] %v11160_v53  ;;  %v11163_v51 = vadd.f32 %v8871_v23, %v11034_v46 }
 0x35e   : > { %v5543_v32 = vpop.f32.mrf.mxu1  ;;  %v11165_v29 = vpop.f32.mrf.mxu0 }
 0x35f   : > { %11708 = vst [vmem:[#allocation57_spill] sm:$0xff] %v11165_v29  ;;  %v11168_v50 = vadd.f32 %v5543_v32, %v11037_v2 }
 0x360   : > { %v8872_v17 = vpop.f32.mrf.mxu1  ;;  %v11170_v3 = vpop.f32.mrf.mxu0 }
 0x361   : > { %11709 = vst [vmem:[#allocation4_spill] sm:$0xff] %v11170_v3  ;;  %v11173_v1 = vadd.f32 %v8872_v17, %v11040_v36 }
 0x362   : > { %v5546_v26 = vpop.f32.mrf.mxu1  ;;  %v11175_v0 = vpop.f32.mrf.mxu0 }
 0x363   : > { %11710 = vst [vmem:[#allocation5_spill] sm:$0xff] %v11175_v0  ;;  %v11178_v18 = vadd.f32 %v5546_v26, %v11043_v11 }
 0x364   : > { %v8875_v46 = vpop.f32.mrf.mxu1  ;;  %v11180_v34 = vpop.f32.mrf.mxu0 }
 0x365   : > { %11711 = vst [vmem:[#allocation8_spill] sm:$0xff] %v11178_v18  ;;  %11712 = vst [vmem:[#allocation14_spill] sm:$0xff] %v11180_v34  ;;  %v11183_v54 = vadd.f32 %v8875_v46, %v11046_v33 }
 0x366   : > { %v5559_v2 = vpop.f32.mrf.mxu1  ;;  %v11185_v49 = vpop.f32.mrf.mxu0 }
 0x367   : > { %11713 = vst [vmem:[#allocation64_spill] sm:$0xff] %v11183_v54  ;;  %11714 = vst [vmem:[#allocation58_spill] sm:$0xff] %v11185_v49  ;;  %v11188_v48 = vadd.f32 %v5559_v2, %v11049_v13 }
 0x368   : > { %v8876_v36 = vpop.f32.mrf.mxu1  ;;  %v11190_v63 = vpop.f32.mrf.mxu0 }
 0x369   : > { %11715 = vst [vmem:[#allocation7_spill] sm:$0xff] %v11188_v48  ;;  %11716 = vst [vmem:[#allocation15_spill] sm:$0xff] %v11190_v63  ;;  %v11193_v23 = vadd.f32 %v8876_v36, %v11052_v7 }
 0x36a   : > { %v5562_v11 = vpop.f32.mrf.mxu1  ;;  %v11195_v32 = vpop.f32.mrf.mxu0 }
 0x36b   : > { %11717 = vst [vmem:[#allocation16_spill] sm:$0xff] %v11193_v23  ;;  %11718 = vst [vmem:[#allocation59_spill] sm:$0xff] %v11195_v32  ;;  %v11198_v17 = vadd.f32 %v5562_v11, %v11055_v42 }
 0x36c   : > { %v8879_v33 = vpop.f32.mrf.mxu1  ;;  %v11200_v26 = vpop.f32.mrf.mxu0 }
 0x36d   : > { %11719 = vst [vmem:[#allocation40_spill] sm:$0xff] %v11198_v17  ;;  %11720 = vst [vmem:[#allocation67_spill] sm:$0xff] %v11200_v26  ;;  %v11203_v46 = vadd.f32 %v8879_v33, %v11058_v57 }
 0x36e   : > { %v5575_v13 = vpop.f32.mrf.mxu1  ;;  %v11205_v2 = vpop.f32.mrf.mxu0 }
 0x36f   : > { %11721 = vst [vmem:[#allocation9_spill] sm:$0xff] %v11203_v46  ;;  %11722 = vst [vmem:[#allocation17_spill] sm:$0xff] %v11205_v2  ;;  %v11208_v63 = vadd.f32 %v5575_v13, %v11061_v4 }
 0x370   : > { %v8880_v7 = vpop.f32.mrf.mxu1  ;;  %v11210_v36 = vpop.f32.mrf.mxu0 }
 0x371   : > { %11723 = vst [vmem:[#allocation18_spill] sm:$0xff] %v11208_v63  ;;  %11724 = vst [vmem:[#allocation22_spill] sm:$0xff] %v11210_v36  ;;  %v11213_v32 = vadd.f32 %v8880_v7, %v11064_v15 }
 0x372   : > { %v5578_v42 = vpop.f32.mrf.mxu1  ;;  %v11215_v11 = vpop.f32.mrf.mxu0 }
 0x373   : > { %11725 = vst [vmem:[#allocation60_spill] sm:$0xff] %v11213_v32  ;;  %11726 = vst [vmem:[#allocation70_spill] sm:$0xff] %v11215_v11  ;;  %v11218_v26 = vadd.f32 %v5578_v42, %v11067_v16 }
 0x374   : > { %v8883_v57 = vpop.f32.mrf.mxu1  ;;  %v11220_v33 = vpop.f32.mrf.mxu0 }
 0x375   : > { %11727 = vst [vmem:[#allocation19_spill] sm:$0xff] %v11218_v26  ;;  %11728 = vst [vmem:[#allocation20_spill] sm:$0xff] %v11220_v33  ;;  %v11223_v2 = vadd.f32 %v8883_v57, %v11071_v37 }
 0x376   : > { %v5591_v4 = vpop.f32.mrf.mxu1  ;;  %v11225_v13 = vpop.f32.mrf.mxu0 }
 0x377   : > { %11729 = vst [vmem:[#allocation62_spill] sm:$0xff] %v11223_v2  ;;  %11730 = vst [vmem:[#allocation23_spill] sm:$0xff] %v11225_v13  ;;  %v11228_v36 = vadd.f32 %v5591_v4, %v11074_v56 }
 0x378   : > { %v8884_v15 = vpop.f32.mrf.mxu1  ;;  %v11230_v7 = vpop.f32.mrf.mxu0 }
 0x379   : > { %11731 = vst [vmem:[#allocation75_spill] sm:$0xff] %v11228_v36  ;;  %11732 = vst [vmem:[#allocation63_spill] sm:$0xff] %v11230_v7  ;;  %v11233_v11 = vadd.f32 %v8884_v15, %v11077_v55 }
 0x37a   : > { %v5594_v16 = vpop.f32.mrf.mxu1  ;;  %v11238_v26 = vpop.f32.mrf.mxu0 }
 0x37b   : > { %11733 = vst [vmem:[#allocation10_spill] sm:$0xff] %v11233_v11  ;;  %v11236_v42 = vadd.f32 %v5594_v16, %v11080_v31  ;;  %11735 = vst [vmem:[#allocation25_spill] sm:$0xff] %v11238_v26 }
 0x37c   : > { %v8887_v33 = vpop.f32.mrf.mxu1  ;;  %v11246_v13 = vpop.f32.mrf.mxu0 }
 0x37d   : > { %11734 = vst [vmem:[#allocation24_spill] sm:$0xff] %v11236_v42  ;;  %v11241_v37 = vadd.f32 %v8887_v33, %v11085_v12  ;;  %11738 = vst [vmem:[#allocation78_spill] sm:$0xff] %v11246_v13 }
 0x37e   : > { %v5607_v57 = vpop.f32.mrf.mxu1  ;;  %v9003_v7 = vpop.f32.mrf.mxu0 }
 0x37f   : > { %11736 = vst [vmem:[#allocation65_spill] sm:$0xff] %v11241_v37  ;;  %v11244_v56 = vadd.f32 %v5607_v57, %v11090_v38 }
 0x380   : > { %v8888_v4 = vpop.f32.mrf.mxu1  ;;  %v6605_v42 = vpop.f32.mrf.mxu0 }
 0x381   : > { %11737 = vst [vmem:[#allocation21_spill] sm:$0xff] %v11244_v56  ;;  %v11249_v55 = vadd.f32 %v8888_v4, %v11095_v45 }
 0x382   : > { %v5610_v15 = vpop.f32.mrf.mxu1  ;;  %v9004_v37 = vpop.f32.mrf.mxu0 }
 0x383   : > { %11739 = vst [vmem:[#allocation26_spill] sm:$0xff] %v11249_v55  ;;  %v11252_v31 = vadd.f32 %v5610_v15, %v11100_v61 }
 0x384   : > { %v8955_v16 = vpop.f32.mrf.mxu1  ;;  %v11254_v57 = vpop.f32.mrf.mxu0 }
 0x385   : > { %11740 = vst [vmem:[#allocation27_spill] sm:$0xff] %v11252_v31 }
 0x386   : > { %v6235_v26 = vpop.f32.mrf.mxu1  ;;  %v11260_v45 = vpop.f32.mrf.mxu0 }
 0x388   : > { %v8956_v12 = vpop.f32.mrf.mxu1  ;;  %v11266_v15 = vpop.f32.mrf.mxu0 }
 0x38a   : > { %v6238_v33 = vpop.f32.mrf.mxu1  ;;  %v11272_v36 = vpop.f32.mrf.mxu0 }
 0x38c   : > { %v8959_v11 = vpop.f32.mrf.mxu1  ;;  %v11278_v63 = vpop.f32.mrf.mxu0 }
 0x38e   : > { %v6251_v38 = vpop.f32.mrf.mxu1  ;;  %v11284_v34 = vpop.f32.mrf.mxu0 }
 0x390   : > { %v11256_v56 = vpop.f32.mrf.mxu1  ;;  %v11290_v23 = vpop.f32.mrf.mxu0 }
 0x392   : > { %v11258_v13 = vpop.f32.mrf.mxu1  ;;  %v11296_v29 = vpop.f32.mrf.mxu0 }
 0x394   : > { %v11262_v4 = vpop.f32.mrf.mxu1 }
 0x396   : > { %v11264_v61 = vpop.f32.mrf.mxu1 }
 0x398   : > { %v11268_v31 = vpop.f32.mrf.mxu1 }
 0x39a   : > { %v11270_v55 = vpop.f32.mrf.mxu1 }
 0x39c   : > { %v11274_v2 = vpop.f32.mrf.mxu1 }
 0x39e   : > { %v11276_v32 = vpop.f32.mrf.mxu1 }
 0x39f   : > { %11741 = vst [vmem:[#allocation30_spill] sm:$0xff] %v11276_v32 }
 0x3a0   : > { %v11280_v49 = vpop.f32.mrf.mxu1 }
 0x3a1   : > { %11742 = vst [vmem:[#allocation66_spill] sm:$0xff] %v11280_v49  ;;  %v11302_v49 = vpop.f32.mrf.mxu0 }
 0x3a2   : > { %v11282_v46 = vpop.f32.mrf.mxu1 }
 0x3a3   : > { %11743 = vst [vmem:[#allocation81_spill] sm:$0xff] %v11282_v46 }
 0x3a4   : > { %v11286_v17 = vpop.f32.mrf.mxu1 }
 0x3a5   : > { %11744 = vst [vmem:[#allocation28_spill] sm:$0xff] %v11286_v17  ;;  %v11308_v17 = vpop.f32.mrf.mxu0 }
 0x3a6   : > { %v11288_v0 = vpop.f32.mrf.mxu1  ;;  %11752 = vst [vmem:[#allocation71_spill] sm:$0xff] %v11308_v17 }
 0x3a7   : > { %11745 = vst [vmem:[#allocation29_spill] sm:$0xff] %v11288_v0 }
 0x3a8   : > { %v11292_v3 = vpop.f32.mrf.mxu1 }
 0x3a9   : > { %11746 = vst [vmem:[#allocation68_spill] sm:$0xff] %v11292_v3  ;;  %v11314_v3 = vpop.f32.mrf.mxu0 }
 0x3aa   : > { %v11294_v48 = vpop.f32.mrf.mxu1  ;;  %11755 = vst [vmem:[#allocation38_spill] sm:$0xff] %v11314_v3 }
 0x3ab   : > { %11747 = vst [vmem:[#allocation31_spill] sm:$0xff] %v11294_v48 }
 0x3ac   : > { %v11298_v54 = vpop.f32.mrf.mxu1 }
 0x3ad   : > { %11748 = vst [vmem:[#allocation69_spill] sm:$0xff] %v11298_v54  ;;  %v11320_v54 = vpop.f32.mrf.mxu0 }
 0x3ae   : > { %v11300_v53 = vpop.f32.mrf.mxu1  ;;  %11758 = vst [vmem:[#allocation37_spill] sm:$0xff] %v11320_v54 }
 0x3af   : > { %11749 = vst [vmem:[#allocation11_spill] sm:$0xff] %v11300_v53 }
 0x3b0   : > { %v11304_v46 = vpop.f32.mrf.mxu1 }
 0x3b1   : > { %11750 = vst [vmem:[#allocation32_spill] sm:$0xff] %v11304_v46  ;;  %v5994_v46 = vadd.f32 %v11083_v39, %v11103_v59 }
 0x3b2   : > { %v11306_v18 = vpop.f32.mrf.mxu1 }
 0x3b3   : > { %11751 = vst [vmem:[#allocation33_spill] sm:$0xff] %v11306_v18  ;;  %v6364_v17 = vadd.f32 %v8955_v16, %v5994_v46  ;;  %v11347_v46 = vld [vmem:[%s11540_s2 + $0x1] ss:$0 sm:$0xff] }
 0x3b4   : > { %v11310_v0 = vpop.f32.mrf.mxu1 }
 0x3b5   : > { %11753 = vst [vmem:[#allocation34_spill] sm:$0xff] %v11310_v0  ;;  %v5992_v0 = vadd.f32 %v11088_v14, %v11108_v27  ;;  %v6734_v39 = vadd.f32 %v9003_v7, %v6364_v17 }
 0x3b6   : > { %v11312_v32 = vpop.f32.mrf.mxu1 }
 0x3b7   : > { %11754 = vst [vmem:[#allocation35_spill] sm:$0xff] %v11312_v32  ;;  %v11330_v32 = vpop.f32.mrf.mxu0 }
 0x3b8   : > { %v11316_v48 = vpop.f32.mrf.mxu1 }
 0x3b9   : > { %11756 = vst [vmem:[#allocation72_spill] sm:$0xff] %v11316_v48  ;;  %v6362_v48 = vadd.f32 %v6235_v26, %v5992_v0  ;;  %v11342_v14 = vpop.f32.mrf.mxu0  ;;  %v5999_v26 = vadd.f32 %v11115_v41, %v11133_v20  ;;  %v5997_v41 = vadd.f32 %v11120_v9, %v11138_v22 }
 0x3ba   : > { %v11318_v5 = vpop.f32.mrf.mxu1 }
 0x3bb   : > { %11757 = vst [vmem:[#allocation36_spill] sm:$0xff] %v11318_v5  ;;  %v5995_v5 = vadd.f32 %v11093_v40, %v11113_v24  ;;  %v6732_v40 = vadd.f32 %v6605_v42, %v6362_v48  ;;  %v11354_v16 = vpop.f32.mrf.mxu0  ;;  %v6369_v42 = vadd.f32 %v11256_v56, %v5999_v26  ;;  %v6367_v9 = vadd.f32 %v11258_v13, %v5997_v41  ;;  %v11761_v41 = vld [vmem:[#allocation6_spill] sm:$0xff] }
 0x3bc   : > { %v11322_v53 = vpop.f32.mrf.mxu1  ;;  %v6006_v26 = vadd.f32 %v11145_v19, %v11163_v51 }
 0x3bd   : > { %11759 = vst [vmem:[#allocation73_spill] sm:$0xff] %v11322_v53  ;;  %v5993_v53 = vadd.f32 %v11098_v6, %v11118_v10  ;;  %v6365_v59 = vadd.f32 %v8956_v12, %v5995_v5  ;;  %v5996_v6 = vadd.f32 %v11110_v44, %v11128_v58 }
 0x3be   : > { %v11326_v18 = vpop.f32.mrf.mxu1 }
 0x3bf   : > { %11760 = vst [vmem:[#allocation39_spill] sm:$0xff] %v11326_v18  ;;  %v5998_v18 = vadd.f32 %v11105_v25, %v11123_v62  ;;  %v6363_v24 = vadd.f32 %v6238_v33, %v5993_v53  ;;  %v6735_v17 = vadd.f32 %v9004_v37, %v6365_v59  ;;  %v6366_v7 = vadd.f32 %v6251_v38, %v5996_v6 }
 0x3c0   : > { %v11332_v3 = vpop.f32.mrf.mxu1  ;;  %v6002_v38 = vadd.f32 %v11125_v30, %v11143_v35  ;;  %v6739_v30 = vadd.f32 %v11272_v36, %v6369_v42 }
 0x3c1   : > { %v6368_v10 = vadd.f32 %v8959_v11, %v5998_v18  ;;  %v6733_v58 = vadd.f32 %v11254_v57, %v6363_v24  ;;  %v6736_v57 = vadd.f32 %v11266_v15, %v6366_v7 }
 0x3c2   : > { %v11336_v54 = vpop.f32.mrf.mxu1 }
 0x3c3   : > { %v6738_v20 = vadd.f32 %v11260_v45, %v6368_v10 }
 0x3c4   : > { %v9051_v27 = vpop.f32.mrf.mxu1 }
 0x3c5   : > { %v7104_v0 = vadd.f32 %v9051_v27, %v6734_v39  ;;  %v11374_v39 = vpop.f32.mrf.mxu0  ;;  %v6000_v27 = vadd.f32 %v11130_v60, %v11148_v8  ;;  %v6737_v60 = vadd.f32 %v11278_v63, %v6367_v9 }
 0x3c6   : > { %v6975_v5 = vpop.f32.mrf.mxu1 }
 0x3c7   : > { %v7205_v25 = vadd.f32 %v11347_v46, %v7104_v0  ;;  %v7102_v62 = vadd.f32 %v6975_v5, %v6732_v40  ;;  %v6372_v40 = vadd.f32 %v11262_v4, %v6002_v38  ;;  %v6003_v0 = vadd.f32 %v11135_v47, %v11153_v43  ;;  %v11388_v10 = vpop.f32.mrf.mxu0  ;;  %v11764_v38 = vld [vmem:[#allocation61_spill] sm:$0xff] }
 0x3c8   : > { %v9052_v44 = vpop.f32.mrf.mxu1  ;;  %v6370_v6 = vadd.f32 %v11264_v61, %v6000_v27 }
 0x3c9   : > { %v7237_v53 = vmax.f32 %v7205_v25, 0.0  ;;  %v7203_v18 = vadd.f32 %v11347_v46, %v7102_v62  ;;  %v7105_v48 = vadd.f32 %v9052_v44, %v6735_v17  ;;  %v6001_v17 = vadd.f32 %v11140_v21, %v11158_v52  ;;  %v11402_v44 = vpop.f32.mrf.mxu0 }
 0x3ca   : > { %v6978_v11 = vpop.f32.mrf.mxu1  ;;  %v6742_v25 = vadd.f32 %v11284_v34, %v6372_v40  ;;  %v6373_v47 = vadd.f32 %v11268_v31, %v6003_v0  ;;  %v6740_v7 = vadd.f32 %v11290_v23, %v6370_v6  ;;  %v11767_v40 = vld [vmem:[#allocation64_spill] sm:$0xff]  ;;  %v11770_v6 = vld [vmem:[#allocation81_spill] sm:$0xff] }
 0x3cb   : > { %7269 = vst [vmem:[%s11361_s24 + $0x10] sm:$0xff] %v7237_v53  ;;  %v7235_v37 = vmax.f32 %v7203_v18, 0.0  ;;  %v7206_v12 = vadd.f32 %v11347_v46, %v7105_v48  ;;  %v7103_v33 = vadd.f32 %v6978_v11, %v6733_v58  ;;  %v6371_v21 = vadd.f32 %v11270_v55, %v6001_v17  ;;  %v11762_v11 = vld [vmem:[#allocation30_spill] sm:$0xff]  ;;  %v11772_v17 = vld [vmem:[#allocation4_spill] sm:$0xff] }
 0x3cc   : > { %v9055_v59 = vpop.f32.mrf.mxu1  ;;  %v6004_v53 = vadd.f32 %v11150_v28, %v11168_v50  ;;  %v6376_v18 = vadd.f32 %v11274_v2, %v6006_v26  ;;  %v6743_v19 = vadd.f32 %v11296_v29, %v6373_v47 }
 0x3cd   : > { %7267 = vst [vmem:[%s11361_s24] sm:$0xff] %v7235_v37  ;;  %v7238_v22 = vmax.f32 %v7206_v12, 0.0  ;;  %v7204_v56 = vadd.f32 %v11347_v46, %v7103_v33  ;;  %v7108_v45 = vadd.f32 %v9055_v59, %v6738_v20  ;;  %v6007_v20 = vadd.f32 %v11761_v41, %v11173_v1  ;;  %v11416_v37 = vpop.f32.mrf.mxu0  ;;  %v11763_v33 = vld [vmem:[#allocation8_spill] sm:$0xff]  ;;  %v11765_v59 = vld [vmem:[#allocation71_spill] sm:$0xff]  ;;  %v11766_v1 = vld [vmem:[#allocation66_spill] sm:$0xff] }
 0x3ce   : > { %v6991_v24 = vpop.f32.mrf.mxu1  ;;  %v6374_v42 = vadd.f32 %v11762_v11, %v6004_v53  ;;  %v6741_v28 = vadd.f32 %v11302_v49, %v6371_v21  ;;  %v6746_v9 = vadd.f32 %v11765_v59, %v6376_v18  ;;  %v11775_v21 = vld [vmem:[#allocation16_spill] sm:$0xff] }
 0x3cf   : > { %7270 = vst [vmem:[%s11361_s24 + $0x18] sm:$0xff] %v7238_v22  ;;  %v7236_v35 = vmax.f32 %v7204_v56, 0.0  ;;  %v7209_v15 = vadd.f32 %v11347_v46, %v7108_v45  ;;  %v7106_v13 = vadd.f32 %v6991_v24, %v6736_v57  ;;  %v6005_v57 = vadd.f32 %v11764_v38, %v11763_v33  ;;  %v11768_v24 = vld [vmem:[#allocation57_spill] sm:$0xff]  ;;  %v11778_v41 = vld [vmem:[#allocation40_spill] sm:$0xff]  ;;  %v11782_v38 = vld [vmem:[#allocation58_spill] sm:$0xff] }
 0x3d0   : > { %v9056_v5 = vpop.f32.mrf.mxu1  ;;  %v6377_v56 = vadd.f32 %v11766_v1, %v6007_v20  ;;  %v11779_v20 = vld [vmem:[#allocation14_spill] sm:$0xff]  ;;  %v11781_v33 = vld [vmem:[#allocation9_spill] sm:$0xff]  ;;  %v11783_v1 = vld [vmem:[#allocation31_spill] sm:$0xff] }
 0x3d1   : > { %7268 = vst [vmem:[%s11361_s24 + $0x8] sm:$0xff] %v7236_v35  ;;  %v7241_v8 = vmax.f32 %v7209_v15, 0.0  ;;  %v7207_v36 = vadd.f32 %v11347_v46, %v7106_v13  ;;  %v7109_v4 = vadd.f32 %v9056_v5, %v6739_v30  ;;  %v6010_v30 = vadd.f32 %v11768_v24, %v11767_v40  ;;  %v11769_v35 = vld [vmem:[#allocation38_spill] sm:$0xff]  ;;  %v11430_v13 = vpop.f32.mrf.mxu0  ;;  %v11785_v40 = vld [vmem:[#allocation15_spill] sm:$0xff] }
 0x3d2   : > { %v6994_v62 = vpop.f32.mrf.mxu1  ;;  %v6744_v15 = vadd.f32 %v11769_v35, %v6374_v42  ;;  %v6375_v5 = vadd.f32 %v11770_v6, %v6005_v57  ;;  %v6009_v11 = vadd.f32 %v11779_v20, %v11778_v41  ;;  %v6014_v57 = vadd.f32 %v11782_v38, %v11781_v33  ;;  %v11795_v20 = vld [vmem:[#allocation33_spill] sm:$0xff] }
 0x3d3   : > { %7273 = vst [vmem:[%s11361_s24 + $0x30] sm:$0xff] %v7241_v8  ;;  %v7239_v43 = vmax.f32 %v7207_v36, 0.0  ;;  %v7210_v61 = vadd.f32 %v11347_v46, %v7109_v4  ;;  %v7107_v63 = vadd.f32 %v6994_v62, %v6737_v60  ;;  %v11771_v4 = vld [vmem:[#allocation7_spill] sm:$0xff]  ;;  %v11773_v62 = vld [vmem:[#allocation28_spill] sm:$0xff]  ;;  %v11444_v18 = vpop.f32.mrf.mxu0 }
 0x3d4   : > { %v9059_v58 = vpop.f32.mrf.mxu1  ;;  %v6380_v47 = vadd.f32 %v11773_v62, %v6010_v30  ;;  %v11786_v30 = vld [vmem:[#allocation69_spill] sm:$0xff] }
 0x3d5   : > { %7271 = vst [vmem:[%s11361_s24 + $0x20] sm:$0xff] %v7239_v43  ;;  %v7242_v52 = vmax.f32 %v7210_v61, 0.0  ;;  %v7208_v34 = vadd.f32 %v11347_v46, %v7107_v63  ;;  %v7112_v31 = vadd.f32 %v9059_v58, %v6742_v25  ;;  %v6008_v25 = vadd.f32 %v11772_v17, %v11771_v4  ;;  %v11774_v61 = vld [vmem:[#allocation37_spill] sm:$0xff]  ;;  %v11789_v4 = vld [vmem:[#allocation11_spill] sm:$0xff] }
 0x3d6   : > { %v7007_v48 = vpop.f32.mrf.mxu1  ;;  %v6747_v63 = vadd.f32 %v11774_v61, %v6377_v56  ;;  %v6750_v42 = vadd.f32 %v11342_v14, %v6380_v47  ;;  %v6379_v56 = vadd.f32 %v11783_v1, %v6009_v11  ;;  %v6384_v35 = vadd.f32 %v11786_v30, %v6014_v57  ;;  %v11800_v1 = vld [vmem:[#allocation70_spill] sm:$0xff] }
 0x3d7   : > { %7274 = vst [vmem:[%s11361_s24 + $0x38] sm:$0xff] %v7242_v52  ;;  %v7240_v51 = vmax.f32 %v7208_v34, 0.0  ;;  %v7213_v23 = vadd.f32 %v11347_v46, %v7112_v31  ;;  %v7110_v55 = vadd.f32 %v7007_v48, %v6740_v7  ;;  %v11776_v52 = vld [vmem:[#allocation5_spill] sm:$0xff] }
 0x3d8   : > { %v9060_v12 = vpop.f32.mrf.mxu1  ;;  %v6011_v34 = vadd.f32 %v11776_v52, %v11775_v21  ;;  %v11777_v31 = vld [vmem:[#allocation29_spill] sm:$0xff]  ;;  %v6749_v47 = vadd.f32 %v11388_v10, %v6379_v56  ;;  %v11792_v52 = vld [vmem:[#allocation32_spill] sm:$0xff] }
 0x3d9   : > { %7272 = vst [vmem:[%s11361_s24 + $0x28] sm:$0xff] %v7240_v51  ;;  %v7245_v50 = vmax.f32 %v7213_v23, 0.0  ;;  %v7211_v29 = vadd.f32 %v11347_v46, %v7110_v55  ;;  %v7113_v2 = vadd.f32 %v9060_v12, %v6743_v19  ;;  %v6378_v53 = vadd.f32 %v11777_v31, %v6008_v25 }
 0x3da   : > { %v7010_v22 = vpop.f32.mrf.mxu1  ;;  %v6745_v19 = vadd.f32 %v11330_v32, %v6375_v5 }
 0x3db   : > { %7277 = vst [vmem:[%s11361_s24 + $0x50] sm:$0xff] %v7245_v50  ;;  %v7243_v45 = vmax.f32 %v7211_v29, 0.0  ;;  %v7214_v27 = vadd.f32 %v11347_v46, %v7113_v2  ;;  %v7111_v49 = vadd.f32 %v7010_v22, %v6741_v28  ;;  %v11780_v28 = vld [vmem:[#allocation68_spill] sm:$0xff]  ;;  %v6748_v59 = vadd.f32 %v11354_v16, %v6378_v53 }
 0x3dc   : > { %v9063_v0 = vpop.f32.mrf.mxu1  ;;  %v6381_v50 = vadd.f32 %v11780_v28, %v6011_v34  ;;  %v11796_v28 = vld [vmem:[#allocation75_spill] sm:$0xff] }
 0x3dd   : > { %7275 = vst [vmem:[%s11361_s24 + $0x40] sm:$0xff] %v7243_v45  ;;  %v7246_v60 = vmax.f32 %v7214_v27, 0.0  ;;  %v7212_v8 = vadd.f32 %v11347_v46, %v7111_v49  ;;  %v7116_v36 = vadd.f32 %v9063_v0, %v6746_v9  ;;  %v9027_v9 = vpop.f32.mrf.mxu0  ;;  %v11784_v49 = vld [vmem:[#allocation18_spill] sm:$0xff] }
 0x3de   : > { %v7023_v43 = vpop.f32.mrf.mxu1  ;;  %v6012_v24 = vadd.f32 %v11785_v40, %v11784_v49  ;;  %v6751_v0 = vadd.f32 %v11374_v39, %v6381_v50  ;;  %v11797_v50 = vld [vmem:[#allocation22_spill] sm:$0xff] }
 0x3df   : > { %7278 = vst [vmem:[%s11361_s24 + $0x58] sm:$0xff] %v7246_v60  ;;  %v7244_v26 = vmax.f32 %v7212_v8, 0.0  ;;  %v7217_v7 = vadd.f32 %v11347_v46, %v7116_v36  ;;  %v7114_v58 = vadd.f32 %v7023_v43, %v6744_v15  ;;  %v11787_v60 = vld [vmem:[#allocation60_spill] sm:$0xff]  ;;  %v11788_v8 = vld [vmem:[#allocation59_spill] sm:$0xff]  ;;  %v6701_v25 = vpop.f32.mrf.mxu0 }
 0x3e0   : > { %v9064_v48 = vpop.f32.mrf.mxu1  ;;  %v6015_v36 = vadd.f32 %v11788_v8, %v11787_v60  ;;  %v6382_v17 = vadd.f32 %v11789_v4, %v6012_v24  ;;  %v11804_v60 = vld [vmem:[#allocation72_spill] sm:$0xff] }
 0x3e1   : > { %7276 = vst [vmem:[%s11361_s24 + $0x48] sm:$0xff] %v7244_v26  ;;  %v7249_v51 = vmax.f32 %v7217_v7, 0.0  ;;  %v7215_v23 = vadd.f32 %v11347_v46, %v7114_v58  ;;  %v7117_v55 = vadd.f32 %v9064_v48, %v6747_v63  ;;  %v11790_v63 = vld [vmem:[#allocation19_spill] sm:$0xff]  ;;  %v6754_v58 = vadd.f32 %v11402_v44, %v6384_v35  ;;  %v11793_v48 = vld [vmem:[#allocation62_spill] sm:$0xff]  ;;  %v11802_v35 = vld [vmem:[#allocation24_spill] sm:$0xff] }
 0x3e2   : > { %v7026_v12 = vpop.f32.mrf.mxu1  ;;  %v11791_v26 = vld [vmem:[#allocation67_spill] sm:$0xff]  ;;  %v6385_v34 = vadd.f32 %v11792_v52, %v6015_v36 }
 0x3e3   : > { %7281 = vst [vmem:[%s11361_s24 + $0x70] sm:$0xff] %v7249_v51  ;;  %v7247_v29 = vmax.f32 %v7215_v23, 0.0  ;;  %v7218_v2 = vadd.f32 %v11347_v46, %v7117_v55  ;;  %v7115_v32 = vadd.f32 %v7026_v12, %v6745_v19  ;;  %v6013_v7 = vadd.f32 %v11791_v26, %v11790_v63  ;;  %v11794_v19 = vld [vmem:[#allocation17_spill] sm:$0xff]  ;;  %v9028_v55 = vpop.f32.mrf.mxu0 }
 0x3e4   : > { %v9067_v22 = vpop.f32.mrf.mxu1  ;;  %v6018_v51 = vadd.f32 %v11794_v19, %v11793_v48  ;;  %v6752_v23 = vadd.f32 %v11416_v37, %v6382_v17  ;;  %v6755_v38 = vadd.f32 %v11430_v13, %v6385_v34  ;;  %v11805_v17 = vld [vmem:[#allocation65_spill] sm:$0xff] }
 0x3e5   : > { %7279 = vst [vmem:[%s11361_s24 + $0x60] sm:$0xff] %v7247_v29  ;;  %v7250_v14 = vmax.f32 %v7218_v2, 0.0  ;;  %v7216_v45 = vadd.f32 %v11347_v46, %v7115_v32  ;;  %v7120_v27 = vadd.f32 %v9067_v22, %v6750_v42  ;;  %v6383_v11 = vadd.f32 %v11795_v20, %v6013_v7  ;;  %v11798_v2 = vld [vmem:[#allocation34_spill] sm:$0xff]  ;;  %v11810_v34 = vld [vmem:[#allocation73_spill] sm:$0xff] }
 0x3e6   : > { %v7039_v15 = vpop.f32.mrf.mxu1  ;;  %v6016_v29 = vadd.f32 %v11797_v50, %v11796_v28  ;;  %v6388_v32 = vadd.f32 %v11798_v2, %v6018_v51  ;;  %v11799_v22 = vld [vmem:[#allocation10_spill] sm:$0xff] }
 0x3e7   : > { %7282 = vst [vmem:[%s11361_s24 + $0x78] sm:$0xff] %v7250_v14  ;;  %v7248_v16 = vmax.f32 %v7216_v45, 0.0  ;;  %v7221_v6 = vadd.f32 %v11347_v46, %v7120_v27  ;;  %v7118_v5 = vadd.f32 %v7039_v15, %v6748_v59  ;;  %v6019_v56 = vadd.f32 %v11800_v1, %v11799_v22  ;;  %v11801_v14 = vld [vmem:[#allocation35_spill] sm:$0xff]  ;;  %v6704_v27 = vpop.f32.mrf.mxu0  ;;  %v11803_v15 = vld [vmem:[#allocation20_spill] sm:$0xff]  ;;  %v11815_v2 = vld [vmem:[#allocation78_spill] sm:$0xff] }
 0x3e8   : > { %v9068_v62 = vpop.f32.mrf.mxu1  ;;  %v6386_v45 = vadd.f32 %v11801_v14, %v6016_v29  ;;  %v6753_v40 = vadd.f32 %v11444_v18, %v6383_v11  ;;  %v11813_v11 = vld [vmem:[#allocation39_spill] sm:$0xff] }
 0x3e9   : > { %7280 = vst [vmem:[%s11361_s24 + $0x68] sm:$0xff] %v7248_v16  ;;  %v7253_v43 = vmax.f32 %v7221_v6, 0.0  ;;  %v7219_v39 = vadd.f32 %v11347_v46, %v7118_v5  ;;  %v7121_v61 = vadd.f32 %v9068_v62, %v6751_v0  ;;  %v6017_v0 = vadd.f32 %v11803_v15, %v11802_v35  ;;  %v9031_v6 = vpop.f32.mrf.mxu0  ;;  %v11806_v62 = vld [vmem:[#allocation23_spill] sm:$0xff] }
 0x3ea   : > { %v7042_v21 = vpop.f32.mrf.mxu1  ;;  %v6758_v16 = vadd.f32 %v9027_v9, %v6388_v32  ;;  %v6389_v8 = vadd.f32 %v11804_v60, %v6019_v56 }
 0x3eb   : > { %7285 = vst [vmem:[%s11361_s24 + $0x90] sm:$0xff] %v7253_v43  ;;  %v7251_v31 = vmax.f32 %v7219_v39, 0.0  ;;  %v7222_v53 = vadd.f32 %v11347_v46, %v7121_v61  ;;  %v7119_v10 = vadd.f32 %v7042_v21, %v6749_v47  ;;  %v6022_v47 = vadd.f32 %v11806_v62, %v11805_v17  ;;  %v11807_v61 = vld [vmem:[#allocation36_spill] sm:$0xff]  ;;  %v11809_v21 = vld [vmem:[#allocation63_spill] sm:$0xff] }
 0x3ec   : > { %v9071_v41 = vpop.f32.mrf.mxu1  ;;  %v6756_v43 = vadd.f32 %v6701_v25, %v6386_v45  ;;  %v6387_v63 = vadd.f32 %v11807_v61, %v6017_v0  ;;  %v6759_v48 = vadd.f32 %v9028_v55, %v6389_v8  ;;  %v11814_v55 = vld [vmem:[#allocation27_spill] sm:$0xff] }
 0x3ed   : > { %7283 = vst [vmem:[%s11361_s24 + $0x80] sm:$0xff] %v7251_v31  ;;  %v7254_v44 = vmax.f32 %v7222_v53, 0.0  ;;  %v7220_v42 = vadd.f32 %v11347_v46, %v7119_v10  ;;  %v7124_v12 = vadd.f32 %v9071_v41, %v6754_v58  ;;  %v11808_v58 = vld [vmem:[#allocation21_spill] sm:$0xff]  ;;  %v6392_v31 = vadd.f32 %v11810_v34, %v6022_v47  ;;  %v6717_v53 = vpop.f32.mrf.mxu0 }
 0x3ee   : > { %v7055_v33 = vpop.f32.mrf.mxu1  ;;  %v6020_v52 = vadd.f32 %v11809_v21, %v11808_v58  ;;  %v11812_v41 = vld [vmem:[#allocation25_spill] sm:$0xff]  ;;  %v6021_v32 = vadd.f32 %v11815_v2, %v11814_v55 }
 0x3ef   : > { %7286 = vst [vmem:[%s11361_s24 + $0x98] sm:$0xff] %v7254_v44  ;;  %v7252_v37 = vmax.f32 %v7220_v42, 0.0  ;;  %v7225_v57 = vadd.f32 %v11347_v46, %v7124_v12  ;;  %v7122_v59 = vadd.f32 %v7055_v33, %v6752_v23  ;;  %v11811_v23 = vld [vmem:[#allocation26_spill] sm:$0xff]  ;;  %v6757_v12 = vadd.f32 %v6704_v27, %v6387_v63 }
 0x3f0   : > { %v9072_v49 = vpop.f32.mrf.mxu1  ;;  %v6023_v20 = vadd.f32 %v11812_v41, %v11811_v23  ;;  %v6390_v44 = vadd.f32 %v11813_v11, %v6020_v52  ;;  %v6762_v33 = vadd.f32 %v9031_v6, %v6392_v31  ;;  %v6391_v45 = vadd.f32 %v11336_v54, %v6021_v32 }
 0x3f1   : > { %7284 = vst [vmem:[%s11361_s24 + $0x88] sm:$0xff] %v7252_v37  ;;  %v7257_v24 = vmax.f32 %v7225_v57, 0.0  ;;  %v7223_v13 = vadd.f32 %v11347_v46, %v7122_v59  ;;  %v7125_v30 = vadd.f32 %v9072_v49, %v6755_v38  ;;  %v9032_v38 = vpop.f32.mrf.mxu0 }
 0x3f2   : > { %v7058_v5 = vpop.f32.mrf.mxu1  ;;  %v6393_v57 = vadd.f32 %v11332_v3, %v6023_v20  ;;  %v6760_v56 = vadd.f32 %v6717_v53, %v6390_v44 }
 0x3f3   : > { %7289 = vst [vmem:[%s11361_s24 + $0xb0] sm:$0xff] %v7257_v24  ;;  %v7255_v36 = vmax.f32 %v7223_v13, 0.0  ;;  %v7226_v4 = vadd.f32 %v11347_v46, %v7125_v30  ;;  %v7123_v18 = vadd.f32 %v7058_v5, %v6753_v40  ;;  %v6720_v24 = vpop.f32.mrf.mxu0 }
 0x3f4   : > { %v9075_v39 = vpop.f32.mrf.mxu1  ;;  %v6763_v30 = vadd.f32 %v9032_v38, %v6393_v57 }
 0x3f5   : > { %7287 = vst [vmem:[%s11361_s24 + $0xa0] sm:$0xff] %v7255_v36  ;;  %v7258_v26 = vmax.f32 %v7226_v4, 0.0  ;;  %v7224_v9 = vadd.f32 %v11347_v46, %v7123_v18  ;;  %v7128_v7 = vadd.f32 %v9075_v39, %v6758_v16  ;;  %v6761_v16 = vadd.f32 %v6720_v24, %v6391_v45 }
 0x3f6   : > { %v7071_v10 = vpop.f32.mrf.mxu1 }
 0x3f7   : > { %7290 = vst [vmem:[%s11361_s24 + $0xb8] sm:$0xff] %v7258_v26  ;;  %v7256_v19 = vmax.f32 %v7224_v9, 0.0  ;;  %v7229_v25 = vadd.f32 %v11347_v46, %v7128_v7  ;;  %v7126_v51 = vadd.f32 %v7071_v10, %v6756_v43 }
 0x3f8   : > { %v9076_v42 = vpop.f32.mrf.mxu1 }
 0x3f9   : > { %7288 = vst [vmem:[%s11361_s24 + $0xa8] sm:$0xff] %v7256_v19  ;;  %v7261_v28 = vmax.f32 %v7229_v25, 0.0  ;;  %v7227_v50 = vadd.f32 %v11347_v46, %v7126_v51  ;;  %v7129_v29 = vadd.f32 %v9076_v42, %v6759_v48 }
 0x3fa   : > { %v7074_v37 = vpop.f32.mrf.mxu1 }
 0x3fb   : > { %7293 = vst [vmem:[%s11361_s24 + $0xd0] sm:$0xff] %v7261_v28  ;;  %v7259_v59 = vmax.f32 %v7227_v50, 0.0  ;;  %v7230_v22 = vadd.f32 %v11347_v46, %v7129_v29  ;;  %v7127_v1 = vadd.f32 %v7074_v37, %v6757_v12 }
 0x3fc   : > { %v9079_v14 = vpop.f32.mrf.mxu1 }
 0x3fd   : > { %7291 = vst [vmem:[%s11361_s24 + $0xc0] sm:$0xff] %v7259_v59  ;;  %v7262_v27 = vmax.f32 %v7230_v22, 0.0  ;;  %v7228_v49 = vadd.f32 %v11347_v46, %v7127_v1  ;;  %v7132_v40 = vadd.f32 %v9079_v14, %v6762_v33 }
 0x3fe   : > { %v7087_v13 = vpop.f32.mrf.mxu1 }
 0x3ff   : > { %7294 = vst [vmem:[%s11361_s24 + $0xd8] sm:$0xff] %v7262_v27  ;;  %v7260_v3 = vmax.f32 %v7228_v49, 0.0  ;;  %v7233_v35 = vadd.f32 %v11347_v46, %v7132_v40  ;;  %v7130_v15 = vadd.f32 %v7087_v13, %v6760_v56 }
 0x400   : > { %v9080_v0 = vpop.f32.mrf.mxu1 }
 0x401   : > { %7292 = vst [vmem:[%s11361_s24 + $0xc8] sm:$0xff] %v7260_v3  ;;  %v7265_v54 = vmax.f32 %v7233_v35, 0.0  ;;  %v7231_v6 = vadd.f32 %v11347_v46, %v7130_v15  ;;  %v7133_v5 = vadd.f32 %v9080_v0, %v6763_v30 }
 0x402   : > { %v7090_v60 = vpop.f32.mrf.mxu1 }
 0x403   : > { %7297 = vst [vmem:[%s11361_s24 + $0xf0] sm:$0xff] %v7265_v54  ;;  %v7263_v8 = vmax.f32 %v7231_v6, 0.0  ;;  %v7234_v36 = vadd.f32 %v11347_v46, %v7133_v5  ;;  %v7131_v4 = vadd.f32 %v7090_v60, %v6761_v16 }
 0x405   : > { %7295 = vst [vmem:[%s11361_s24 + $0xe0] sm:$0xff] %v7263_v8  ;;  %v7266_v18 = vmax.f32 %v7234_v36, 0.0  ;;  %v7232_v17 = vadd.f32 %v11347_v46, %v7131_v4 }
 0x407   : > { %7298 = vst [vmem:[%s11361_s24 + $0xf8] sm:$0xff] %v7266_v18  ;;  %v7264_v62 = vmax.f32 %v7232_v17, 0.0 }
 0x409   : > { %7296 = vst [vmem:[%s11361_s24 + $0xe8] sm:$0xff] %v7264_v62 }
 0x40a PF: > { %s13_s12 = sadd.s32 1, %s9242_s12  }
 0x40b   : > { %p10_p4 = scmp.ge.s32.totalorder %s13_s12, 4  }
 0x40d   :  { %12 = sbr.rel (!%p10_p4) target bundleno = 1 (0x1), region = 81 }

</bundles_post_ra>
